<compile_context>
chip_gen: v6e
topology: v6e:2x2x1
jax: 0.10.0
libtpu: 0.0.40
codegen_flags: <defaults>
</compile_context>

<pallas_src>
import jax
import jax.numpy as jnp
from jax.experimental import pallas as pl
from jax.experimental.pallas import tpu as pltpu

_EPS = 1e-5  # PyTorch BatchNorm2d default


# ---------------------------------------------------------------------------
# in-kernel helpers (called at trace time)
# ---------------------------------------------------------------------------
def _pad_into(pad_ref, interior):
    """Write `interior` (N,H,W,C) into pad_ref (N,H+2,W+2,C), zeroing only the
    1-element halo (interior written once, no full zero-fill)."""
    n, hp2, wp2, c = pad_ref.shape
    h, w = hp2 - 2, wp2 - 2
    z_row = jnp.zeros((n, 1, wp2, c), jnp.float32)
    z_col = jnp.zeros((n, hp2, 1, c), jnp.float32)
    pad_ref[:, 0:1, :, :] = z_row
    pad_ref[:, h + 1:h + 2, :, :] = z_row
    pad_ref[:, :, 0:1, :] = z_col
    pad_ref[:, :, w + 1:w + 2, :] = z_col
    pad_ref[:, 1:h + 1, 1:w + 1, :] = interior


def _im2col_into(col_ref, pad_ref):
    """Build the (N*H*W, 9*C) im2col matrix in bf16 (taps written pre-cast)."""
    n, hp2, wp2, c = pad_ref.shape
    h, w = hp2 - 2, wp2 - 2
    nhw = n * h * w
    for t in range(9):
        ky, kx = divmod(t, 3)
        tap = pad_ref[:, ky:ky + h, kx:kx + w, :].reshape(nhw, c)
        col_ref[:, t * c:(t + 1) * c] = tap.astype(jnp.bfloat16)


def _bn_relu(a, gamma, beta, cnt):
    """Training-mode BatchNorm (biased batch variance) + ReLU on a (M, C)
    pre-activation whose rows span the whole (N,H,W) batch."""
    s = jnp.sum(a, axis=0, keepdims=True)            # (1, C)
    ss = jnp.sum(a * a, axis=0, keepdims=True)       # (1, C)
    mean = s / cnt
    var = jnp.maximum(ss / cnt - mean * mean, 0.0)
    scale = gamma * jax.lax.rsqrt(var + _EPS)
    shift = beta - mean * scale
    return jnp.maximum(a * scale + shift, 0.0)


# ---------------------------------------------------------------------------
# fused kernel: MaxPool2d(2) -> conv1 -> BN1 -> ReLU -> conv2 -> BN2 -> ReLU
#               -> SELayer, whole batch per grid step
# ---------------------------------------------------------------------------
def _encoder_block_kernel(xg_ref, w1_ref, w2_ref, g1_ref, b1_ref, g2_ref,
                          b2_ref, s1_ref, s2_ref, out_ref,
                          pad1_ref, col1_ref, pad2_ref, col2_ref):
    # xg_ref : (N, H, 2, W, 2*Cin) f32  pool windows grouped by a pure reshape
    # w1_ref : (9*Cin, C) bf16          conv1 im2col weight slab
    # w2_ref : (9*C,  C) bf16           conv2 im2col weight slab
    # g*/b*  : (1, C) f32               BatchNorm affine params
    # s1_ref : (Cr, C) f32              SE fc1 weight (PyTorch layout)
    # s2_ref : (C, Cr) f32              SE fc2 weight (PyTorch layout)
    # out_ref: (N, H*W, C) f32
    # pad*   : (N, H+2, W+2, c) f32     padded-halo scratch
    # col*   : (N*H*W, 9*c) bf16        im2col scratch
    n, hp2, wp2, cin = pad1_ref.shape
    h, w = hp2 - 2, wp2 - 2
    c = g1_ref.shape[-1]
    nhw = n * h * w
    cnt = float(nhw)

    # ---- MaxPool2d(2): rows split on axis 2, cols interleaved in last axis --
    rows = jnp.maximum(xg_ref[:, :, 0, :, :], xg_ref[:, :, 1, :, :])   # (N,H,W,2Cin)
    pooled = jnp.maximum(rows[..., :cin], rows[..., cin:])             # (N,H,W,Cin)

    # ---- conv1: halo-pad + im2col + ONE MXU matmul (M = N*H*W) --------------
    _pad_into(pad1_ref, pooled)
    _im2col_into(col1_ref, pad1_ref)
    a1 = jnp.dot(col1_ref[...], w1_ref[...],
                 preferred_element_type=jnp.float32)                   # (NHW, C)

    # ---- BN1 (batch stats, in-kernel) + ReLU --------------------------------
    h1 = _bn_relu(a1, g1_ref[...], b1_ref[...], cnt)                   # (NHW, C)

    # ---- conv2 ---------------------------------------------------------------
    _pad_into(pad2_ref, h1.reshape(n, h, w, c))
    _im2col_into(col2_ref, pad2_ref)
    a2 = jnp.dot(col2_ref[...], w2_ref[...],
                 preferred_element_type=jnp.float32)                   # (NHW, C)

    # ---- BN2 + ReLU ----------------------------------------------------------
    h2 = _bn_relu(a2, g2_ref[...], b2_ref[...], cnt)                   # (NHW, C)

    # ---- SELayer: per-sample avgpool -> FC -> ReLU -> FC -> sigmoid -> scale -
    h2s = h2.reshape(n, h * w, c)                                      # (N, HW, C)
    y = jnp.sum(h2s, axis=1) / float(h * w)                            # (N, C)
    # FC layers on the VPU (broadcast-mul + minor-axis reduce); M=N MXU
    # matmuls would be pure fill/drain.
    z = jnp.maximum(
        jnp.sum(y[:, None, :] * s1_ref[...][None, :, :], axis=-1), 0.0)   # (N, Cr)
    gate = jax.nn.sigmoid(
        jnp.sum(z[:, None, :] * s2_ref[...][None, :, :], axis=-1))        # (N, C)

    out_ref[...] = h2s * gate[:, None, :]


# ---------------------------------------------------------------------------
# wrapper
# ---------------------------------------------------------------------------
def encoder_block(x_nchw, params):
    """Encoder_Block(first=False): MaxPool2d(2) -> (conv3x3-BN-ReLU)x2 -> SE.
    Input NCHW, output NCHW (float32)."""
    N, Cin, H0, W0 = x_nchw.shape
    H, W = H0 // 2, W0 // 2
    w1, w2, g1, b1, g2, b2, s1, s2 = params
    C = w1.shape[-1]
    Cr = s1.shape[0]

    # NCHW -> NHWC once; a *pure reshape* then groups every 2x2 pooling window
    # (rows on a size-2 axis, columns interleaved in the last axis).
    x = jnp.transpose(x_nchw, (0, 2, 3, 1)).astype(jnp.float32)
    xg = x.reshape(N, H, 2, W, 2 * Cin)

    # conv weights as single im2col slabs; bf16 operands (f32 accumulation).
    w1b = w1.reshape(9 * Cin, C).astype(jnp.bfloat16)
    w2b = w2.reshape(9 * C, C).astype(jnp.bfloat16)
    g1r = g1.reshape(1, C).astype(jnp.float32)
    b1r = b1.reshape(1, C).astype(jnp.float32)
    g2r = g2.reshape(1, C).astype(jnp.float32)
    b2r = b2.reshape(1, C).astype(jnp.float32)
    s1f = s1.astype(jnp.float32)      # (Cr, C)  fc1 weight
    s2f = s2.astype(jnp.float32)      # (C, Cr)  fc2 weight

    out = pl.pallas_call(
        _encoder_block_kernel,
        grid=(1,),
        in_specs=[
            pl.BlockSpec((N, H, 2, W, 2 * Cin), lambda i: (0, 0, 0, 0, 0)),
            pl.BlockSpec((9 * Cin, C), lambda i: (0, 0)),
            pl.BlockSpec((9 * C, C), lambda i: (0, 0)),
            pl.BlockSpec((1, C), lambda i: (0, 0)),
            pl.BlockSpec((1, C), lambda i: (0, 0)),
            pl.BlockSpec((1, C), lambda i: (0, 0)),
            pl.BlockSpec((1, C), lambda i: (0, 0)),
            pl.BlockSpec((Cr, C), lambda i: (0, 0)),
            pl.BlockSpec((C, Cr), lambda i: (0, 0)),
        ],
        out_specs=pl.BlockSpec((N, H * W, C), lambda i: (0, 0, 0)),
        out_shape=jax.ShapeDtypeStruct((N, H * W, C), jnp.float32),
        scratch_shapes=[
            pltpu.VMEM((N, H + 2, W + 2, Cin), jnp.float32),
            pltpu.VMEM((N * H * W, 9 * Cin), jnp.bfloat16),
            pltpu.VMEM((N, H + 2, W + 2, C), jnp.float32),
            pltpu.VMEM((N * H * W, 9 * C), jnp.bfloat16),
        ],
        compiler_params=pltpu.CompilerParams(
            dimension_semantics=("arbitrary",),
            vmem_limit_bytes=32 * 1024 * 1024,
        ),
    )(xg, w1b, w2b, g1r, b1r, g2r, b2r, s1f, s2f)

    return jnp.transpose(out.reshape(N, H, W, C), (0, 3, 1, 2))


def init_params(key, in_channels, out_channels, reduction=16):
    """Deterministic synthetic parameters (shapes follow the PyTorch module)."""
    cr = max(out_channels // reduction, 1)
    ks = jax.random.split(key, 4)
    # conv weights stored as (ky, kx, Cin, Cout)
    w1 = jax.random.normal(ks[0], (3, 3, in_channels, out_channels), jnp.float32) * 0.1
    w2 = jax.random.normal(ks[1], (3, 3, out_channels, out_channels), jnp.float32) * 0.05
    # BatchNorm affine params (PyTorch default init: gamma=1, beta=0)
    g1 = jnp.ones((out_channels,), jnp.float32)
    b1 = jnp.zeros((out_channels,), jnp.float32)
    g2 = jnp.ones((out_channels,), jnp.float32)
    b2 = jnp.zeros((out_channels,), jnp.float32)
    # SE fully-connected weights (bias=False), PyTorch Linear layouts
    s1 = jax.random.normal(ks[2], (cr, out_channels), jnp.float32) * 0.1   # fc1: (Cr, C)
    s2 = jax.random.normal(ks[3], (out_channels, cr), jnp.float32) * 0.1   # fc2: (C, Cr)
    return (w1, w2, g1, b1, g2, b2, s1, s2)


if __name__ == "__main__":
    key = jax.random.PRNGKey(0)
    kx, kp = jax.random.split(key)
    # NCHW input, like PyTorch: batch=2, in_channels=4, 16x16 spatial
    x = jax.random.normal(kx, (2, 4, 16, 16), jnp.float32)
    params = init_params(kp, in_channels=4, out_channels=32)

    fwd = jax.jit(encoder_block)
    out = jax.block_until_ready(fwd(x, params))
    assert out.shape == (2, 32, 8, 8), out.shape
    assert out.dtype == jnp.float32
    assert bool(jnp.isfinite(out).all())
    print("KERNEL_OK")
</pallas_src>

<mosaic_0001>
module attributes {stable_mosaic.version = 11 : i64} {
  func.func @_encoder_block_kernel(%arg0: i32, %arg1: memref<2x8x2x8x8xf32, #tpu.memory_space<vmem>>, %arg2: memref<36x32xbf16, #tpu.memory_space<vmem>>, %arg3: memref<288x32xbf16, #tpu.memory_space<vmem>>, %arg4: memref<1x32xf32, #tpu.memory_space<vmem>>, %arg5: memref<1x32xf32, #tpu.memory_space<vmem>>, %arg6: memref<1x32xf32, #tpu.memory_space<vmem>>, %arg7: memref<1x32xf32, #tpu.memory_space<vmem>>, %arg8: memref<2x32xf32, #tpu.memory_space<vmem>>, %arg9: memref<32x2xf32, #tpu.memory_space<vmem>>, %arg10: memref<2x64x32xf32, #tpu.memory_space<vmem>>, %arg11: memref<2x10x10x4xf32, #tpu.memory_space<vmem>>, %arg12: memref<128x36xbf16, #tpu.memory_space<vmem>>, %arg13: memref<2x10x10x32xf32, #tpu.memory_space<vmem>>, %arg14: memref<128x288xbf16, #tpu.memory_space<vmem>>) attributes {dimension_semantics = [#tpu.dimension_semantics<arbitrary>], iteration_bounds = array<i64: 1>, scalar_prefetch = 0 : i64, scratch_operands = 4 : i64, tpu.core_type = #tpu.core_type<tc>, window_params = [{pipeline_mode = #tpu.pipeline_mode<synchronous>, transform_indices = @transform_0, window_bounds = array<i64: 2, 8, 2, 8, 8>}, {pipeline_mode = #tpu.pipeline_mode<synchronous>, transform_indices = @transform_1, window_bounds = array<i64: 36, 32>}, {pipeline_mode = #tpu.pipeline_mode<synchronous>, transform_indices = @transform_2, window_bounds = array<i64: 288, 32>}, {pipeline_mode = #tpu.pipeline_mode<synchronous>, transform_indices = @transform_3, window_bounds = array<i64: 1, 32>}, {pipeline_mode = #tpu.pipeline_mode<synchronous>, transform_indices = @transform_4, window_bounds = array<i64: 1, 32>}, {pipeline_mode = #tpu.pipeline_mode<synchronous>, transform_indices = @transform_5, window_bounds = array<i64: 1, 32>}, {pipeline_mode = #tpu.pipeline_mode<synchronous>, transform_indices = @transform_6, window_bounds = array<i64: 1, 32>}, {pipeline_mode = #tpu.pipeline_mode<synchronous>, transform_indices = @transform_7, window_bounds = array<i64: 2, 32>}, {pipeline_mode = #tpu.pipeline_mode<synchronous>, transform_indices = @transform_8, window_bounds = array<i64: 32, 2>}, {pipeline_mode = #tpu.pipeline_mode<synchronous>, transform_indices = @transform_9, window_bounds = array<i64: 2, 64, 32>}]} {
    %c0 = arith.constant 0 : index
    %c0_0 = arith.constant 0 : index
    %c0_1 = arith.constant 0 : index
    %c0_2 = arith.constant 0 : index
    %c0_3 = arith.constant 0 : index
    %0 = vector.load %arg1[%c0, %c0_0, %c0_1, %c0_2, %c0_3] : memref<2x8x2x8x8xf32, #tpu.memory_space<vmem>>, vector<2x8x1x8x8xf32>
    %1 = vector.shape_cast %0 : vector<2x8x1x8x8xf32> to vector<2x8x8x8xf32>
    %c0_4 = arith.constant 0 : index
    %c0_5 = arith.constant 0 : index
    %c1 = arith.constant 1 : index
    %c0_6 = arith.constant 0 : index
    %c0_7 = arith.constant 0 : index
    %2 = vector.load %arg1[%c0_4, %c0_5, %c1, %c0_6, %c0_7] : memref<2x8x2x8x8xf32, #tpu.memory_space<vmem>>, vector<2x8x1x8x8xf32>
    %3 = vector.shape_cast %2 : vector<2x8x1x8x8xf32> to vector<2x8x8x8xf32>
    %4 = arith.maximumf %1, %3 : vector<2x8x8x8xf32>
    %5 = vector.extract_strided_slice %4 {offsets = [0, 0, 0, 0], sizes = [2, 8, 8, 4], strides = [1, 1, 1, 1]} : vector<2x8x8x8xf32> to vector<2x8x8x4xf32>
    %6 = vector.extract_strided_slice %4 {offsets = [0, 0, 0, 4], sizes = [2, 8, 8, 4], strides = [1, 1, 1, 1]} : vector<2x8x8x8xf32> to vector<2x8x8x4xf32>
    %7 = arith.maximumf %5, %6 : vector<2x8x8x4xf32>
    %cst = arith.constant 0.000000e+00 : f32
    %8 = vector.broadcast %cst : f32 to vector<2x1x10x4xf32>
    %cst_8 = arith.constant 0.000000e+00 : f32
    %9 = vector.broadcast %cst_8 : f32 to vector<2x10x1x4xf32>
    %c0_9 = arith.constant 0 : index
    %c0_10 = arith.constant 0 : index
    %c0_11 = arith.constant 0 : index
    %c0_12 = arith.constant 0 : index
    %10 = vector.load %arg11[%c0_9, %c0_10, %c0_11, %c0_12] : memref<2x10x10x4xf32, #tpu.memory_space<vmem>>, vector<2x1x10x4xf32>
    tpu.vector_store %arg11[%c0_9, %c0_10, %c0_11, %c0_12], %8 {strides = array<i32>} : memref<2x10x10x4xf32, #tpu.memory_space<vmem>>, vector<2x1x10x4xf32>,
    %c0_13 = arith.constant 0 : index
    %c9 = arith.constant 9 : index
    %c0_14 = arith.constant 0 : index
    %c0_15 = arith.constant 0 : index
    %11 = vector.load %arg11[%c0_13, %c9, %c0_14, %c0_15] : memref<2x10x10x4xf32, #tpu.memory_space<vmem>>, vector<2x1x10x4xf32>
    tpu.vector_store %arg11[%c0_13, %c9, %c0_14, %c0_15], %8 {strides = array<i32>} : memref<2x10x10x4xf32, #tpu.memory_space<vmem>>, vector<2x1x10x4xf32>,
    %c0_16 = arith.constant 0 : index
    %c0_17 = arith.constant 0 : index
    %c0_18 = arith.constant 0 : index
    %c0_19 = arith.constant 0 : index
    %12 = vector.load %arg11[%c0_16, %c0_17, %c0_18, %c0_19] : memref<2x10x10x4xf32, #tpu.memory_space<vmem>>, vector<2x10x1x4xf32>
    tpu.vector_store %arg11[%c0_16, %c0_17, %c0_18, %c0_19], %9 {strides = array<i32>} : memref<2x10x10x4xf32, #tpu.memory_space<vmem>>, vector<2x10x1x4xf32>,
    %c0_20 = arith.constant 0 : index
    %c0_21 = arith.constant 0 : index
    %c9_22 = arith.constant 9 : index
    %c0_23 = arith.constant 0 : index
    %13 = vector.load %arg11[%c0_20, %c0_21, %c9_22, %c0_23] : memref<2x10x10x4xf32, #tpu.memory_space<vmem>>, vector<2x10x1x4xf32>
    tpu.vector_store %arg11[%c0_20, %c0_21, %c9_22, %c0_23], %9 {strides = array<i32>} : memref<2x10x10x4xf32, #tpu.memory_space<vmem>>, vector<2x10x1x4xf32>,
    %c0_24 = arith.constant 0 : index
    %c1_25 = arith.constant 1 : index
    %c1_26 = arith.constant 1 : index
    %c0_27 = arith.constant 0 : index
    %14 = vector.load %arg11[%c0_24, %c1_25, %c1_26, %c0_27] : memref<2x10x10x4xf32, #tpu.memory_space<vmem>>, vector<2x8x8x4xf32>
    tpu.vector_store %arg11[%c0_24, %c1_25, %c1_26, %c0_27], %7 {strides = array<i32>} : memref<2x10x10x4xf32, #tpu.memory_space<vmem>>, vector<2x8x8x4xf32>,
    %c0_28 = arith.constant 0 : index
    %c0_29 = arith.constant 0 : index
    %c0_30 = arith.constant 0 : index
    %c0_31 = arith.constant 0 : index
    %15 = vector.load %arg11[%c0_28, %c0_29, %c0_30, %c0_31] : memref<2x10x10x4xf32, #tpu.memory_space<vmem>>, vector<2x8x8x4xf32>
    %16 = vector.shape_cast %15 : vector<2x8x8x4xf32> to vector<128x4xf32>
    %17 = arith.truncf %16 : vector<128x4xf32> to vector<128x4xbf16>
    %c0_32 = arith.constant 0 : index
    %c0_33 = arith.constant 0 : index
    %18 = vector.load %arg12[%c0_32, %c0_33] : memref<128x36xbf16, #tpu.memory_space<vmem>>, vector<128x4xbf16>
    tpu.vector_store %arg12[%c0_32, %c0_33], %17 {strides = array<i32>} : memref<128x36xbf16, #tpu.memory_space<vmem>>, vector<128x4xbf16>,
    %c0_34 = arith.constant 0 : index
    %c0_35 = arith.constant 0 : index
    %c1_36 = arith.constant 1 : index
    %c0_37 = arith.constant 0 : index
    %19 = vector.load %arg11[%c0_34, %c0_35, %c1_36, %c0_37] : memref<2x10x10x4xf32, #tpu.memory_space<vmem>>, vector<2x8x8x4xf32>
    %20 = vector.shape_cast %19 : vector<2x8x8x4xf32> to vector<128x4xf32>
    %21 = arith.truncf %20 : vector<128x4xf32> to vector<128x4xbf16>
    %c0_38 = arith.constant 0 : index
    %c4 = arith.constant 4 : index
    %22 = vector.load %arg12[%c0_38, %c4] : memref<128x36xbf16, #tpu.memory_space<vmem>>, vector<128x4xbf16>
    tpu.vector_store %arg12[%c0_38, %c4], %21 {strides = array<i32>} : memref<128x36xbf16, #tpu.memory_space<vmem>>, vector<128x4xbf16>,
    %c0_39 = arith.constant 0 : index
    %c0_40 = arith.constant 0 : index
    %c2 = arith.constant 2 : index
    %c0_41 = arith.constant 0 : index
    %23 = vector.load %arg11[%c0_39, %c0_40, %c2, %c0_41] : memref<2x10x10x4xf32, #tpu.memory_space<vmem>>, vector<2x8x8x4xf32>
    %24 = vector.shape_cast %23 : vector<2x8x8x4xf32> to vector<128x4xf32>
    %25 = arith.truncf %24 : vector<128x4xf32> to vector<128x4xbf16>
    %c0_42 = arith.constant 0 : index
    %c8 = arith.constant 8 : index
    %26 = vector.load %arg12[%c0_42, %c8] : memref<128x36xbf16, #tpu.memory_space<vmem>>, vector<128x4xbf16>
    tpu.vector_store %arg12[%c0_42, %c8], %25 {strides = array<i32>} : memref<128x36xbf16, #tpu.memory_space<vmem>>, vector<128x4xbf16>,
    %c0_43 = arith.constant 0 : index
    %c1_44 = arith.constant 1 : index
    %c0_45 = arith.constant 0 : index
    %c0_46 = arith.constant 0 : index
    %27 = vector.load %arg11[%c0_43, %c1_44, %c0_45, %c0_46] : memref<2x10x10x4xf32, #tpu.memory_space<vmem>>, vector<2x8x8x4xf32>
    %28 = vector.shape_cast %27 : vector<2x8x8x4xf32> to vector<128x4xf32>
    %29 = arith.truncf %28 : vector<128x4xf32> to vector<128x4xbf16>
    %c0_47 = arith.constant 0 : index
    %c12 = arith.constant 12 : index
    %30 = vector.load %arg12[%c0_47, %c12] : memref<128x36xbf16, #tpu.memory_space<vmem>>, vector<128x4xbf16>
    tpu.vector_store %arg12[%c0_47, %c12], %29 {strides = array<i32>} : memref<128x36xbf16, #tpu.memory_space<vmem>>, vector<128x4xbf16>,
    %c0_48 = arith.constant 0 : index
    %c1_49 = arith.constant 1 : index
    %c1_50 = arith.constant 1 : index
    %c0_51 = arith.constant 0 : index
    %31 = vector.load %arg11[%c0_48, %c1_49, %c1_50, %c0_51] : memref<2x10x10x4xf32, #tpu.memory_space<vmem>>, vector<2x8x8x4xf32>
    %32 = vector.shape_cast %31 : vector<2x8x8x4xf32> to vector<128x4xf32>
    %33 = arith.truncf %32 : vector<128x4xf32> to vector<128x4xbf16>
    %c0_52 = arith.constant 0 : index
    %c16 = arith.constant 16 : index
    %34 = vector.load %arg12[%c0_52, %c16] : memref<128x36xbf16, #tpu.memory_space<vmem>>, vector<128x4xbf16>
    tpu.vector_store %arg12[%c0_52, %c16], %33 {strides = array<i32>} : memref<128x36xbf16, #tpu.memory_space<vmem>>, vector<128x4xbf16>,
    %c0_53 = arith.constant 0 : index
    %c1_54 = arith.constant 1 : index
    %c2_55 = arith.constant 2 : index
    %c0_56 = arith.constant 0 : index
    %35 = vector.load %arg11[%c0_53, %c1_54, %c2_55, %c0_56] : memref<2x10x10x4xf32, #tpu.memory_space<vmem>>, vector<2x8x8x4xf32>
    %36 = vector.shape_cast %35 : vector<2x8x8x4xf32> to vector<128x4xf32>
    %37 = arith.truncf %36 : vector<128x4xf32> to vector<128x4xbf16>
    %c0_57 = arith.constant 0 : index
    %c20 = arith.constant 20 : index
    %38 = vector.load %arg12[%c0_57, %c20] : memref<128x36xbf16, #tpu.memory_space<vmem>>, vector<128x4xbf16>
    tpu.vector_store %arg12[%c0_57, %c20], %37 {strides = array<i32>} : memref<128x36xbf16, #tpu.memory_space<vmem>>, vector<128x4xbf16>,
    %c0_58 = arith.constant 0 : index
    %c2_59 = arith.constant 2 : index
    %c0_60 = arith.constant 0 : index
    %c0_61 = arith.constant 0 : index
    %39 = vector.load %arg11[%c0_58, %c2_59, %c0_60, %c0_61] : memref<2x10x10x4xf32, #tpu.memory_space<vmem>>, vector<2x8x8x4xf32>
    %40 = vector.shape_cast %39 : vector<2x8x8x4xf32> to vector<128x4xf32>
    %41 = arith.truncf %40 : vector<128x4xf32> to vector<128x4xbf16>
    %c0_62 = arith.constant 0 : index
    %c24 = arith.constant 24 : index
    %42 = vector.load %arg12[%c0_62, %c24] : memref<128x36xbf16, #tpu.memory_space<vmem>>, vector<128x4xbf16>
    tpu.vector_store %arg12[%c0_62, %c24], %41 {strides = array<i32>} : memref<128x36xbf16, #tpu.memory_space<vmem>>, vector<128x4xbf16>,
    %c0_63 = arith.constant 0 : index
    %c2_64 = arith.constant 2 : index
    %c1_65 = arith.constant 1 : index
    %c0_66 = arith.constant 0 : index
    %43 = vector.load %arg11[%c0_63, %c2_64, %c1_65, %c0_66] : memref<2x10x10x4xf32, #tpu.memory_space<vmem>>, vector<2x8x8x4xf32>
    %44 = vector.shape_cast %43 : vector<2x8x8x4xf32> to vector<128x4xf32>
    %45 = arith.truncf %44 : vector<128x4xf32> to vector<128x4xbf16>
    %c0_67 = arith.constant 0 : index
    %c28 = arith.constant 28 : index
    %46 = vector.load %arg12[%c0_67, %c28] : memref<128x36xbf16, #tpu.memory_space<vmem>>, vector<128x4xbf16>
    tpu.vector_store %arg12[%c0_67, %c28], %45 {strides = array<i32>} : memref<128x36xbf16, #tpu.memory_space<vmem>>, vector<128x4xbf16>,
    %c0_68 = arith.constant 0 : index
    %c2_69 = arith.constant 2 : index
    %c2_70 = arith.constant 2 : index
    %c0_71 = arith.constant 0 : index
    %47 = vector.load %arg11[%c0_68, %c2_69, %c2_70, %c0_71] : memref<2x10x10x4xf32, #tpu.memory_space<vmem>>, vector<2x8x8x4xf32>
    %48 = vector.shape_cast %47 : vector<2x8x8x4xf32> to vector<128x4xf32>
    %49 = arith.truncf %48 : vector<128x4xf32> to vector<128x4xbf16>
    %c0_72 = arith.constant 0 : index
    %c32 = arith.constant 32 : index
    %50 = vector.load %arg12[%c0_72, %c32] : memref<128x36xbf16, #tpu.memory_space<vmem>>, vector<128x4xbf16>
    tpu.vector_store %arg12[%c0_72, %c32], %49 {strides = array<i32>} : memref<128x36xbf16, #tpu.memory_space<vmem>>, vector<128x4xbf16>,
    %c0_73 = arith.constant 0 : index
    %c0_74 = arith.constant 0 : index
    %51 = vector.load %arg12[%c0_73, %c0_74] : memref<128x36xbf16, #tpu.memory_space<vmem>>, vector<128x36xbf16>
    %c0_75 = arith.constant 0 : index
    %c0_76 = arith.constant 0 : index
    %52 = vector.load %arg2[%c0_75, %c0_76] : memref<36x32xbf16, #tpu.memory_space<vmem>>, vector<36x32xbf16>
    %cst_77 = arith.constant dense<0.000000e+00> : vector<128x32xf32>
    %53 = tpu.matmul %51, %52, %cst_77 {dimension_numbers = #tpu.dot_dimension_numbers<[1], [0], [0], [1], [0, 0, 1, 1], [], []>} : vector<128x36xbf16>, vector<36x32xbf16>, vector<128x32xf32> -> vector<128x32xf32>
    %c0_78 = arith.constant 0 : index
    %c0_79 = arith.constant 0 : index
    %54 = vector.load %arg4[%c0_78, %c0_79] : memref<1x32xf32, #tpu.memory_space<vmem>>, vector<1x32xf32>
    %c0_80 = arith.constant 0 : index
    %c0_81 = arith.constant 0 : index
    %55 = vector.load %arg5[%c0_80, %c0_81] : memref<1x32xf32, #tpu.memory_space<vmem>>, vector<1x32xf32>
    %cst_82 = arith.constant dense<0.000000e+00> : vector<32xf32>
    %56 = vector.multi_reduction <add>, %53, %cst_82 [0] : vector<128x32xf32> to vector<32xf32>
    %57 = vector.shape_cast %56 : vector<32xf32> to vector<1x32xf32>
    %58 = arith.mulf %53, %53 : vector<128x32xf32>
    %cst_83 = arith.constant dense<0.000000e+00> : vector<32xf32>
    %59 = vector.multi_reduction <add>, %58, %cst_83 [0] : vector<128x32xf32> to vector<32xf32>
    %60 = vector.shape_cast %59 : vector<32xf32> to vector<1x32xf32>
    %cst_84 = arith.constant 1.280000e+02 : f32
    %61 = vector.broadcast %cst_84 : f32 to vector<1x32xf32>
    %62 = arith.divf %57, %61 : vector<1x32xf32>
    %cst_85 = arith.constant 1.280000e+02 : f32
    %63 = vector.broadcast %cst_85 : f32 to vector<1x32xf32>
    %64 = arith.divf %60, %63 : vector<1x32xf32>
    %65 = arith.mulf %62, %62 : vector<1x32xf32>
    %66 = arith.subf %64, %65 : vector<1x32xf32>
    %cst_86 = arith.constant 0.000000e+00 : f32
    %67 = vector.broadcast %cst_86 : f32 to vector<1x32xf32>
    %68 = arith.maximumf %66, %67 : vector<1x32xf32>
    %cst_87 = arith.constant 9.99999974E-6 : f32
    %69 = vector.broadcast %cst_87 : f32 to vector<1x32xf32>
    %70 = arith.addf %68, %69 : vector<1x32xf32>
    %71 = math.rsqrt %70 : vector<1x32xf32>
    %72 = arith.mulf %54, %71 : vector<1x32xf32>
    %73 = arith.mulf %62, %72 : vector<1x32xf32>
    %74 = arith.subf %55, %73 : vector<1x32xf32>
    %75 = vector.broadcast %72 : vector<1x32xf32> to vector<128x32xf32>
    %76 = arith.mulf %53, %75 : vector<128x32xf32>
    %77 = vector.broadcast %74 : vector<1x32xf32> to vector<128x32xf32>
    %78 = arith.addf %76, %77 : vector<128x32xf32>
    %cst_88 = arith.constant 0.000000e+00 : f32
    %79 = vector.broadcast %cst_88 : f32 to vector<128x32xf32>
    %80 = arith.maximumf %78, %79 : vector<128x32xf32>
    %81 = vector.shape_cast %80 : vector<128x32xf32> to vector<2x8x8x32xf32>
    %cst_89 = arith.constant 0.000000e+00 : f32
    %82 = vector.broadcast %cst_89 : f32 to vector<2x1x10x32xf32>
    %cst_90 = arith.constant 0.000000e+00 : f32
    %83 = vector.broadcast %cst_90 : f32 to vector<2x10x1x32xf32>
    %c0_91 = arith.constant 0 : index
    %c0_92 = arith.constant 0 : index
    %c0_93 = arith.constant 0 : index
    %c0_94 = arith.constant 0 : index
    %84 = vector.load %arg13[%c0_91, %c0_92, %c0_93, %c0_94] : memref<2x10x10x32xf32, #tpu.memory_space<vmem>>, vector<2x1x10x32xf32>
    tpu.vector_store %arg13[%c0_91, %c0_92, %c0_93, %c0_94], %82 {strides = array<i32>} : memref<2x10x10x32xf32, #tpu.memory_space<vmem>>, vector<2x1x10x32xf32>,
    %c0_95 = arith.constant 0 : index
    %c9_96 = arith.constant 9 : index
    %c0_97 = arith.constant 0 : index
    %c0_98 = arith.constant 0 : index
    %85 = vector.load %arg13[%c0_95, %c9_96, %c0_97, %c0_98] : memref<2x10x10x32xf32, #tpu.memory_space<vmem>>, vector<2x1x10x32xf32>
    tpu.vector_store %arg13[%c0_95, %c9_96, %c0_97, %c0_98], %82 {strides = array<i32>} : memref<2x10x10x32xf32, #tpu.memory_space<vmem>>, vector<2x1x10x32xf32>,
    %c0_99 = arith.constant 0 : index
    %c0_100 = arith.constant 0 : index
    %c0_101 = arith.constant 0 : index
    %c0_102 = arith.constant 0 : index
    %86 = vector.load %arg13[%c0_99, %c0_100, %c0_101, %c0_102] : memref<2x10x10x32xf32, #tpu.memory_space<vmem>>, vector<2x10x1x32xf32>
    tpu.vector_store %arg13[%c0_99, %c0_100, %c0_101, %c0_102], %83 {strides = array<i32>} : memref<2x10x10x32xf32, #tpu.memory_space<vmem>>, vector<2x10x1x32xf32>,
    %c0_103 = arith.constant 0 : index
    %c0_104 = arith.constant 0 : index
    %c9_105 = arith.constant 9 : index
    %c0_106 = arith.constant 0 : index
    %87 = vector.load %arg13[%c0_103, %c0_104, %c9_105, %c0_106] : memref<2x10x10x32xf32, #tpu.memory_space<vmem>>, vector<2x10x1x32xf32>
    tpu.vector_store %arg13[%c0_103, %c0_104, %c9_105, %c0_106], %83 {strides = array<i32>} : memref<2x10x10x32xf32, #tpu.memory_space<vmem>>, vector<2x10x1x32xf32>,
    %c0_107 = arith.constant 0 : index
    %c1_108 = arith.constant 1 : index
    %c1_109 = arith.constant 1 : index
    %c0_110 = arith.constant 0 : index
    %88 = vector.load %arg13[%c0_107, %c1_108, %c1_109, %c0_110] : memref<2x10x10x32xf32, #tpu.memory_space<vmem>>, vector<2x8x8x32xf32>
    tpu.vector_store %arg13[%c0_107, %c1_108, %c1_109, %c0_110], %81 {strides = array<i32>} : memref<2x10x10x32xf32, #tpu.memory_space<vmem>>, vector<2x8x8x32xf32>,
    %c0_111 = arith.constant 0 : index
    %c0_112 = arith.constant 0 : index
    %c0_113 = arith.constant 0 : index
    %c0_114 = arith.constant 0 : index
    %89 = vector.load %arg13[%c0_111, %c0_112, %c0_113, %c0_114] : memref<2x10x10x32xf32, #tpu.memory_space<vmem>>, vector<2x8x8x32xf32>
    %90 = vector.shape_cast %89 : vector<2x8x8x32xf32> to vector<128x32xf32>
    %91 = arith.truncf %90 : vector<128x32xf32> to vector<128x32xbf16>
    %c0_115 = arith.constant 0 : index
    %c0_116 = arith.constant 0 : index
    %92 = vector.load %arg14[%c0_115, %c0_116] : memref<128x288xbf16, #tpu.memory_space<vmem>>, vector<128x32xbf16>
    tpu.vector_store %arg14[%c0_115, %c0_116], %91 {strides = array<i32>} : memref<128x288xbf16, #tpu.memory_space<vmem>>, vector<128x32xbf16>,
    %c0_117 = arith.constant 0 : index
    %c0_118 = arith.constant 0 : index
    %c1_119 = arith.constant 1 : index
    %c0_120 = arith.constant 0 : index
    %93 = vector.load %arg13[%c0_117, %c0_118, %c1_119, %c0_120] : memref<2x10x10x32xf32, #tpu.memory_space<vmem>>, vector<2x8x8x32xf32>
    %94 = vector.shape_cast %93 : vector<2x8x8x32xf32> to vector<128x32xf32>
    %95 = arith.truncf %94 : vector<128x32xf32> to vector<128x32xbf16>
    %c0_121 = arith.constant 0 : index
    %c32_122 = arith.constant 32 : index
    %96 = vector.load %arg14[%c0_121, %c32_122] : memref<128x288xbf16, #tpu.memory_space<vmem>>, vector<128x32xbf16>
    tpu.vector_store %arg14[%c0_121, %c32_122], %95 {strides = array<i32>} : memref<128x288xbf16, #tpu.memory_space<vmem>>, vector<128x32xbf16>,
    %c0_123 = arith.constant 0 : index
    %c0_124 = arith.constant 0 : index
    %c2_125 = arith.constant 2 : index
    %c0_126 = arith.constant 0 : index
    %97 = vector.load %arg13[%c0_123, %c0_124, %c2_125, %c0_126] : memref<2x10x10x32xf32, #tpu.memory_space<vmem>>, vector<2x8x8x32xf32>
    %98 = vector.shape_cast %97 : vector<2x8x8x32xf32> to vector<128x32xf32>
    %99 = arith.truncf %98 : vector<128x32xf32> to vector<128x32xbf16>
    %c0_127 = arith.constant 0 : index
    %c64 = arith.constant 64 : index
    %100 = vector.load %arg14[%c0_127, %c64] : memref<128x288xbf16, #tpu.memory_space<vmem>>, vector<128x32xbf16>
    tpu.vector_store %arg14[%c0_127, %c64], %99 {strides = array<i32>} : memref<128x288xbf16, #tpu.memory_space<vmem>>, vector<128x32xbf16>,
    %c0_128 = arith.constant 0 : index
    %c1_129 = arith.constant 1 : index
    %c0_130 = arith.constant 0 : index
    %c0_131 = arith.constant 0 : index
    %101 = vector.load %arg13[%c0_128, %c1_129, %c0_130, %c0_131] : memref<2x10x10x32xf32, #tpu.memory_space<vmem>>, vector<2x8x8x32xf32>
    %102 = vector.shape_cast %101 : vector<2x8x8x32xf32> to vector<128x32xf32>
    %103 = arith.truncf %102 : vector<128x32xf32> to vector<128x32xbf16>
    %c0_132 = arith.constant 0 : index
    %c96 = arith.constant 96 : index
    %104 = vector.load %arg14[%c0_132, %c96] : memref<128x288xbf16, #tpu.memory_space<vmem>>, vector<128x32xbf16>
    tpu.vector_store %arg14[%c0_132, %c96], %103 {strides = array<i32>} : memref<128x288xbf16, #tpu.memory_space<vmem>>, vector<128x32xbf16>,
    %c0_133 = arith.constant 0 : index
    %c1_134 = arith.constant 1 : index
    %c1_135 = arith.constant 1 : index
    %c0_136 = arith.constant 0 : index
    %105 = vector.load %arg13[%c0_133, %c1_134, %c1_135, %c0_136] : memref<2x10x10x32xf32, #tpu.memory_space<vmem>>, vector<2x8x8x32xf32>
    %106 = vector.shape_cast %105 : vector<2x8x8x32xf32> to vector<128x32xf32>
    %107 = arith.truncf %106 : vector<128x32xf32> to vector<128x32xbf16>
    %c0_137 = arith.constant 0 : index
    %c128 = arith.constant 128 : index
    %108 = vector.load %arg14[%c0_137, %c128] : memref<128x288xbf16, #tpu.memory_space<vmem>>, vector<128x32xbf16>
    tpu.vector_store %arg14[%c0_137, %c128], %107 {strides = array<i32>} : memref<128x288xbf16, #tpu.memory_space<vmem>>, vector<128x32xbf16>,
    %c0_138 = arith.constant 0 : index
    %c1_139 = arith.constant 1 : index
    %c2_140 = arith.constant 2 : index
    %c0_141 = arith.constant 0 : index
    %109 = vector.load %arg13[%c0_138, %c1_139, %c2_140, %c0_141] : memref<2x10x10x32xf32, #tpu.memory_space<vmem>>, vector<2x8x8x32xf32>
    %110 = vector.shape_cast %109 : vector<2x8x8x32xf32> to vector<128x32xf32>
    %111 = arith.truncf %110 : vector<128x32xf32> to vector<128x32xbf16>
    %c0_142 = arith.constant 0 : index
    %c160 = arith.constant 160 : index
    %112 = vector.load %arg14[%c0_142, %c160] : memref<128x288xbf16, #tpu.memory_space<vmem>>, vector<128x32xbf16>
    tpu.vector_store %arg14[%c0_142, %c160], %111 {strides = array<i32>} : memref<128x288xbf16, #tpu.memory_space<vmem>>, vector<128x32xbf16>,
    %c0_143 = arith.constant 0 : index
    %c2_144 = arith.constant 2 : index
    %c0_145 = arith.constant 0 : index
    %c0_146 = arith.constant 0 : index
    %113 = vector.load %arg13[%c0_143, %c2_144, %c0_145, %c0_146] : memref<2x10x10x32xf32, #tpu.memory_space<vmem>>, vector<2x8x8x32xf32>
    %114 = vector.shape_cast %113 : vector<2x8x8x32xf32> to vector<128x32xf32>
    %115 = arith.truncf %114 : vector<128x32xf32> to vector<128x32xbf16>
    %c0_147 = arith.constant 0 : index
    %c192 = arith.constant 192 : index
    %116 = vector.load %arg14[%c0_147, %c192] : memref<128x288xbf16, #tpu.memory_space<vmem>>, vector<128x32xbf16>
    tpu.vector_store %arg14[%c0_147, %c192], %115 {strides = array<i32>} : memref<128x288xbf16, #tpu.memory_space<vmem>>, vector<128x32xbf16>,
    %c0_148 = arith.constant 0 : index
    %c2_149 = arith.constant 2 : index
    %c1_150 = arith.constant 1 : index
    %c0_151 = arith.constant 0 : index
    %117 = vector.load %arg13[%c0_148, %c2_149, %c1_150, %c0_151] : memref<2x10x10x32xf32, #tpu.memory_space<vmem>>, vector<2x8x8x32xf32>
    %118 = vector.shape_cast %117 : vector<2x8x8x32xf32> to vector<128x32xf32>
    %119 = arith.truncf %118 : vector<128x32xf32> to vector<128x32xbf16>
    %c0_152 = arith.constant 0 : index
    %c224 = arith.constant 224 : index
    %120 = vector.load %arg14[%c0_152, %c224] : memref<128x288xbf16, #tpu.memory_space<vmem>>, vector<128x32xbf16>
    tpu.vector_store %arg14[%c0_152, %c224], %119 {strides = array<i32>} : memref<128x288xbf16, #tpu.memory_space<vmem>>, vector<128x32xbf16>,
    %c0_153 = arith.constant 0 : index
    %c2_154 = arith.constant 2 : index
    %c2_155 = arith.constant 2 : index
    %c0_156 = arith.constant 0 : index
    %121 = vector.load %arg13[%c0_153, %c2_154, %c2_155, %c0_156] : memref<2x10x10x32xf32, #tpu.memory_space<vmem>>, vector<2x8x8x32xf32>
    %122 = vector.shape_cast %121 : vector<2x8x8x32xf32> to vector<128x32xf32>
    %123 = arith.truncf %122 : vector<128x32xf32> to vector<128x32xbf16>
    %c0_157 = arith.constant 0 : index
    %c256 = arith.constant 256 : index
    %124 = vector.load %arg14[%c0_157, %c256] : memref<128x288xbf16, #tpu.memory_space<vmem>>, vector<128x32xbf16>
    tpu.vector_store %arg14[%c0_157, %c256], %123 {strides = array<i32>} : memref<128x288xbf16, #tpu.memory_space<vmem>>, vector<128x32xbf16>,
    %c0_158 = arith.constant 0 : index
    %c0_159 = arith.constant 0 : index
    %125 = vector.load %arg14[%c0_158, %c0_159] : memref<128x288xbf16, #tpu.memory_space<vmem>>, vector<128x288xbf16>
    %c0_160 = arith.constant 0 : index
    %c0_161 = arith.constant 0 : index
    %126 = vector.load %arg3[%c0_160, %c0_161] : memref<288x32xbf16, #tpu.memory_space<vmem>>, vector<288x32xbf16>
    %cst_162 = arith.constant dense<0.000000e+00> : vector<128x32xf32>
    %127 = tpu.matmul %125, %126, %cst_162 {dimension_numbers = #tpu.dot_dimension_numbers<[1], [0], [0], [1], [0, 0, 1, 1], [], []>} : vector<128x288xbf16>, vector<288x32xbf16>, vector<128x32xf32> -> vector<128x32xf32>
    %c0_163 = arith.constant 0 : index
    %c0_164 = arith.constant 0 : index
    %128 = vector.load %arg6[%c0_163, %c0_164] : memref<1x32xf32, #tpu.memory_space<vmem>>, vector<1x32xf32>
    %c0_165 = arith.constant 0 : index
    %c0_166 = arith.constant 0 : index
    %129 = vector.load %arg7[%c0_165, %c0_166] : memref<1x32xf32, #tpu.memory_space<vmem>>, vector<1x32xf32>
    %cst_167 = arith.constant dense<0.000000e+00> : vector<32xf32>
    %130 = vector.multi_reduction <add>, %127, %cst_167 [0] : vector<128x32xf32> to vector<32xf32>
    %131 = vector.shape_cast %130 : vector<32xf32> to vector<1x32xf32>
    %132 = arith.mulf %127, %127 : vector<128x32xf32>
    %cst_168 = arith.constant dense<0.000000e+00> : vector<32xf32>
    %133 = vector.multi_reduction <add>, %132, %cst_168 [0] : vector<128x32xf32> to vector<32xf32>
    %134 = vector.shape_cast %133 : vector<32xf32> to vector<1x32xf32>
    %cst_169 = arith.constant 1.280000e+02 : f32
    %135 = vector.broadcast %cst_169 : f32 to vector<1x32xf32>
    %136 = arith.divf %131, %135 : vector<1x32xf32>
    %cst_170 = arith.constant 1.280000e+02 : f32
    %137 = vector.broadcast %cst_170 : f32 to vector<1x32xf32>
    %138 = arith.divf %134, %137 : vector<1x32xf32>
    %139 = arith.mulf %136, %136 : vector<1x32xf32>
    %140 = arith.subf %138, %139 : vector<1x32xf32>
    %cst_171 = arith.constant 0.000000e+00 : f32
    %141 = vector.broadcast %cst_171 : f32 to vector<1x32xf32>
    %142 = arith.maximumf %140, %141 : vector<1x32xf32>
    %cst_172 = arith.constant 9.99999974E-6 : f32
    %143 = vector.broadcast %cst_172 : f32 to vector<1x32xf32>
    %144 = arith.addf %142, %143 : vector<1x32xf32>
    %145 = math.rsqrt %144 : vector<1x32xf32>
    %146 = arith.mulf %128, %145 : vector<1x32xf32>
    %147 = arith.mulf %136, %146 : vector<1x32xf32>
    %148 = arith.subf %129, %147 : vector<1x32xf32>
    %149 = vector.broadcast %146 : vector<1x32xf32> to vector<128x32xf32>
    %150 = arith.mulf %127, %149 : vector<128x32xf32>
    %151 = vector.broadcast %148 : vector<1x32xf32> to vector<128x32xf32>
    %152 = arith.addf %150, %151 : vector<128x32xf32>
    %cst_173 = arith.constant 0.000000e+00 : f32
    %153 = vector.broadcast %cst_173 : f32 to vector<128x32xf32>
    %154 = arith.maximumf %152, %153 : vector<128x32xf32>
    %155 = vector.shape_cast %154 : vector<128x32xf32> to vector<2x64x32xf32>
    %cst_174 = arith.constant dense<0.000000e+00> : vector<2x32xf32>
    %156 = vector.multi_reduction <add>, %155, %cst_174 [1] : vector<2x64x32xf32> to vector<2x32xf32>
    %cst_175 = arith.constant 6.400000e+01 : f32
    %157 = vector.broadcast %cst_175 : f32 to vector<2x32xf32>
    %158 = arith.divf %156, %157 : vector<2x32xf32>
    %159 = vector.shape_cast %158 : vector<2x32xf32> to vector<2x1x32xf32>
    %c0_176 = arith.constant 0 : index
    %c0_177 = arith.constant 0 : index
    %160 = vector.load %arg8[%c0_176, %c0_177] : memref<2x32xf32, #tpu.memory_space<vmem>>, vector<2x32xf32>
    %161 = vector.shape_cast %160 : vector<2x32xf32> to vector<1x2x32xf32>
    %162 = vector.broadcast %159 : vector<2x1x32xf32> to vector<2x2x32xf32>
    %163 = vector.broadcast %161 : vector<1x2x32xf32> to vector<2x2x32xf32>
    %164 = arith.mulf %162, %163 : vector<2x2x32xf32>
    %cst_178 = arith.constant dense<0.000000e+00> : vector<2x2xf32>
    %165 = vector.multi_reduction <add>, %164, %cst_178 [2] : vector<2x2x32xf32> to vector<2x2xf32>
    %cst_179 = arith.constant 0.000000e+00 : f32
    %166 = vector.broadcast %cst_179 : f32 to vector<2x2xf32>
    %167 = arith.maximumf %165, %166 : vector<2x2xf32>
    %168 = vector.shape_cast %167 : vector<2x2xf32> to vector<2x1x2xf32>
    %c0_180 = arith.constant 0 : index
    %c0_181 = arith.constant 0 : index
    %169 = vector.load %arg9[%c0_180, %c0_181] : memref<32x2xf32, #tpu.memory_space<vmem>>, vector<32x2xf32>
    %170 = vector.shape_cast %169 : vector<32x2xf32> to vector<1x32x2xf32>
    %171 = vector.broadcast %168 : vector<2x1x2xf32> to vector<2x32x2xf32>
    %172 = vector.broadcast %170 : vector<1x32x2xf32> to vector<2x32x2xf32>
    %173 = arith.mulf %171, %172 : vector<2x32x2xf32>
    %cst_182 = arith.constant dense<0.000000e+00> : vector<2x32xf32>
    %174 = vector.multi_reduction <add>, %173, %cst_182 [2] : vector<2x32x2xf32> to vector<2x32xf32>
    %175 = arith.negf %174 : vector<2x32xf32>
    %176 = math.exp %175 : vector<2x32xf32>
    %cst_183 = arith.constant 1.000000e+00 : f32
    %177 = vector.broadcast %cst_183 : f32 to vector<2x32xf32>
    %178 = arith.addf %177, %176 : vector<2x32xf32>
    %179 = arith.divf %177, %178 : vector<2x32xf32>
    %180 = vector.shape_cast %179 : vector<2x32xf32> to vector<2x1x32xf32>
    %181 = vector.broadcast %180 : vector<2x1x32xf32> to vector<2x64x32xf32>
    %182 = arith.mulf %155, %181 : vector<2x64x32xf32>
    %c0_184 = arith.constant 0 : index
    %c0_185 = arith.constant 0 : index
    %c0_186 = arith.constant 0 : index
    %183 = vector.load %arg10[%c0_184, %c0_185, %c0_186] : memref<2x64x32xf32, #tpu.memory_space<vmem>>, vector<2x64x32xf32>
    tpu.vector_store %arg10[%c0_184, %c0_185, %c0_186], %182 {strides = array<i32>} : memref<2x64x32xf32, #tpu.memory_space<vmem>>, vector<2x64x32xf32>,
    return
  }
  func.func @transform_0(%arg0: i32) -> (i32, i32, i32, i32, i32) {
    %c0_i32 = arith.constant 0 : i32
    %c0_i32_0 = arith.constant 0 : i32
    %c0_i32_1 = arith.constant 0 : i32
    %c0_i32_2 = arith.constant 0 : i32
    %c0_i32_3 = arith.constant 0 : i32
    %c0_i32_4 = arith.constant 0 : i32
    return %c0_i32, %c0_i32_0, %c0_i32_1, %c0_i32_2, %c0_i32_3 : i32, i32, i32, i32, i32
  }
  func.func @transform_1(%arg0: i32) -> (i32, i32) {
    %c0_i32 = arith.constant 0 : i32
    %c0_i32_0 = arith.constant 0 : i32
    %c0_i32_1 = arith.constant 0 : i32
    return %c0_i32, %c0_i32_0 : i32, i32
  }
  func.func @transform_2(%arg0: i32) -> (i32, i32) {
    %c0_i32 = arith.constant 0 : i32
    %c0_i32_0 = arith.constant 0 : i32
    %c0_i32_1 = arith.constant 0 : i32
    return %c0_i32, %c0_i32_0 : i32, i32
  }
  func.func @transform_3(%arg0: i32) -> (i32, i32) {
    %c0_i32 = arith.constant 0 : i32
    %c0_i32_0 = arith.constant 0 : i32
    %c0_i32_1 = arith.constant 0 : i32
    return %c0_i32, %c0_i32_0 : i32, i32
  }
  func.func @transform_4(%arg0: i32) -> (i32, i32) {
    %c0_i32 = arith.constant 0 : i32
    %c0_i32_0 = arith.constant 0 : i32
    %c0_i32_1 = arith.constant 0 : i32
    return %c0_i32, %c0_i32_0 : i32, i32
  }
  func.func @transform_5(%arg0: i32) -> (i32, i32) {
    %c0_i32 = arith.constant 0 : i32
    %c0_i32_0 = arith.constant 0 : i32
    %c0_i32_1 = arith.constant 0 : i32
    return %c0_i32, %c0_i32_0 : i32, i32
  }
  func.func @transform_6(%arg0: i32) -> (i32, i32) {
    %c0_i32 = arith.constant 0 : i32
    %c0_i32_0 = arith.constant 0 : i32
    %c0_i32_1 = arith.constant 0 : i32
    return %c0_i32, %c0_i32_0 : i32, i32
  }
  func.func @transform_7(%arg0: i32) -> (i32, i32) {
    %c0_i32 = arith.constant 0 : i32
    %c0_i32_0 = arith.constant 0 : i32
    %c0_i32_1 = arith.constant 0 : i32
    return %c0_i32, %c0_i32_0 : i32, i32
  }
  func.func @transform_8(%arg0: i32) -> (i32, i32) {
    %c0_i32 = arith.constant 0 : i32
    %c0_i32_0 = arith.constant 0 : i32
    %c0_i32_1 = arith.constant 0 : i32
    return %c0_i32, %c0_i32_0 : i32, i32
  }
  func.func @transform_9(%arg0: i32) -> (i32, i32, i32) {
    %c0_i32 = arith.constant 0 : i32
    %c0_i32_0 = arith.constant 0 : i32
    %c0_i32_1 = arith.constant 0 : i32
    %c0_i32_2 = arith.constant 0 : i32
    return %c0_i32, %c0_i32_0, %c0_i32_1 : i32, i32, i32
  }
}

</mosaic_0001>

<bundles_post_ra>
// kernel: encoder_block.1
= control target key start
LH: loop header
LB: loop body
LE: loop exit
PB: predicated region body
PF: predicated region fallthrough
CT: control target
= control target key end

     0   :  { %vm163_vm0 = vcmask 31744   ;;  %v5633_v7 = vmov 0.0   ;;  %vm165_vm1 = vcmask 25600   ;;  %vm174_vm2 = vcmask 24576   ;;  %s5634_s25 = smov 124   ;;  %s7950_s0 = inlined_call_operand.vmem [shape: f32[2,8,2,8,8], index: 0, kind: input, shape index: {}]   ;;  %s7951_s1 = inlined_call_operand.vmem [shape: bf16[36,32], index: 1, kind: input, shape index: {}]   ;;  %s7952_s2 = inlined_call_operand.vmem [shape: bf16[288,32], index: 2, kind: input, shape index: {}]   ;;  %s7953_s3 = inlined_call_operand.vmem [shape: f32[1,32], index: 3, kind: input, shape index: {}]   ;;  %s7954_s4 = inlined_call_operand.vmem [shape: f32[1,32], index: 4, kind: input, shape index: {}]   ;;  %s7955_s5 = inlined_call_operand.vmem [shape: f32[1,32], index: 5, kind: input, shape index: {}]   ;;  %s7956_s6 = inlined_call_operand.vmem [shape: f32[1,32], index: 6, kind: input, shape index: {}]   ;;  %s7957_s7 = inlined_call_operand.vmem [shape: f32[2,32], index: 7, kind: input, shape index: {}]   ;;  %s7958_s8 = inlined_call_operand.vmem [shape: f32[32,2], index: 8, kind: input, shape index: {}]   ;;  %s7959_s9 = inlined_call_operand.hbm [shape: f32[2,64,32], index: 9, kind: output, shape index: {}]  }
   0x1   :  { %v34_v0 = vld [vmem:[%s7950_s0] sm:$0xff]  ;;  %v4689_v1 = vld [vmem:[%s7950_s0 + $0x8] sm:$0xff]  ;;  %v35_v5 = vld [vmem:[%s7950_s0 + $0x10] sm:$0xff]  ;;  %164 = vst.msk [vmem:[#allocation2] sm:$0xff] %vm163_vm0, %v5633_v7 }
   0x2   :  { %v36_v2 = vld [vmem:[%s7950_s0 + $0x20] sm:$0xff]  ;;  %v5707_v3 = vmax.f32 %v34_v0, %v4689_v1  ;;  %v4691_v4 = vld [vmem:[%s7950_s0 + $0x28] sm:$0xff]  ;;  %v4690_v6 = vld [vmem:[%s7950_s0 + $0x18] sm:$0xff]  ;;  %167 = vst.msk [vmem:[#allocation2 + $0xa0] sm:$0xff] %vm163_vm0, %v5633_v7 }
   0x3   :  { %170 = vst.msk [vmem:[#allocation2 + $0x90] sm:$0xff] %vm163_vm0, %v5633_v7  ;;  %172 = vst.msk [vmem:[#allocation2 + $0x130] sm:$0xff] %vm163_vm0, %v5633_v7  ;;  %v5726_v8 = vmax.f32 %v36_v2, %v4691_v4  ;;  %v37_v9 = vld [vmem:[%s7950_s0 + $0x30] sm:$0xff]  ;;  %v4692_v10 = vld [vmem:[%s7950_s0 + $0x38] sm:$0xff]  ;;  %v5812_v11 = vmax.f32 %v35_v5, %v4690_v6 }
   0x4   :  { %166 = vst.msk [vmem:[#allocation2 + $0x8] sm:$0x3] %vm165_vm1, %v5633_v7  ;;  %168 = vst.msk [vmem:[#allocation2 + $0xa8] sm:$0x3] %vm165_vm1, %v5633_v7  ;;  %99 = vrot.lane.b32.xlu0 %v5707_v3, %s5634_s25  ;;  %v5824_v12 = vmax.f32 %v37_v9, %v4692_v10  ;;  %v38_v13 = vld [vmem:[%s7950_s0 + $0x40] sm:$0xff]  ;;  %v4693_v14 = vld [vmem:[%s7950_s0 + $0x48] sm:$0xff] }
   0x5   :  { %171 = vst.msk [vmem:[#allocation2 + $0x98] sm:$0x3] %vm165_vm1, %v5633_v7  ;;  %173 = vst.msk [vmem:[#allocation2 + $0x138] sm:$0x3] %vm165_vm1, %v5633_v7  ;;  %103 = vrot.lane.b32.xlu1 %v5726_v8, %s5634_s25  ;;  %v39_v15 = vld [vmem:[%s7950_s0 + $0x50] sm:$0xff]  ;;  %v4694_v16 = vld [vmem:[%s7950_s0 + $0x58] sm:$0xff]  ;;  %v5840_v17 = vmax.f32 %v38_v13, %v4693_v14 }
   0x6   :  { %175 = vst.msk [vmem:[#allocation2] sm:$0x1] %vm174_vm2, %v5633_v7  ;;  %176 = vst.msk [vmem:[#allocation2 + $0x10] sm:$0x1] %vm174_vm2, %v5633_v7  ;;  %v5844_v18 = vmax.f32 %v39_v15, %v4694_v16  ;;  %v40_v19 = vld [vmem:[%s7950_s0 + $0x60] sm:$0xff]  ;;  %v4695_v20 = vld [vmem:[%s7950_s0 + $0x68] sm:$0xff] }
   0x7   :  { %177 = vst.msk [vmem:[#allocation2 + $0x20] sm:$0x1] %vm174_vm2, %v5633_v7  ;;  %178 = vst.msk [vmem:[#allocation2 + $0x30] sm:$0x1] %vm174_vm2, %v5633_v7  ;;  %v41_v21 = vld [vmem:[%s7950_s0 + $0x70] sm:$0xff]  ;;  %v4696_v22 = vld [vmem:[%s7950_s0 + $0x78] sm:$0xff]  ;;  %v5866_v25 = vmax.f32 %v40_v19, %v4695_v20 }
   0x8   :  { %179 = vst.msk [vmem:[#allocation2 + $0x40] sm:$0x1] %vm174_vm2, %v5633_v7  ;;  %180 = vst.msk [vmem:[#allocation2 + $0x50] sm:$0x1] %vm174_vm2, %v5633_v7  ;;  %101 = vrot.lane.b32.xlu0 %v5812_v11, %s5634_s25  ;;  %v42_v23 = vld [vmem:[%s7950_s0 + $0x80] sm:$0xff]  ;;  %v4697_v24 = vld [vmem:[%s7950_s0 + $0x88] sm:$0xff]  ;;  %v5873_v27 = vmax.f32 %v41_v21, %v4696_v22 }
   0x9   :  { %181 = vst.msk [vmem:[#allocation2 + $0x60] sm:$0x1] %vm174_vm2, %v5633_v7  ;;  %182 = vst.msk [vmem:[#allocation2 + $0x70] sm:$0x1] %vm174_vm2, %v5633_v7  ;;  %105 = vrot.lane.b32.xlu1 %v5824_v12, %s5634_s25  ;;  %v43_v26 = vld [vmem:[%s7950_s0 + $0x90] sm:$0xff]  ;;  %v4698_v28 = vld [vmem:[%s7950_s0 + $0x98] sm:$0xff]  ;;  %v5886_v31 = vmax.f32 %v42_v23, %v4697_v24 }
   0xa   :  { %183 = vst.msk [vmem:[#allocation2 + $0x80] sm:$0x1] %vm174_vm2, %v5633_v7  ;;  %184 = vst.msk [vmem:[#allocation2 + $0x90] sm:$0x1] %vm174_vm2, %v5633_v7  ;;  %v44_v29 = vld [vmem:[%s7950_s0 + $0xa0] sm:$0xff]  ;;  %v4699_v30 = vld [vmem:[%s7950_s0 + $0xa8] sm:$0xff]  ;;  %v5896_v34 = vmax.f32 %v43_v26, %v4698_v28 }
   0xb   :  { %185 = vst.msk [vmem:[#allocation2 + $0xa0] sm:$0x1] %vm174_vm2, %v5633_v7  ;;  %186 = vst.msk [vmem:[#allocation2 + $0xb0] sm:$0x1] %vm174_vm2, %v5633_v7  ;;  %v45_v32 = vld [vmem:[%s7950_s0 + $0xb0] sm:$0xff]  ;;  %v4700_v33 = vld [vmem:[%s7950_s0 + $0xb8] sm:$0xff]  ;;  %v5906_v37 = vmax.f32 %v44_v29, %v4699_v30 }
   0xc   :  { %187 = vst.msk [vmem:[#allocation2 + $0xc0] sm:$0x1] %vm174_vm2, %v5633_v7  ;;  %188 = vst.msk [vmem:[#allocation2 + $0xd0] sm:$0x1] %vm174_vm2, %v5633_v7  ;;  %107 = vrot.lane.b32.xlu0 %v5840_v17, %s5634_s25  ;;  %v46_v35 = vld [vmem:[%s7950_s0 + $0xc0] sm:$0xff]  ;;  %v4701_v36 = vld [vmem:[%s7950_s0 + $0xc8] sm:$0xff]  ;;  %v5913_v39 = vmax.f32 %v45_v32, %v4700_v33 }
   0xd   :  { %189 = vst.msk [vmem:[#allocation2 + $0xe0] sm:$0x1] %vm174_vm2, %v5633_v7  ;;  %190 = vst.msk [vmem:[#allocation2 + $0xf0] sm:$0x1] %vm174_vm2, %v5633_v7  ;;  %109 = vrot.lane.b32.xlu1 %v5844_v18, %s5634_s25  ;;  %v47_v38 = vld [vmem:[%s7950_s0 + $0xd0] sm:$0xff]  ;;  %v4702_v40 = vld [vmem:[%s7950_s0 + $0xd8] sm:$0xff]  ;;  %v5926_v43 = vmax.f32 %v46_v35, %v4701_v36 }
   0xe   :  { %191 = vst.msk [vmem:[#allocation2 + $0x100] sm:$0x1] %vm174_vm2, %v5633_v7  ;;  %192 = vst.msk [vmem:[#allocation2 + $0x110] sm:$0x1] %vm174_vm2, %v5633_v7  ;;  %v48_v41 = vld [vmem:[%s7950_s0 + $0xe0] sm:$0xff]  ;;  %v4703_v42 = vld [vmem:[%s7950_s0 + $0xe8] sm:$0xff]  ;;  %v5936_v46 = vmax.f32 %v47_v38, %v4702_v40 }
   0xf   :  { %193 = vst.msk [vmem:[#allocation2 + $0x120] sm:$0x1] %vm174_vm2, %v5633_v7  ;;  %194 = vst.msk [vmem:[#allocation2 + $0x130] sm:$0x1] %vm174_vm2, %v5633_v7  ;;  %v49_v44 = vld [vmem:[%s7950_s0 + $0xf0] sm:$0xff]  ;;  %v4704_v45 = vld [vmem:[%s7950_s0 + $0xf8] sm:$0xff] }
  0x10   :  { %196 = vst.msk [vmem:[#allocation2 + $0x19] sm:$0x1] %vm174_vm2, %v5633_v7  ;;  %197 = vst.msk [vmem:[#allocation2 + $0x29] sm:$0x1] %vm174_vm2, %v5633_v7  ;;  %111 = vrot.lane.b32.xlu0 %v5866_v25, %s5634_s25 }
  0x11   :  { %198 = vst.msk [vmem:[#allocation2 + $0x39] sm:$0x1] %vm174_vm2, %v5633_v7  ;;  %199 = vst.msk [vmem:[#allocation2 + $0x49] sm:$0x1] %vm174_vm2, %v5633_v7  ;;  %113 = vrot.lane.b32.xlu1 %v5873_v27, %s5634_s25 }
  0x12   :  { %200 = vst.msk [vmem:[#allocation2 + $0x59] sm:$0x1] %vm174_vm2, %v5633_v7  ;;  %201 = vst.msk [vmem:[#allocation2 + $0x69] sm:$0x1] %vm174_vm2, %v5633_v7 }
  0x13   :  { %202 = vst.msk [vmem:[#allocation2 + $0x79] sm:$0x1] %vm174_vm2, %v5633_v7  ;;  %203 = vst.msk [vmem:[#allocation2 + $0x89] sm:$0x1] %vm174_vm2, %v5633_v7 }
  0x14   :  { %206 = vst.msk [vmem:[#allocation2 + $0xb9] sm:$0x1] %vm174_vm2, %v5633_v7  ;;  %207 = vst.msk [vmem:[#allocation2 + $0xc9] sm:$0x1] %vm174_vm2, %v5633_v7  ;;  %115 = vrot.lane.b32.xlu0 %v5886_v31, %s5634_s25 }
  0x15   :  { %208 = vst.msk [vmem:[#allocation2 + $0xd9] sm:$0x1] %vm174_vm2, %v5633_v7  ;;  %209 = vst.msk [vmem:[#allocation2 + $0xe9] sm:$0x1] %vm174_vm2, %v5633_v7  ;;  %117 = vrot.lane.b32.xlu1 %v5896_v34, %s5634_s25 }
  0x16   :  { %210 = vst.msk [vmem:[#allocation2 + $0xf9] sm:$0x1] %vm174_vm2, %v5633_v7  ;;  %211 = vst.msk [vmem:[#allocation2 + $0x109] sm:$0x1] %vm174_vm2, %v5633_v7 }
  0x17   :  { %212 = vst.msk [vmem:[#allocation2 + $0x119] sm:$0x1] %vm174_vm2, %v5633_v7  ;;  %213 = vst.msk [vmem:[#allocation2 + $0x129] sm:$0x1] %vm174_vm2, %v5633_v7 }
  0x18   :  { %195 = vst.msk [vmem:[#allocation2 + $0x9] sm:$0x1] %vm174_vm2, %v5633_v7  ;;  %204 = vst.msk [vmem:[#allocation2 + $0x99] sm:$0x1] %vm174_vm2, %v5633_v7  ;;  %119 = vrot.lane.b32.xlu0 %v5906_v37, %s5634_s25 }
  0x19   :  { %205 = vst.msk [vmem:[#allocation2 + $0xa9] sm:$0x1] %vm174_vm2, %v5633_v7  ;;  %214 = vst.msk [vmem:[#allocation2 + $0x139] sm:$0x1] %vm174_vm2, %v5633_v7  ;;  %121 = vrot.lane.b32.xlu1 %v5913_v39, %s5634_s25 }
  0x1a   :  { %14 = vsyncpa [#allocation7], 0  ;;  %v5940_v47 = vmax.f32 %v48_v41, %v4703_v42  ;;  %v5944_v48 = vmax.f32 %v49_v44, %v4704_v45  ;;  %v329_v49 = vld [vmem:[#allocation2 + $0x1] sm:$0xff]  ;;  %s5635_s0 = smov 4   ;;  %s5636_s13 = smov 8   ;;  %vm312_vm3 = vcmask 27648  }
  0x1b   :  { %v5086_v50 = vpack.c.bf16 %v329_v49, %v329_v49  ;;  %v232_v53 = vld [vmem:[#allocation2] sm:$0xff]  ;;  %vm441_vm4 = vcmask 60448   ;;  %s5638_s14 = smov 16   ;;  %vm570_vm5 = vcmask 93248   ;;  %s5639_s15 = smov 20   ;;  %vm1463_vm6 = vcmask 1041408  }
  0x1c   :  { %123 = vrot.lane.b32.xlu0 %v5926_v43, %s5634_s25  ;;  %v5070_v54 = vpack.c.bf16 %v232_v53, %v232_v53  ;;  %s5640_s16 = smov 24   ;;  %s5641_s17 = smov 28   ;;  %vm699_vm7 = vcmask 126048   ;;  %vm828_vm8 = vcmask 158848   ;;  %vm957_vm9 = vcmask 191648  }
  0x1d   :  { %125 = vrot.lane.b32.xlu1 %v5936_v46, %s5634_s25  ;;  %s5642_s22 = smov 32   ;;  %vm1087_vm10 = vcmask 224448   ;;  %vm1216_vm11 = vcmask 257248   ;;  %vm1345_vm12 = vcmask 290048   ;;  %vm1438_vm13 = vcmask 293888   ;;  %s5644_s26 = smov 96  }
  0x1e   :  { %313 = vst.msk [vmem:[#allocation3] sm:$0xf] %vm312_vm3, %v5070_v54  ;;  %vm1566_vm14 = vcmask 261120   ;;  %vm1729_vm15 = vcmask 254976   ;;  %vm1876_vm1 = vcmask 257024   ;;  %vm2005_vm2 = vcmask 519424  }
  0x1f   :  { %v458_v51 = vld [vmem:[#allocation2 + $0x2] sm:$0xff]  ;;  %1728 = vst.msk [vmem:[#allocation4] sm:$0xff] %vm1566_vm14, %v5633_v7  ;;  %1731 = vst.msk [vmem:[#allocation4 + $0xa0] sm:$0xff] %vm1566_vm14, %v5633_v7 }
  0x20   :  { %127 = vrot.lane.b32.xlu0 %v5940_v47, %s5634_s25  ;;  %v5102_v52 = vpack.c.bf16 %v458_v51, %v458_v51  ;;  %1734 = vst.msk [vmem:[#allocation4 + $0x90] sm:$0xff] %vm1566_vm14, %v5633_v7  ;;  %1736 = vst.msk [vmem:[#allocation4 + $0x130] sm:$0xff] %vm1566_vm14, %v5633_v7 }
  0x21   :  { %129 = vrot.lane.b32.xlu1 %v5944_v48, %s5634_s25  ;;  %s5637_s25 = smov 12   ;;  %1730 = vst.msk [vmem:[#allocation4 + $0x8] sm:$0x3] %vm1729_vm15, %v5633_v7  ;;  %1732 = vst.msk [vmem:[#allocation4 + $0xa8] sm:$0x3] %vm1729_vm15, %v5633_v7 }
  0x22   :  { %1735 = vst.msk [vmem:[#allocation4 + $0x98] sm:$0x3] %vm1729_vm15, %v5633_v7  ;;  %1737 = vst.msk [vmem:[#allocation4 + $0x138] sm:$0x3] %vm1729_vm15, %v5633_v7 }
  0x24   :  { %393 = vrot.lane.b32.xlu0 %v5086_v50, %s5635_s0 }
  0x28   :  { %522 = vrot.lane.b32.xlu0 %v5102_v52, %s5636_s13 }
  0x76   :  { %v100_v55 = vpop.permute.xlu0 %99 }
  0x77   :  { %v147_v56 = vmax.f32 %v5707_v3, %v100_v55  ;;  %v104_v57 = vpop.permute.xlu1 %103 }
  0x78   :  { %v149_v58 = vmax.f32 %v5726_v8, %v104_v57 }
  0x79   :  { %216 = vst.msk [vmem:[#allocation2 + $0x11] sm:$0xff] %vm163_vm0, %v147_v56 }
  0x7a   :  { %218 = vst.msk [vmem:[#allocation2 + $0x31] sm:$0xff] %vm163_vm0, %v149_v58  ;;  %v102_v59 = vpop.permute.xlu0 %101 }
  0x7b   :  { %v148_v60 = vmax.f32 %v5812_v11, %v102_v59  ;;  %v106_v61 = vpop.permute.xlu1 %105 }
  0x7c   :  { %v150_v62 = vmax.f32 %v5824_v12, %v106_v61 }
  0x7d   :  { %217 = vst.msk [vmem:[#allocation2 + $0x21] sm:$0xff] %vm163_vm0, %v148_v60 }
  0x7e   :  { %219 = vst.msk [vmem:[#allocation2 + $0x41] sm:$0xff] %vm163_vm0, %v150_v62  ;;  %v108_v63 = vpop.permute.xlu0 %107 }
  0x7f   :  { %v151_v0 = vmax.f32 %v5840_v17, %v108_v63  ;;  %v110_v1 = vpop.permute.xlu1 %109 }
  0x80   :  { %v330_v2 = vld [vmem:[#allocation2 + $0x11] sm:$0xff]  ;;  %v152_v4 = vmax.f32 %v5844_v18, %v110_v1 }
  0x81   :  { %v587_v3 = vld [vmem:[#allocation2 + $0x10] sm:$0xff]  ;;  %v5963_v5 = vpack.c.bf16 %v330_v2, %v330_v2  ;;  %220 = vst.msk [vmem:[#allocation2 + $0x51] sm:$0xff] %vm163_vm0, %v151_v0 }
  0x82   :  { %v332_v6 = vld [vmem:[#allocation2 + $0x31] sm:$0xff]  ;;  %v5118_v8 = vpack.c.bf16 %v587_v3, %v587_v3  ;;  %221 = vst.msk [vmem:[#allocation2 + $0x61] sm:$0xff] %vm163_vm0, %v152_v4  ;;  %v112_v11 = vpop.permute.xlu0 %111 }
  0x83   :  { %v589_v9 = vld [vmem:[#allocation2 + $0x30] sm:$0xff]  ;;  %395 = vrot.lane.b32.xlu1 %v5963_v5, %s5635_s0  ;;  %v5971_v12 = vpack.c.bf16 %v332_v6, %v332_v6  ;;  %v153_v13 = vmax.f32 %v5866_v25, %v112_v11  ;;  %v114_v14 = vpop.permute.xlu1 %113  ;;  %v5520_v11 = vld [vmem:[%s7951_s1 + $0x8] sm:$0xff]  }
  0x84   :  { %v5966_v10 = vpack.c.bf16 %v589_v9, %v589_v9  ;;  %314 = vst.msk [vmem:[#allocation3 + $0x4] sm:$0xf] %vm312_vm3, %v5118_v8  ;;  %v331_v15 = vld [vmem:[#allocation2 + $0x21] sm:$0xff]  ;;  %v154_v18 = vmax.f32 %v5873_v27, %v114_v14  ;;  %v459_v22 = vld [vmem:[#allocation2 + $0x12] sm:$0xff] }
  0x85   :  { %v460_v16 = vld [vmem:[#allocation2 + $0x22] sm:$0xff]  ;;  %v5978_v19 = vpack.c.bf16 %v331_v15, %v331_v15  ;;  %222 = vst.msk [vmem:[#allocation2 + $0x71] sm:$0xff] %vm163_vm0, %v153_v13  ;;  %v5998_v30 = vpack.c.bf16 %v459_v22, %v459_v22  ;;  %v461_v35 = vld [vmem:[#allocation2 + $0x32] sm:$0xff]  ;;  %v5519_v6 = vld [vmem:[%s7951_s1 + $0x10] ss:$0 sps:$4 sm:$0x33]  }
  0x86   :  { %v588_v17 = vld [vmem:[#allocation2 + $0x20] sm:$0xff]  ;;  %316 = vst.msk [vmem:[#allocation3 + $0xc] sm:$0xf] %vm312_vm3, %v5966_v10  ;;  %v116_v24 = vpop.permute.xlu0 %115  ;;  %v5990_v25 = vpack.c.bf16 %v460_v16, %v460_v16  ;;  %v6016_v42 = vpack.c.bf16 %v461_v35, %v461_v35  ;;  %v1465_v9 = vsel %vm1463_vm6, %v5519_v6, 0  ;;  %5501 = vmatprep.subr.msk.bf16.mxu0 %vm1463_vm6, %v5519_v6  ;;  %v1111_v35 = vld [vmem:[#allocation2 + $0x91] sm:$0xff]  ;;  %vm4433_vm6 = vcmask 1042434  }
  0x87   :  { %v5980_v20 = vpack.c.bf16 %v588_v17, %v588_v17  ;;  %v590_v21 = vld [vmem:[#allocation2 + $0x40] sm:$0xff]  ;;  %223 = vst.msk [vmem:[#allocation2 + $0x81] sm:$0xff] %vm163_vm0, %v154_v18  ;;  %399 = vrot.lane.b32.xlu1 %v5971_v12, %s5635_s0  ;;  %397 = vrot.lane.b32.xlu0 %v5978_v19, %s5635_s0  ;;  %v155_v26 = vmax.f32 %v5886_v31, %v116_v24  ;;  %v118_v27 = vpop.permute.xlu1 %117 }
  0x88   :  { %v5983_v23 = vpack.c.bf16 %v590_v21, %v590_v21  ;;  %v978_v28 = vld [vmem:[#allocation2 + $0x50] sm:$0xff]  ;;  %v156_v29 = vmax.f32 %v5896_v34, %v118_v27  ;;  %v719_v62 = vld [vmem:[#allocation2 + $0x41] sm:$0xff]  ;;  %5444 = vmatpush3.bf16.msra.mxu0 %v1465_v9 }
  0x89   :  { %315 = vst.msk [vmem:[#allocation3 + $0x8] sm:$0xf] %vm312_vm3, %v5980_v20  ;;  %v6000_v32 = vpack.c.bf16 %v978_v28, %v978_v28  ;;  %v592_v33 = vld [vmem:[#allocation2 + $0x60] sm:$0xff]  ;;  %v5137_v2 = vpack.c.bf16 %v719_v62, %v719_v62  ;;  %5445 = vmatprep.subr.bf16.mxu0 %v5520_v11  ;;  %v1236_v14 = vld [vmem:[#allocation2 + $0x52] sm:$0xff] }
  0x8a   :  { %317 = vst.msk [vmem:[#allocation3 + $0x10] sm:$0xf] %vm312_vm3, %v5983_v23  ;;  %v6003_v36 = vpack.c.bf16 %v592_v33, %v592_v33  ;;  %v120_v31 = vpop.permute.xlu0 %119  ;;  %v848_v4 = vld [vmem:[#allocation2 + $0x42] sm:$0xff]  ;;  %v5201_v17 = vpack.c.bf16 %v1236_v14, %v1236_v14 }
  0x8b   :  { %224 = vst.msk [vmem:[#allocation2 + $0xb1] sm:$0xff] %vm163_vm0, %v155_v26  ;;  %225 = vst.msk [vmem:[#allocation2 + $0xc1] sm:$0xff] %vm163_vm0, %v156_v29  ;;  %524 = vrot.lane.b32.xlu1 %v5998_v30, %s5636_s13  ;;  %526 = vrot.lane.b32.xlu0 %v5990_v25, %s5636_s13  ;;  %v157_v34 = vmax.f32 %v5906_v37, %v120_v31  ;;  %v122_v38 = vpop.permute.xlu1 %121  ;;  %v335_v13 = vld [vmem:[#allocation2 + $0x61] sm:$0xff]  ;;  %v982_v29 = vld [vmem:[#allocation2 + $0x90] sm:$0xff] }
  0x8c   :  { %318 = vst.msk [vmem:[#allocation3 + $0x14] sm:$0xf] %vm312_vm3, %v6000_v32  ;;  %v593_v40 = vld [vmem:[#allocation2 + $0x70] sm:$0xff]  ;;  %v158_v41 = vmax.f32 %v5913_v39, %v122_v38  ;;  %319 = vst.msk [vmem:[#allocation3 + $0x18] sm:$0xf] %vm312_vm3, %v6003_v36  ;;  %5446 = vmatpush3.bf16.msra.mxu0 %v5520_v11  ;;  %v5092_v15 = vpack.c.bf16 %v335_v13, %v335_v13  ;;  %v337_v31 = vld [vmem:[#allocation2 + $0xa1] sm:$0xff] }
  0x8d   :  { %v6018_v44 = vpack.c.bf16 %v593_v40, %v593_v40  ;;  %226 = vst.msk [vmem:[#allocation2 + $0xd1] sm:$0xff] %vm163_vm0, %v157_v34  ;;  %v336_v16 = vld [vmem:[#allocation2 + $0x71] sm:$0xff]  ;;  %v5094_v38 = vpack.c.bf16 %v337_v31, %v337_v31 }
  0x8e   :  { %227 = vst.msk [vmem:[#allocation2 + $0xe1] sm:$0xff] %vm163_vm0, %v158_v41  ;;  %v124_v45 = vpop.permute.xlu0 %123  ;;  %v5093_v18 = vpack.c.bf16 %v336_v16, %v336_v16  ;;  %v465_v21 = vld [vmem:[#allocation2 + $0x72] sm:$0xff]  ;;  %v852_v27 = vld [vmem:[#allocation2 + $0x82] sm:$0xff] }
  0x8f   :  { %528 = vrot.lane.b32.xlu1 %v6016_v42, %s5636_s13  ;;  %651 = vrot.lane.b32.xlu0 %v5118_v8, %s5637_s25  ;;  %v159_v37 = vmax.f32 %v5926_v43, %v124_v45  ;;  %v126_v39 = vpop.permute.xlu1 %125  ;;  %320 = vst.msk [vmem:[#allocation3 + $0x1c] sm:$0xf] %vm312_vm3, %v6018_v44  ;;  %v1107_v8 = vld [vmem:[#allocation2 + $0x51] sm:$0xff]  ;;  %v5109_v22 = vpack.c.bf16 %v465_v21, %v465_v21 }
  0x90   :  { %v160_v49 = vmax.f32 %v5936_v46, %v126_v39  ;;  %v5157_v28 = vpack.c.bf16 %v852_v27, %v852_v27 }
  0x91   :  { %228 = vst.msk [vmem:[#allocation2 + $0xf1] sm:$0xff] %vm163_vm0, %v159_v37 }
  0x92   :  { %v595_v50 = vld [vmem:[#allocation2 + $0xb0] sm:$0xff]  ;;  %v596_v52 = vld [vmem:[#allocation2 + $0xc0] sm:$0xff]  ;;  %229 = vst.msk [vmem:[#allocation2 + $0x101] sm:$0xff] %vm163_vm0, %v160_v49  ;;  %v128_v53 = vpop.permute.xlu0 %127 }
  0x93   :  { %v6030_v51 = vpack.c.bf16 %v595_v50, %v595_v50  ;;  %v6033_v54 = vpack.c.bf16 %v596_v52, %v596_v52  ;;  %653 = vrot.lane.b32.xlu1 %v5980_v20, %s5637_s25  ;;  %655 = vrot.lane.b32.xlu0 %v5966_v10, %s5637_s25  ;;  %v161_v43 = vmax.f32 %v5940_v47, %v128_v53  ;;  %v130_v46 = vpop.permute.xlu1 %129  ;;  %v339_v49 = vld [vmem:[#allocation2 + $0xc1] sm:$0xff]  ;;  %v467_v62 = vld [vmem:[#allocation2 + $0xb2] sm:$0xff] }
  0x94   :  { %v162_v55 = vmax.f32 %v5944_v48, %v130_v46  ;;  %v597_v56 = vld [vmem:[#allocation2 + $0xd0] sm:$0xff]  ;;  %v466_v52 = vld [vmem:[#allocation2 + $0xa2] sm:$0xff]  ;;  %v6158_v46 = vpack.c.bf16 %v339_v49, %v339_v49 }
  0x95   :  { %322 = vst.msk [vmem:[#allocation3 + $0x24] sm:$0xf] %vm312_vm3, %v6030_v51  ;;  %323 = vst.msk [vmem:[#allocation3 + $0x28] sm:$0xf] %vm312_vm3, %v6033_v54  ;;  %v6046_v57 = vpack.c.bf16 %v597_v56, %v597_v56  ;;  %v598_v58 = vld [vmem:[#allocation2 + $0xe0] sm:$0xff]  ;;  %v5110_v56 = vpack.c.bf16 %v466_v52, %v466_v52 }
  0x96   :  { %230 = vst.msk [vmem:[#allocation2 + $0x111] sm:$0xff] %vm163_vm0, %v161_v43  ;;  %231 = vst.msk [vmem:[#allocation2 + $0x121] sm:$0xff] %vm163_vm0, %v162_v55  ;;  %v394_v59 = vpop.permute.xlu0 %393  ;;  %v6049_v47 = vpack.c.bf16 %v598_v58, %v598_v58  ;;  %v340_v55 = vld [vmem:[#allocation2 + $0xd1] sm:$0xff]  ;;  %v856_v21 = vld [vmem:[#allocation2 + $0xe2] sm:$0xff]  ;;  %vm1738_vm0 = vcmask 253952  }
  0x97   :  { %657 = vrot.lane.b32.xlu1 %v5983_v23, %s5637_s25  ;;  %780 = vrot.lane.b32.xlu0 %v5963_v5, %s5638_s14  ;;  %442 = vst.msk [vmem:[#allocation3] sm:$0xf] %vm441_vm4, %v394_v59  ;;  %v5153_v5 = vpack.c.bf16 %v848_v4, %v848_v4  ;;  %v5111_v4 = vpack.c.bf16 %v467_v62, %v467_v62 }
  0x98   :  { %324 = vst.msk [vmem:[#allocation3 + $0x2c] sm:$0xf] %vm312_vm3, %v6046_v57  ;;  %v986_v48 = vld [vmem:[#allocation2 + $0xf0] sm:$0xff]  ;;  %325 = vst.msk [vmem:[#allocation3 + $0x30] sm:$0xf] %vm312_vm3, %v6049_v47 }
  0x99   :  { %v6060_v60 = vpack.c.bf16 %v986_v48, %v986_v48  ;;  %v600_v61 = vld [vmem:[#allocation2 + $0x100] sm:$0xff]  ;;  %v6165_v48 = vpack.c.bf16 %v340_v55, %v340_v55  ;;  %1748 = vst.msk [vmem:[#allocation4 + $0x90] sm:$0x1] %vm1738_vm0, %v5633_v7  ;;  %1739 = vst.msk [vmem:[#allocation4] sm:$0x1] %vm1738_vm0, %v5633_v7 }
  0x9a   :  { %v523_v63 = vpop.permute.xlu0 %522  ;;  %v6062_v0 = vpack.c.bf16 %v600_v61, %v600_v61  ;;  %v468_v61 = vld [vmem:[#allocation2 + $0xc2] sm:$0xff]  ;;  %1740 = vst.msk [vmem:[#allocation4 + $0x10] sm:$0x1] %vm1738_vm0, %v5633_v7  ;;  %1741 = vst.msk [vmem:[#allocation4 + $0x20] sm:$0x1] %vm1738_vm0, %v5633_v7 }
  0x9b   :  { %782 = vrot.lane.b32.xlu1 %v5978_v19, %s5638_s14  ;;  %784 = vrot.lane.b32.xlu0 %v5971_v12, %s5638_s14  ;;  %571 = vst.msk [vmem:[#allocation3] sm:$0xf] %vm570_vm5, %v523_v63 }
  0x9c   :  { %326 = vst.msk [vmem:[#allocation3 + $0x34] sm:$0xf] %vm312_vm3, %v6060_v60  ;;  %327 = vst.msk [vmem:[#allocation3 + $0x38] sm:$0xf] %vm312_vm3, %v6062_v0 }
  0x9d   :  { %v601_v1 = vld [vmem:[#allocation2 + $0x110] sm:$0xff]  ;;  %1742 = vst.msk [vmem:[#allocation4 + $0x30] sm:$0x1] %vm1738_vm0, %v5633_v7  ;;  %1743 = vst.msk [vmem:[#allocation4 + $0x40] sm:$0x1] %vm1738_vm0, %v5633_v7 }
  0x9e   :  { %v6073_v3 = vpack.c.bf16 %v601_v1, %v601_v1  ;;  %1744 = vst.msk [vmem:[#allocation4 + $0x50] sm:$0x1] %vm1738_vm0, %v5633_v7  ;;  %1745 = vst.msk [vmem:[#allocation4 + $0x60] sm:$0x1] %vm1738_vm0, %v5633_v7 }
  0x9f   :  { %786 = vrot.lane.b32.xlu1 %v5137_v2, %s5638_s14  ;;  %909 = vrot.lane.b32.xlu0 %v5998_v30, %s5639_s15  ;;  %v5173_v30 = vpack.c.bf16 %v982_v29, %v982_v29  ;;  %1746 = vst.msk [vmem:[#allocation4 + $0x70] sm:$0x1] %vm1738_vm0, %v5633_v7  ;;  %1747 = vst.msk [vmem:[#allocation4 + $0x80] sm:$0x1] %vm1738_vm0, %v5633_v7 }
  0xa0   :  { %328 = vst.msk [vmem:[#allocation3 + $0x3c] sm:$0xf] %vm312_vm3, %v6073_v3 }
  0xa1   :  { %1749 = vst.msk [vmem:[#allocation4 + $0xa0] sm:$0x1] %vm1738_vm0, %v5633_v7  ;;  %1750 = vst.msk [vmem:[#allocation4 + $0xb0] sm:$0x1] %vm1738_vm0, %v5633_v7 }
  0xa2   :  { %1751 = vst.msk [vmem:[#allocation4 + $0xc0] sm:$0x1] %vm1738_vm0, %v5633_v7  ;;  %1752 = vst.msk [vmem:[#allocation4 + $0xd0] sm:$0x1] %vm1738_vm0, %v5633_v7 }
  0xa3   :  { %911 = vrot.lane.b32.xlu1 %v5990_v25, %s5639_s15  ;;  %913 = vrot.lane.b32.xlu0 %v6016_v42, %s5639_s15  ;;  %1753 = vst.msk [vmem:[#allocation4 + $0xe0] sm:$0x1] %vm1738_vm0, %v5633_v7  ;;  %1754 = vst.msk [vmem:[#allocation4 + $0xf0] sm:$0x1] %vm1738_vm0, %v5633_v7 }
  0xa4   :  { %1755 = vst.msk [vmem:[#allocation4 + $0x100] sm:$0x1] %vm1738_vm0, %v5633_v7  ;;  %1756 = vst.msk [vmem:[#allocation4 + $0x110] sm:$0x1] %vm1738_vm0, %v5633_v7 }
  0xa5   :  { %1757 = vst.msk [vmem:[#allocation4 + $0x120] sm:$0x1] %vm1738_vm0, %v5633_v7  ;;  %1758 = vst.msk [vmem:[#allocation4 + $0x130] sm:$0x1] %vm1738_vm0, %v5633_v7 }
  0xa6   :  { %1759 = vst.msk [vmem:[#allocation4 + $0x9] sm:$0x1] %vm1738_vm0, %v5633_v7  ;;  %1760 = vst.msk [vmem:[#allocation4 + $0x19] sm:$0x1] %vm1738_vm0, %v5633_v7 }
  0xa7   :  { %915 = vrot.lane.b32.xlu1 %v5153_v5, %s5639_s15  ;;  %1039 = vrot.lane.b32.xlu0 %v5980_v20, %s5640_s16  ;;  %1761 = vst.msk [vmem:[#allocation4 + $0x29] sm:$0x1] %vm1738_vm0, %v5633_v7  ;;  %1762 = vst.msk [vmem:[#allocation4 + $0x39] sm:$0x1] %vm1738_vm0, %v5633_v7 }
  0xa8   :  { %1763 = vst.msk [vmem:[#allocation4 + $0x49] sm:$0x1] %vm1738_vm0, %v5633_v7  ;;  %1764 = vst.msk [vmem:[#allocation4 + $0x59] sm:$0x1] %vm1738_vm0, %v5633_v7 }
  0xa9   :  { %1765 = vst.msk [vmem:[#allocation4 + $0x69] sm:$0x1] %vm1738_vm0, %v5633_v7  ;;  %1766 = vst.msk [vmem:[#allocation4 + $0x79] sm:$0x1] %vm1738_vm0, %v5633_v7 }
  0xaa   :  { %1767 = vst.msk [vmem:[#allocation4 + $0x89] sm:$0x1] %vm1738_vm0, %v5633_v7  ;;  %1768 = vst.msk [vmem:[#allocation4 + $0x99] sm:$0x1] %vm1738_vm0, %v5633_v7 }
  0xab   :  { %1041 = vrot.lane.b32.xlu1 %v5966_v10, %s5640_s16  ;;  %1043 = vrot.lane.b32.xlu0 %v5983_v23, %s5640_s16  ;;  %v5185_v10 = vpack.c.bf16 %v1107_v8, %v1107_v8  ;;  %v594_v23 = vld [vmem:[#allocation2 + $0x80] sm:$0xff]  ;;  %1769 = vst.msk [vmem:[#allocation4 + $0xa9] sm:$0x1] %vm1738_vm0, %v5633_v7  ;;  %1770 = vst.msk [vmem:[#allocation4 + $0xb9] sm:$0x1] %vm1738_vm0, %v5633_v7 }
  0xac   :  { %v5125_v24 = vpack.c.bf16 %v594_v23, %v594_v23  ;;  %1771 = vst.msk [vmem:[#allocation4 + $0xc9] sm:$0x1] %vm1738_vm0, %v5633_v7  ;;  %1772 = vst.msk [vmem:[#allocation4 + $0xd9] sm:$0x1] %vm1738_vm0, %v5633_v7 }
  0xad   :  { %1773 = vst.msk [vmem:[#allocation4 + $0xe9] sm:$0x1] %vm1738_vm0, %v5633_v7  ;;  %1774 = vst.msk [vmem:[#allocation4 + $0xf9] sm:$0x1] %vm1738_vm0, %v5633_v7 }
  0xae   :  { %1775 = vst.msk [vmem:[#allocation4 + $0x109] sm:$0x1] %vm1738_vm0, %v5633_v7  ;;  %1776 = vst.msk [vmem:[#allocation4 + $0x119] sm:$0x1] %vm1738_vm0, %v5633_v7 }
  0xaf   :  { %1168 = vrot.lane.b32.xlu0 %v5978_v19, %s5641_s17  ;;  %1045 = vrot.lane.b32.xlu1 %v6000_v32, %s5640_s16  ;;  %v464_v19 = vld [vmem:[#allocation2 + $0x62] sm:$0xff]  ;;  %1777 = vst.msk [vmem:[#allocation4 + $0x129] sm:$0x1] %vm1738_vm0, %v5633_v7  ;;  %1778 = vst.msk [vmem:[#allocation4 + $0x139] sm:$0x1] %vm1738_vm0, %v5633_v7  ;;  %vm4606_vm0 = vcmask 261312  }
  0xb0   :  { %v5108_v20 = vpack.c.bf16 %v464_v19, %v464_v19 }
  0xb3   :  { %1172 = vrot.lane.b32.xlu0 %v5137_v2, %s5641_s17  ;;  %1170 = vrot.lane.b32.xlu1 %v5971_v12, %s5641_s17  ;;  %v5522_v12 = vld [vmem:[%s7951_s1] sm:$0xff]   ;;  %s5643_s1 = smov 64  }
  0xb4   :  { %5447 = vmatprep.subr.bf16.mxu0 %v5522_v12 }
  0xb5   :  { %5448 = vmatpush3.bf16.msra.mxu0 %v5522_v12 }
  0xb7   :  { %1297 = vrot.lane.b32.xlu0 %v5990_v25, %s5642_s22  ;;  %1174 = vrot.lane.b32.xlu1 %v5185_v10, %s5641_s17  ;;  %v723_v25 = vld [vmem:[#allocation2 + $0x81] sm:$0xff] }
  0xb8   :  { %v5141_v26 = vpack.c.bf16 %v723_v25, %v723_v25 }
  0xbb   :  { %401 = vrot.lane.b32.xlu0 %v5137_v2, %s5635_s0  ;;  %1299 = vrot.lane.b32.xlu1 %v6016_v42, %s5642_s22  ;;  %v338_v42 = vld [vmem:[#allocation2 + $0xb1] sm:$0xff]  ;;  %v6172_v2 = vpack.c.bf16 %v468_v61, %v468_v61 }
  0xbc   :  { %v5095_v39 = vpack.c.bf16 %v338_v42, %v338_v42 }
  0xbf   :  { %1301 = vrot.lane.b32.xlu0 %v5153_v5, %s5642_s22  ;;  %403 = vrot.lane.b32.xlu1 %v5185_v10, %s5635_s0 }
  0xc3   :  { %405 = vrot.lane.b32.xlu0 %v5092_v15, %s5635_s0  ;;  %1303 = vrot.lane.b32.xlu1 %v5201_v17, %s5642_s22 }
  0xc7   :  { %530 = vrot.lane.b32.xlu0 %v5153_v5, %s5636_s13  ;;  %407 = vrot.lane.b32.xlu1 %v5093_v18, %s5635_s0  ;;  %v469_v5 = vld [vmem:[#allocation2 + $0xd2] sm:$0xff] }
  0xc8   :  { %v6179_v9 = vpack.c.bf16 %v469_v5, %v469_v5 }
  0xcb   :  { %534 = vrot.lane.b32.xlu0 %v5108_v20, %s5636_s13  ;;  %532 = vrot.lane.b32.xlu1 %v5201_v17, %s5636_s13 }
  0xcf   :  { %659 = vrot.lane.b32.xlu0 %v6000_v32, %s5637_s25  ;;  %536 = vrot.lane.b32.xlu1 %v5109_v22, %s5636_s13  ;;  %v240_v32 = vld [vmem:[#allocation2 + $0xa0] sm:$0xff] }
  0xd0   :  { %v5078_v33 = vpack.c.bf16 %v240_v32, %v240_v32 }
  0xd2   :  { %321 = vst.msk [vmem:[#allocation3 + $0x20] sm:$0xf] %vm312_vm3, %v5078_v33  ;;  %vm2134_vm3 = vcmask 781824  }
  0xd3   :  { %663 = vrot.lane.b32.xlu0 %v6018_v44, %s5637_s25  ;;  %661 = vrot.lane.b32.xlu1 %v6003_v36, %s5637_s25 }
  0xd7   :  { %788 = vrot.lane.b32.xlu0 %v5185_v10, %s5638_s14  ;;  %665 = vrot.lane.b32.xlu1 %v5125_v24, %s5637_s25 }
  0xdb   :  { %792 = vrot.lane.b32.xlu0 %v5093_v18, %s5638_s14  ;;  %790 = vrot.lane.b32.xlu1 %v5092_v15, %s5638_s14 }
  0xdf   :  { %917 = vrot.lane.b32.xlu0 %v5201_v17, %s5639_s15  ;;  %794 = vrot.lane.b32.xlu1 %v5141_v26, %s5638_s14 }
  0xe3   :  { %921 = vrot.lane.b32.xlu0 %v5109_v22, %s5639_s15  ;;  %919 = vrot.lane.b32.xlu1 %v5108_v20, %s5639_s15 }
  0xe7   :  { %1047 = vrot.lane.b32.xlu0 %v6003_v36, %s5640_s16  ;;  %923 = vrot.lane.b32.xlu1 %v5157_v28, %s5639_s15  ;;  %v5189_v36 = vpack.c.bf16 %v1111_v35, %v1111_v35 }
  0xeb   :  { %1051 = vrot.lane.b32.xlu0 %v5125_v24, %s5640_s16  ;;  %1049 = vrot.lane.b32.xlu1 %v6018_v44, %s5640_s16  ;;  %v1240_v44 = vld [vmem:[#allocation2 + $0x92] sm:$0xff]  ;;  %v6214_v24 = vpack.c.bf16 %v856_v21, %v856_v21 }
  0xec   :  { %v5205_v50 = vpack.c.bf16 %v1240_v44, %v1240_v44 }
  0xef   :  { %1176 = vrot.lane.b32.xlu0 %v5092_v15, %s5641_s17  ;;  %1053 = vrot.lane.b32.xlu1 %v5173_v30, %s5640_s16  ;;  %v727_v15 = vld [vmem:[#allocation2 + $0xe1] sm:$0xff] }
  0xf3   :  { %1180 = vrot.lane.b32.xlu0 %v5141_v26, %s5641_s17  ;;  %1178 = vrot.lane.b32.xlu1 %v5093_v18, %s5641_s17  ;;  %v5145_v18 = vpack.c.bf16 %v727_v15, %v727_v15 }
  0xf5   :  { %v396_v34 = vpop.permute.xlu1 %395 }
  0xf6   :  { %443 = vst.msk [vmem:[#allocation3 + $0x4] sm:$0xf] %vm441_vm4, %v396_v34 }
  0xf7   :  { %1305 = vrot.lane.b32.xlu0 %v5108_v20, %s5642_s22  ;;  %1182 = vrot.lane.b32.xlu1 %v5189_v36, %s5641_s17 }
  0xf9   :  { %v400_v40 = vpop.permute.xlu1 %399  ;;  %v398_v41 = vpop.permute.xlu0 %397 }
  0xfa   :  { %445 = vst.msk [vmem:[#allocation3 + $0xc] sm:$0xf] %vm441_vm4, %v400_v40  ;;  %444 = vst.msk [vmem:[#allocation3 + $0x8] sm:$0xf] %vm441_vm4, %v398_v41  ;;  %v1244_v40 = vld [vmem:[#allocation2 + $0xf2] sm:$0xff]  ;;  %v343_v41 = vld [vmem:[#allocation2 + $0x101] sm:$0xff] }
  0xfb   :  { %409 = vrot.lane.b32.xlu0 %v5094_v38, %s5635_s0  ;;  %1307 = vrot.lane.b32.xlu1 %v5109_v22, %s5642_s22 }
  0xfd   :  { %v525_v45 = vpop.permute.xlu1 %524  ;;  %v527_v37 = vpop.permute.xlu0 %526 }
  0xfe   :  { %572 = vst.msk [vmem:[#allocation3 + $0x4] sm:$0xf] %vm570_vm5, %v525_v45  ;;  %573 = vst.msk [vmem:[#allocation3 + $0x8] sm:$0xf] %vm570_vm5, %v527_v37  ;;  %v5209_v45 = vpack.c.bf16 %v1244_v40, %v1244_v40  ;;  %v6260_v37 = vpack.c.bf16 %v343_v41, %v343_v41 }
  0xff   :  { %1309 = vrot.lane.b32.xlu0 %v5157_v28, %s5642_s22  ;;  %411 = vrot.lane.b32.xlu1 %v5095_v39, %s5635_s0 }
 0x101   :  { %v529_v53 = vpop.permute.xlu1 %528  ;;  %v652_v43 = vpop.permute.xlu0 %651 }
 0x102   :  { %574 = vst.msk [vmem:[#allocation3 + $0xc] sm:$0xf] %vm570_vm5, %v529_v53  ;;  %v472_v53 = vld [vmem:[#allocation2 + $0x102] sm:$0xff] }
 0x103   :  { %700 = vst.msk [vmem:[#allocation3] sm:$0xf] %vm699_vm7, %v652_v43  ;;  %413 = vrot.lane.b32.xlu0 %v6158_v46, %s5635_s0  ;;  %1311 = vrot.lane.b32.xlu1 %v5205_v50, %s5642_s22  ;;  %v6275_v55 = vpack.c.bf16 %v472_v53, %v472_v53 }
 0x105   :  { %v654_v58 = vpop.permute.xlu1 %653  ;;  %v656_v59 = vpop.permute.xlu0 %655 }
 0x106   :  { %701 = vst.msk [vmem:[#allocation3 + $0x4] sm:$0xf] %vm699_vm7, %v654_v58  ;;  %702 = vst.msk [vmem:[#allocation3 + $0x8] sm:$0xf] %vm699_vm7, %v656_v59 }
 0x107   :  { %538 = vrot.lane.b32.xlu0 %v5110_v56, %s5636_s13  ;;  %415 = vrot.lane.b32.xlu1 %v6165_v48, %s5635_s0  ;;  %v473_v56 = vld [vmem:[#allocation2 + $0x112] sm:$0xff] }
 0x109   :  { %v658_v63 = vpop.permute.xlu1 %657  ;;  %v781_v1 = vpop.permute.xlu0 %780 }
 0x10a   :  { %703 = vst.msk [vmem:[#allocation3 + $0xc] sm:$0xf] %vm699_vm7, %v658_v63  ;;  %v602_v63 = vld [vmem:[#allocation2 + $0x120] sm:$0xff] }
 0x10b   :  { %829 = vst.msk [vmem:[#allocation3] sm:$0xf] %vm828_vm8, %v781_v1  ;;  %542 = vrot.lane.b32.xlu0 %v6172_v2, %s5636_s13  ;;  %540 = vrot.lane.b32.xlu1 %v5111_v4, %s5636_s13 }
 0x10d   :  { %v783_v6 = vpop.permute.xlu1 %782  ;;  %v785_v8 = vpop.permute.xlu0 %784 }
 0x10e   :  { %830 = vst.msk [vmem:[#allocation3 + $0x4] sm:$0xf] %vm828_vm8, %v783_v6  ;;  %831 = vst.msk [vmem:[#allocation3 + $0x8] sm:$0xf] %vm828_vm8, %v785_v8  ;;  %v731_v6 = vld [vmem:[#allocation2 + $0x121] sm:$0xff] }
 0x10f   :  { %667 = vrot.lane.b32.xlu0 %v6030_v51, %s5637_s25  ;;  %544 = vrot.lane.b32.xlu1 %v6179_v9, %s5636_s13 }
 0x111   :  { %v787_v10 = vpop.permute.xlu1 %786  ;;  %v910_v11 = vpop.permute.xlu0 %909 }
 0x112   :  { %832 = vst.msk [vmem:[#allocation3 + $0xc] sm:$0xf] %vm828_vm8, %v787_v10  ;;  %v5149_v10 = vpack.c.bf16 %v731_v6, %v731_v6 }
 0x113   :  { %958 = vst.msk [vmem:[#allocation3] sm:$0xf] %vm957_vm9, %v910_v11  ;;  %671 = vrot.lane.b32.xlu0 %v6046_v57, %s5637_s25  ;;  %669 = vrot.lane.b32.xlu1 %v6033_v54, %s5637_s25 }
 0x115   :  { %v912_v12 = vpop.permute.xlu1 %911  ;;  %v914_v13 = vpop.permute.xlu0 %913 }
 0x116   :  { %959 = vst.msk [vmem:[#allocation3 + $0x4] sm:$0xf] %vm957_vm9, %v912_v12  ;;  %960 = vst.msk [vmem:[#allocation3 + $0x8] sm:$0xf] %vm957_vm9, %v914_v13  ;;  %v860_v13 = vld [vmem:[#allocation2 + $0x122] sm:$0xff] }
 0x117   :  { %796 = vrot.lane.b32.xlu0 %v5095_v39, %s5638_s14  ;;  %673 = vrot.lane.b32.xlu1 %v6049_v47, %s5637_s25  ;;  %v344_v39 = vld [vmem:[#allocation2 + $0x111] sm:$0xff]  ;;  %v5165_v15 = vpack.c.bf16 %v860_v13, %v860_v13 }
 0x118   :  { %v6267_v52 = vpack.c.bf16 %v344_v39, %v344_v39 }
 0x119   :  { %v916_v51 = vpop.permute.xlu1 %915  ;;  %v1040_v14 = vpop.permute.xlu0 %1039 }
 0x11a   :  { %961 = vst.msk [vmem:[#allocation3 + $0xc] sm:$0xf] %vm957_vm9, %v916_v51 }
 0x11b   :  { %1088 = vst.msk [vmem:[#allocation3] sm:$0xf] %vm1087_vm10, %v1040_v14  ;;  %800 = vrot.lane.b32.xlu0 %v6165_v48, %s5638_s14  ;;  %798 = vrot.lane.b32.xlu1 %v6158_v46, %s5638_s14 }
 0x11d   :  { %v1042_v16 = vpop.permute.xlu1 %1041  ;;  %v1044_v17 = vpop.permute.xlu0 %1043 }
 0x11e   :  { %1089 = vst.msk [vmem:[#allocation3 + $0x4] sm:$0xf] %vm1087_vm10, %v1042_v16  ;;  %1090 = vst.msk [vmem:[#allocation3 + $0x8] sm:$0xf] %vm1087_vm10, %v1044_v17  ;;  %v990_v16 = vld [vmem:[#allocation2 + $0x130] sm:$0xff] }
 0x11f   :  { %925 = vrot.lane.b32.xlu0 %v5111_v4, %s5639_s15  ;;  %802 = vrot.lane.b32.xlu1 %v5145_v18, %s5638_s14  ;;  %v5133_v4 = vpack.c.bf16 %v602_v63, %v602_v63 }
 0x121   :  { %v1046_v19 = vpop.permute.xlu1 %1045  ;;  %v1169_v20 = vpop.permute.xlu0 %1168 }
 0x122   :  { %1091 = vst.msk [vmem:[#allocation3 + $0xc] sm:$0xf] %vm1087_vm10, %v1046_v19  ;;  %v5181_v19 = vpack.c.bf16 %v990_v16, %v990_v16 }
 0x123   :  { %1217 = vst.msk [vmem:[#allocation3] sm:$0xf] %vm1216_vm11, %v1169_v20  ;;  %929 = vrot.lane.b32.xlu0 %v6179_v9, %s5639_s15  ;;  %927 = vrot.lane.b32.xlu1 %v6172_v2, %s5639_s15 }
 0x125   :  { %v1171_v22 = vpop.permute.xlu1 %1170  ;;  %v1173_v23 = vpop.permute.xlu0 %1172 }
 0x126   :  { %1218 = vst.msk [vmem:[#allocation3 + $0x4] sm:$0xf] %vm1216_vm11, %v1171_v22  ;;  %1219 = vst.msk [vmem:[#allocation3 + $0x8] sm:$0xf] %vm1216_vm11, %v1173_v23 }
 0x127   :  { %1055 = vrot.lane.b32.xlu0 %v6033_v54, %s5640_s16  ;;  %931 = vrot.lane.b32.xlu1 %v6214_v24, %s5639_s15 }
 0x129   :  { %v1175_v25 = vpop.permute.xlu1 %1174  ;;  %v1298_v26 = vpop.permute.xlu0 %1297 }
 0x12a   :  { %1220 = vst.msk [vmem:[#allocation3 + $0xc] sm:$0xf] %vm1216_vm11, %v1175_v25 }
 0x12b   :  { %1346 = vst.msk [vmem:[#allocation3] sm:$0xf] %vm1345_vm12, %v1298_v26  ;;  %1059 = vrot.lane.b32.xlu0 %v6049_v47, %s5640_s16  ;;  %1057 = vrot.lane.b32.xlu1 %v6046_v57, %s5640_s16  ;;  %v1115_v47 = vld [vmem:[#allocation2 + $0xf1] sm:$0xff] }
 0x12c   :  { %v6239_v32 = vpack.c.bf16 %v1115_v47, %v1115_v47 }
 0x12d   :  { %v1300_v27 = vpop.permute.xlu1 %1299  ;;  %v402_v28 = vpop.permute.xlu0 %401 }
 0x12e   :  { %1347 = vst.msk [vmem:[#allocation3 + $0x4] sm:$0xf] %vm1345_vm12, %v1300_v27  ;;  %v1248_v27 = vld [vmem:[#allocation2 + $0x132] sm:$0xff] }
 0x12f   :  { %446 = vst.msk [vmem:[#allocation3 + $0x10] sm:$0xf] %vm441_vm4, %v402_v28  ;;  %1184 = vrot.lane.b32.xlu0 %v6158_v46, %s5641_s17  ;;  %1061 = vrot.lane.b32.xlu1 %v6060_v60, %s5640_s16 }
 0x131   :  { %v404_v54 = vpop.permute.xlu1 %403  ;;  %v1302_v29 = vpop.permute.xlu0 %1301 }
 0x132   :  { %447 = vst.msk [vmem:[#allocation3 + $0x14] sm:$0xf] %vm441_vm4, %v404_v54 }
 0x133   :  { %1348 = vst.msk [vmem:[#allocation3 + $0x8] sm:$0xf] %vm1345_vm12, %v1302_v29  ;;  %1188 = vrot.lane.b32.xlu0 %v5145_v18, %s5641_s17  ;;  %1186 = vrot.lane.b32.xlu1 %v6165_v48, %s5641_s17  ;;  %v6282_v48 = vpack.c.bf16 %v473_v56, %v473_v56  ;;  %v5213_v29 = vpack.c.bf16 %v1248_v27, %v1248_v27 }
 0x135   :  { %v1304_v57 = vpop.permute.xlu1 %1303  ;;  %v406_v30 = vpop.permute.xlu0 %405  ;;  %v5521_v33 = vld [vmem:[#allocation3] sm:$0xff]  }
 0x136   :  { %1349 = vst.msk [vmem:[#allocation3 + $0xc] sm:$0xf] %vm1345_vm12, %v1304_v57  ;;  %5449 = vmatprep.mubr.msk.bf16.mxu0 %vm1438_vm13, %v5521_v33 }
 0x137   :  { %448 = vst.msk [vmem:[#allocation3 + $0x18] sm:$0xf] %vm441_vm4, %v406_v30  ;;  %1313 = vrot.lane.b32.xlu0 %v6172_v2, %s5642_s22  ;;  %1190 = vrot.lane.b32.xlu1 %v6239_v32, %s5641_s17 }
 0x139   :  { %v408_v35 = vpop.permute.xlu1 %407  ;;  %v531_v36 = vpop.permute.xlu0 %530 }
 0x13a   :  { %449 = vst.msk [vmem:[#allocation3 + $0x1c] sm:$0xf] %vm441_vm4, %v408_v35 }
 0x13b   :  { %575 = vst.msk [vmem:[#allocation3 + $0x10] sm:$0xf] %vm570_vm5, %v531_v36  ;;  %1315 = vrot.lane.b32.xlu1 %v6179_v9, %s5642_s22  ;;  %417 = vrot.lane.b32.xlu0 %v5145_v18, %s5635_s0 }
 0x13d   :  { %v533_v31 = vpop.permute.xlu1 %532  ;;  %v535_v34 = vpop.permute.xlu0 %534  ;;  %v5523_v38 = vld [vmem:[#allocation3 + $0x8] sm:$0xff]  }
 0x13e   :  { %576 = vst.msk [vmem:[#allocation3 + $0x14] sm:$0xf] %vm570_vm5, %v533_v31  ;;  %577 = vst.msk [vmem:[#allocation3 + $0x18] sm:$0xf] %vm570_vm5, %v535_v34  ;;  %5450 = vmatmul.mubr.msk.bf16.vlgmr.msra.gmra.mxu0 %vm1438_vm13, %v5523_v38 }
 0x13f   :  { %419 = vrot.lane.b32.xlu1 %v6239_v32, %s5635_s0  ;;  %1317 = vrot.lane.b32.xlu0 %v6214_v24, %s5642_s22 }
 0x141   :  { %v537_v42 = vpop.permute.xlu1 %536  ;;  %v660_v44 = vpop.permute.xlu0 %659 }
 0x142   :  { %578 = vst.msk [vmem:[#allocation3 + $0x1c] sm:$0xf] %vm570_vm5, %v537_v42 }
 0x143   :  { %704 = vst.msk [vmem:[#allocation3 + $0x10] sm:$0xf] %vm699_vm7, %v660_v44  ;;  %1319 = vrot.lane.b32.xlu1 %v5209_v45, %s5642_s22  ;;  %421 = vrot.lane.b32.xlu0 %v6260_v37, %s5635_s0 }
 0x145   :  { %v662_v49 = vpop.permute.xlu1 %661  ;;  %v664_v50 = vpop.permute.xlu0 %663 }
 0x146   :  { %705 = vst.msk [vmem:[#allocation3 + $0x14] sm:$0xf] %vm699_vm7, %v662_v49  ;;  %706 = vst.msk [vmem:[#allocation3 + $0x18] sm:$0xf] %vm699_vm7, %v664_v50 }
 0x147   :  { %423 = vrot.lane.b32.xlu1 %v6267_v52, %s5635_s0  ;;  %546 = vrot.lane.b32.xlu0 %v6214_v24, %s5636_s13 }
 0x149   :  { %v666_v43 = vpop.permute.xlu1 %665  ;;  %v789_v46 = vpop.permute.xlu0 %788 }
 0x14a   :  { %707 = vst.msk [vmem:[#allocation3 + $0x1c] sm:$0xf] %vm699_vm7, %v666_v43 }
 0x14b   :  { %833 = vst.msk [vmem:[#allocation3 + $0x10] sm:$0xf] %vm828_vm8, %v789_v46  ;;  %548 = vrot.lane.b32.xlu1 %v5209_v45, %s5636_s13  ;;  %550 = vrot.lane.b32.xlu0 %v6275_v55, %s5636_s13 }
 0x14d   :  { %v791_v58 = vpop.permute.xlu1 %790  ;;  %v793_v59 = vpop.permute.xlu0 %792 }
 0x14e   :  { %834 = vst.msk [vmem:[#allocation3 + $0x14] sm:$0xf] %vm828_vm8, %v791_v58  ;;  %835 = vst.msk [vmem:[#allocation3 + $0x18] sm:$0xf] %vm828_vm8, %v793_v59 }
 0x14f   :  { %552 = vrot.lane.b32.xlu1 %v6282_v48, %s5636_s13  ;;  %675 = vrot.lane.b32.xlu0 %v6060_v60, %s5637_s25 }
 0x151   :  { %v795_v61 = vpop.permute.xlu1 %794  ;;  %v918_v62 = vpop.permute.xlu0 %917 }
 0x152   :  { %836 = vst.msk [vmem:[#allocation3 + $0x1c] sm:$0xf] %vm828_vm8, %v795_v61 }
 0x153   :  { %962 = vst.msk [vmem:[#allocation3 + $0x10] sm:$0xf] %vm957_vm9, %v918_v62  ;;  %677 = vrot.lane.b32.xlu1 %v6062_v0, %s5637_s25  ;;  %679 = vrot.lane.b32.xlu0 %v6073_v3, %s5637_s25 }
 0x155   :  { %v920_v1 = vpop.permute.xlu1 %919  ;;  %v922_v2 = vpop.permute.xlu0 %921 }
 0x156   :  { %963 = vst.msk [vmem:[#allocation3 + $0x14] sm:$0xf] %vm957_vm9, %v920_v1  ;;  %964 = vst.msk [vmem:[#allocation3 + $0x18] sm:$0xf] %vm957_vm9, %v922_v2 }
 0x157   :  { %681 = vrot.lane.b32.xlu1 %v5133_v4, %s5637_s25  ;;  %804 = vrot.lane.b32.xlu0 %v6239_v32, %s5638_s14 }
 0x159   :  { %v924_v60 = vpop.permute.xlu1 %923  ;;  %v1048_v5 = vpop.permute.xlu0 %1047 }
 0x15a   :  { %965 = vst.msk [vmem:[#allocation3 + $0x1c] sm:$0xf] %vm957_vm9, %v924_v60 }
 0x15b   :  { %1092 = vst.msk [vmem:[#allocation3 + $0x10] sm:$0xf] %vm1087_vm10, %v1048_v5  ;;  %806 = vrot.lane.b32.xlu1 %v6260_v37, %s5638_s14  ;;  %808 = vrot.lane.b32.xlu0 %v6267_v52, %s5638_s14 }
 0x15d   :  { %v1050_v8 = vpop.permute.xlu1 %1049  ;;  %v1052_v9 = vpop.permute.xlu0 %1051 }
 0x15e   :  { %1093 = vst.msk [vmem:[#allocation3 + $0x14] sm:$0xf] %vm1087_vm10, %v1050_v8  ;;  %1094 = vst.msk [vmem:[#allocation3 + $0x18] sm:$0xf] %vm1087_vm10, %v1052_v9 }
 0x15f   :  { %810 = vrot.lane.b32.xlu1 %v5149_v10, %s5638_s14  ;;  %933 = vrot.lane.b32.xlu0 %v5209_v45, %s5639_s15 }
 0x161   :  { %v1054_v11 = vpop.permute.xlu1 %1053  ;;  %v1177_v12 = vpop.permute.xlu0 %1176 }
 0x162   :  { %1095 = vst.msk [vmem:[#allocation3 + $0x1c] sm:$0xf] %vm1087_vm10, %v1054_v11 }
 0x163   :  { %1221 = vst.msk [vmem:[#allocation3 + $0x10] sm:$0xf] %vm1216_vm11, %v1177_v12  ;;  %935 = vrot.lane.b32.xlu1 %v6275_v55, %s5639_s15  ;;  %937 = vrot.lane.b32.xlu0 %v6282_v48, %s5639_s15 }
 0x165   :  { %v1179_v51 = vpop.permute.xlu1 %1178  ;;  %v1181_v14 = vpop.permute.xlu0 %1180 }
 0x166   :  { %1222 = vst.msk [vmem:[#allocation3 + $0x14] sm:$0xf] %vm1216_vm11, %v1179_v51  ;;  %1223 = vst.msk [vmem:[#allocation3 + $0x18] sm:$0xf] %vm1216_vm11, %v1181_v14 }
 0x167   :  { %939 = vrot.lane.b32.xlu1 %v5165_v15, %s5639_s15  ;;  %1063 = vrot.lane.b32.xlu0 %v6062_v0, %s5640_s16  ;;  %v1119_v0 = vld [vmem:[#allocation2 + $0x131] sm:$0xff] }
 0x169   :  { %v1183_v17 = vpop.permute.xlu1 %1182  ;;  %v1306_v18 = vpop.permute.xlu0 %1305 }
 0x16a   :  { %1224 = vst.msk [vmem:[#allocation3 + $0x1c] sm:$0xf] %vm1216_vm11, %v1183_v17 }
 0x16b   :  { %1350 = vst.msk [vmem:[#allocation3 + $0x10] sm:$0xf] %vm1345_vm12, %v1306_v18  ;;  %1065 = vrot.lane.b32.xlu1 %v6073_v3, %s5640_s16  ;;  %1067 = vrot.lane.b32.xlu0 %v5133_v4, %s5640_s16  ;;  %v5197_v3 = vpack.c.bf16 %v1119_v0, %v1119_v0 }
 0x16d   :  { %v1308_v20 = vpop.permute.xlu1 %1307  ;;  %v410_v21 = vpop.permute.xlu0 %409 }
 0x16e   :  { %1351 = vst.msk [vmem:[#allocation3 + $0x14] sm:$0xf] %vm1345_vm12, %v1308_v20 }
 0x16f   :  { %450 = vst.msk [vmem:[#allocation3 + $0x20] sm:$0xf] %vm441_vm4, %v410_v21  ;;  %1069 = vrot.lane.b32.xlu1 %v5181_v19, %s5640_s16  ;;  %1192 = vrot.lane.b32.xlu0 %v6260_v37, %s5641_s17 }
 0x171   :  { %v412_v22 = vpop.permute.xlu1 %411  ;;  %v1310_v23 = vpop.permute.xlu0 %1309 }
 0x172   :  { %451 = vst.msk [vmem:[#allocation3 + $0x24] sm:$0xf] %vm441_vm4, %v412_v22 }
 0x173   :  { %1352 = vst.msk [vmem:[#allocation3 + $0x18] sm:$0xf] %vm1345_vm12, %v1310_v23  ;;  %1194 = vrot.lane.b32.xlu1 %v6267_v52, %s5641_s17  ;;  %1196 = vrot.lane.b32.xlu0 %v5149_v10, %s5641_s17 }
 0x175   :  { %v1312_v24 = vpop.permute.xlu1 %1311  ;;  %v414_v25 = vpop.permute.xlu0 %413  ;;  %v5524_v26 = vld [vmem:[#allocation3 + $0x10] sm:$0xff]  }
 0x176   :  { %1353 = vst.msk [vmem:[#allocation3 + $0x1c] sm:$0xf] %vm1345_vm12, %v1312_v24  ;;  %5453 = vmatprep.mubr.msk.bf16.mxu0 %vm1438_vm13, %v5524_v26 }
 0x177   :  { %452 = vst.msk [vmem:[#allocation3 + $0x28] sm:$0xf] %vm441_vm4, %v414_v25  ;;  %1198 = vrot.lane.b32.xlu1 %v5197_v3, %s5641_s17  ;;  %1321 = vrot.lane.b32.xlu0 %v6275_v55, %s5642_s22 }
 0x179   :  { %v416_v28 = vpop.permute.xlu1 %415  ;;  %v539_v54 = vpop.permute.xlu0 %538 }
 0x17a   :  { %453 = vst.msk [vmem:[#allocation3 + $0x2c] sm:$0xf] %vm441_vm4, %v416_v28 }
 0x17b   :  { %579 = vst.msk [vmem:[#allocation3 + $0x20] sm:$0xf] %vm570_vm5, %v539_v54  ;;  %1323 = vrot.lane.b32.xlu1 %v6282_v48, %s5642_s22  ;;  %1325 = vrot.lane.b32.xlu0 %v5165_v15, %s5642_s22 }
 0x17d   :  { %v541_v47 = vpop.permute.xlu1 %540  ;;  %v543_v57 = vpop.permute.xlu0 %542  ;;  %v5525_v30 = vld [vmem:[#allocation3 + $0x18] sm:$0xff]  }
 0x17e   :  { %580 = vst.msk [vmem:[#allocation3 + $0x24] sm:$0xf] %vm570_vm5, %v541_v47  ;;  %581 = vst.msk [vmem:[#allocation3 + $0x28] sm:$0xf] %vm570_vm5, %v543_v57  ;;  %5454 = vmatmul.mubr.msk.bf16.gmra.mxu0 %vm1438_vm13, %v5525_v30  ;;  %v1893_v57 = vld [vmem:[#allocation4 + $0x1] sm:$0xff] }
 0x17f   :  { %1327 = vrot.lane.b32.xlu1 %v5213_v29, %s5642_s22  ;;  %v5230_v30 = vpack.c.bf16 %v1893_v57, %v1893_v57 }
 0x181   :  { %v545_v32 = vpop.permute.xlu1 %544  ;;  %v668_v33 = vpop.permute.xlu0 %667  ;;  %1957 = vrot.lane.b32.xlu0 %v5230_v30, %s5642_s22 }
 0x182   :  { %582 = vst.msk [vmem:[#allocation3 + $0x2c] sm:$0xf] %vm570_vm5, %v545_v32  ;;  %v2512_v32 = vld [vmem:[#allocation4 + $0x90] sm:$0xff] }
 0x183   :  { %708 = vst.msk [vmem:[#allocation3 + $0x20] sm:$0xf] %vm699_vm7, %v668_v33  ;;  %v2022_v33 = vld [vmem:[#allocation4 + $0x2] sm:$0xff] }
 0x185   :  { %v670_v35 = vpop.permute.xlu1 %669  ;;  %v672_v36 = vpop.permute.xlu0 %671 }
 0x186   :  { %709 = vst.msk [vmem:[#allocation3 + $0x24] sm:$0xf] %vm699_vm7, %v670_v35  ;;  %710 = vst.msk [vmem:[#allocation3 + $0x28] sm:$0xf] %vm699_vm7, %v672_v36  ;;  %v5317_v35 = vpack.c.bf16 %v2512_v32, %v2512_v32  ;;  %v5246_v36 = vpack.c.bf16 %v2022_v33, %v2022_v33 }
 0x188   :  { %2583 = vrot.lane.b32.xlu1 %v5317_v35, %s5643_s1  ;;  %2086 = vrot.lane.b32.xlu0 %v5246_v36, %s5643_s1 }
 0x189   :  { %v674_v31 = vpop.permute.xlu1 %673  ;;  %v797_v34 = vpop.permute.xlu0 %796 }
 0x18a   :  { %711 = vst.msk [vmem:[#allocation3 + $0x2c] sm:$0xf] %vm699_vm7, %v674_v31  ;;  %v2640_v31 = vld [vmem:[#allocation4 + $0x91] sm:$0xff] }
 0x18b   :  { %837 = vst.msk [vmem:[#allocation3 + $0x20] sm:$0xf] %vm828_vm8, %v797_v34  ;;  %v1901_v34 = vld [vmem:[#allocation4 + $0xa1] sm:$0xff] }
 0x18d   :  { %v799_v38 = vpop.permute.xlu1 %798  ;;  %v801_v40 = vpop.permute.xlu0 %800 }
 0x18e   :  { %838 = vst.msk [vmem:[#allocation3 + $0x24] sm:$0xf] %vm828_vm8, %v799_v38  ;;  %839 = vst.msk [vmem:[#allocation3 + $0x28] sm:$0xf] %vm828_vm8, %v801_v40  ;;  %v2520_v38 = vld [vmem:[#allocation4 + $0x130] sm:$0xff]  ;;  %v5333_v40 = vpack.c.bf16 %v2640_v31, %v2640_v31 }
 0x18f   :  { %v5325_v7 = vpack.c.bf16 %v2520_v38, %v2520_v38 }
 0x190   :  { %2711 = vrot.lane.b32.xlu1 %v5333_v40, %s5644_s26 }
 0x191   :  { %v803_v41 = vpop.permute.xlu1 %802  ;;  %v926_v42 = vpop.permute.xlu0 %925 }
 0x192   :  { %840 = vst.msk [vmem:[#allocation3 + $0x2c] sm:$0xf] %vm828_vm8, %v803_v41  ;;  %v5238_v41 = vpack.c.bf16 %v1901_v34, %v1901_v34 }
 0x193   :  { %966 = vst.msk [vmem:[#allocation3 + $0x20] sm:$0xf] %vm957_vm9, %v926_v42  ;;  %v2030_v42 = vld [vmem:[#allocation4 + $0xa2] sm:$0xff] }
 0x194   :  { %1973 = vrot.lane.b32.xlu0 %v5238_v41, %s5642_s22  ;;  %2599 = vrot.lane.b32.xlu1 %v5325_v7, %s5643_s1 }
 0x195   :  { %v928_v44 = vpop.permute.xlu1 %927  ;;  %v930_v45 = vpop.permute.xlu0 %929 }
 0x196   :  { %967 = vst.msk [vmem:[#allocation3 + $0x24] sm:$0xf] %vm957_vm9, %v928_v44  ;;  %968 = vst.msk [vmem:[#allocation3 + $0x28] sm:$0xf] %vm957_vm9, %v930_v45  ;;  %v5254_v44 = vpack.c.bf16 %v2030_v42, %v2030_v42 }
 0x198   :  { %2102 = vrot.lane.b32.xlu0 %v5254_v44, %s5643_s1 }
 0x199   :  { %v932_v37 = vpop.permute.xlu1 %931  ;;  %v1056_v39 = vpop.permute.xlu0 %1055 }
 0x19a   :  { %969 = vst.msk [vmem:[#allocation3 + $0x2c] sm:$0xf] %vm957_vm9, %v932_v37 }
 0x19b   :  { %1096 = vst.msk [vmem:[#allocation3 + $0x20] sm:$0xf] %vm1087_vm10, %v1056_v39 }
 0x19d   :  { %v1058_v49 = vpop.permute.xlu1 %1057  ;;  %v1060_v50 = vpop.permute.xlu0 %1059 }
 0x19e   :  { %1097 = vst.msk [vmem:[#allocation3 + $0x24] sm:$0xf] %vm1087_vm10, %v1058_v49  ;;  %1098 = vst.msk [vmem:[#allocation3 + $0x28] sm:$0xf] %vm1087_vm10, %v1060_v50 }
 0x1a1   :  { %v1062_v52 = vpop.permute.xlu1 %1061  ;;  %v1185_v53 = vpop.permute.xlu0 %1184 }
 0x1a2   :  { %1099 = vst.msk [vmem:[#allocation3 + $0x2c] sm:$0xf] %vm1087_vm10, %v1062_v52  ;;  %v2768_v52 = vld [vmem:[#allocation4 + $0x92] sm:$0xff] }
 0x1a3   :  { %1225 = vst.msk [vmem:[#allocation3 + $0x20] sm:$0xf] %vm1216_vm11, %v1185_v53  ;;  %v2776_v53 = vld [vmem:[#allocation4 + $0x132] sm:$0xff] }
 0x1a5   :  { %v1187_v43 = vpop.permute.xlu1 %1186  ;;  %v1189_v46 = vpop.permute.xlu0 %1188 }
 0x1a6   :  { %1226 = vst.msk [vmem:[#allocation3 + $0x24] sm:$0xf] %vm1216_vm11, %v1187_v43  ;;  %1227 = vst.msk [vmem:[#allocation3 + $0x28] sm:$0xf] %vm1216_vm11, %v1189_v46  ;;  %v5349_v43 = vpack.c.bf16 %v2768_v52, %v2768_v52  ;;  %v5357_v46 = vpack.c.bf16 %v2776_v53, %v2776_v53 }
 0x1a8   :  { %2848 = vst.msk [vmem:[#allocation5 + $0x5c] sm:$0xf] %vm1876_vm1, %v5349_v43  ;;  %2856 = vst.msk [vmem:[#allocation5 + $0xbc] sm:$0xf] %vm1876_vm1, %v5357_v46 }
 0x1a9   :  { %v1191_v55 = vpop.permute.xlu1 %1190  ;;  %v1314_v56 = vpop.permute.xlu0 %1313 }
 0x1aa   :  { %1228 = vst.msk [vmem:[#allocation3 + $0x2c] sm:$0xf] %vm1216_vm11, %v1191_v55 }
 0x1ab   :  { %1354 = vst.msk [vmem:[#allocation3 + $0x20] sm:$0xf] %vm1345_vm12, %v1314_v56 }
 0x1ad   :  { %v1316_v58 = vpop.permute.xlu1 %1315  ;;  %v418_v59 = vpop.permute.xlu0 %417 }
 0x1ae   :  { %1355 = vst.msk [vmem:[#allocation3 + $0x24] sm:$0xf] %vm1345_vm12, %v1316_v58 }
 0x1af   :  { %454 = vst.msk [vmem:[#allocation3 + $0x30] sm:$0xf] %vm441_vm4, %v418_v59 }
 0x1b1   :  { %v420_v48 = vpop.permute.xlu1 %419  ;;  %v1318_v61 = vpop.permute.xlu0 %1317 }
 0x1b2   :  { %455 = vst.msk [vmem:[#allocation3 + $0x34] sm:$0xf] %vm441_vm4, %v420_v48 }
 0x1b3   :  { %1356 = vst.msk [vmem:[#allocation3 + $0x28] sm:$0xf] %vm1345_vm12, %v1318_v61 }
 0x1b5   :  { %v1320_v62 = vpop.permute.xlu1 %1319  ;;  %v422_v63 = vpop.permute.xlu0 %421  ;;  %v5526_v1 = vld [vmem:[#allocation3 + $0x20] sm:$0xff]  }
 0x1b6   :  { %1357 = vst.msk [vmem:[#allocation3 + $0x2c] sm:$0xf] %vm1345_vm12, %v1320_v62  ;;  %5457 = vmatprep.mubr.msk.bf16.mxu0 %vm1438_vm13, %v5526_v1 }
 0x1b7   :  { %456 = vst.msk [vmem:[#allocation3 + $0x38] sm:$0xf] %vm441_vm4, %v422_v63 }
 0x1b9   :  { %v424_v2 = vpop.permute.xlu1 %423  ;;  %v547_v4 = vpop.permute.xlu0 %546 }
 0x1ba   :  { %457 = vst.msk [vmem:[#allocation3 + $0x3c] sm:$0xf] %vm441_vm4, %v424_v2  ;;  %vm2263_vm4 = vcmask 1044224  }
 0x1bb   :  { %583 = vst.msk [vmem:[#allocation3 + $0x30] sm:$0xf] %vm570_vm5, %v547_v4 }
 0x1bd   :  { %v549_v60 = vpop.permute.xlu1 %548  ;;  %v551_v5 = vpop.permute.xlu0 %550  ;;  %v5527_v6 = vld [vmem:[#allocation3 + $0x28] sm:$0xff]  }
 0x1be   :  { %584 = vst.msk [vmem:[#allocation3 + $0x34] sm:$0xf] %vm570_vm5, %v549_v60  ;;  %585 = vst.msk [vmem:[#allocation3 + $0x38] sm:$0xf] %vm570_vm5, %v551_v5  ;;  %5458 = vmatmul.mubr.msk.bf16.gmra.mxu0 %vm1438_vm13, %v5527_v6 }
 0x1c1   :  { %v553_v8 = vpop.permute.xlu1 %552  ;;  %v676_v9 = vpop.permute.xlu0 %675 }
 0x1c2   :  { %586 = vst.msk [vmem:[#allocation3 + $0x3c] sm:$0xf] %vm570_vm5, %v553_v8  ;;  %vm4431_vm5 = vcmask 1041409  }
 0x1c3   :  { %712 = vst.msk [vmem:[#allocation3 + $0x30] sm:$0xf] %vm699_vm7, %v676_v9 }
 0x1c5   :  { %v678_v10 = vpop.permute.xlu1 %677  ;;  %v680_v11 = vpop.permute.xlu0 %679 }
 0x1c6   :  { %713 = vst.msk [vmem:[#allocation3 + $0x34] sm:$0xf] %vm699_vm7, %v678_v10  ;;  %714 = vst.msk [vmem:[#allocation3 + $0x38] sm:$0xf] %vm699_vm7, %v680_v11 }
 0x1c9   :  { %v682_v12 = vpop.permute.xlu1 %681  ;;  %v805_v13 = vpop.permute.xlu0 %804 }
 0x1ca   :  { %715 = vst.msk [vmem:[#allocation3 + $0x3c] sm:$0xf] %vm699_vm7, %v682_v12  ;;  %vm4435_vm7 = vcmask 1043459  }
 0x1cb   :  { %841 = vst.msk [vmem:[#allocation3 + $0x30] sm:$0xf] %vm828_vm8, %v805_v13 }
 0x1cd   :  { %v807_v51 = vpop.permute.xlu1 %806  ;;  %v809_v14 = vpop.permute.xlu0 %808 }
 0x1ce   :  { %842 = vst.msk [vmem:[#allocation3 + $0x34] sm:$0xf] %vm828_vm8, %v807_v51  ;;  %843 = vst.msk [vmem:[#allocation3 + $0x38] sm:$0xf] %vm828_vm8, %v809_v14 }
 0x1d1   :  { %v811_v15 = vpop.permute.xlu1 %810  ;;  %v934_v16 = vpop.permute.xlu0 %933 }
 0x1d2   :  { %844 = vst.msk [vmem:[#allocation3 + $0x3c] sm:$0xf] %vm828_vm8, %v811_v15  ;;  %vm4437_vm8 = vcmask 1044484  }
 0x1d3   :  { %970 = vst.msk [vmem:[#allocation3 + $0x30] sm:$0xf] %vm957_vm9, %v934_v16 }
 0x1d5   :  { %v936_v17 = vpop.permute.xlu1 %935  ;;  %v938_v18 = vpop.permute.xlu0 %937 }
 0x1d6   :  { %971 = vst.msk [vmem:[#allocation3 + $0x34] sm:$0xf] %vm957_vm9, %v936_v17  ;;  %972 = vst.msk [vmem:[#allocation3 + $0x38] sm:$0xf] %vm957_vm9, %v938_v18 }
 0x1d9   :  { %v940_v19 = vpop.permute.xlu1 %939  ;;  %v1064_v20 = vpop.permute.xlu0 %1063 }
 0x1da   :  { %973 = vst.msk [vmem:[#allocation3 + $0x3c] sm:$0xf] %vm957_vm9, %v940_v19  ;;  %vm4439_vm9 = vcmask 1045509  }
 0x1db   :  { %1100 = vst.msk [vmem:[#allocation3 + $0x30] sm:$0xf] %vm1087_vm10, %v1064_v20 }
 0x1dd   :  { %v1066_v21 = vpop.permute.xlu1 %1065  ;;  %v1068_v0 = vpop.permute.xlu0 %1067 }
 0x1de   :  { %1101 = vst.msk [vmem:[#allocation3 + $0x34] sm:$0xf] %vm1087_vm10, %v1066_v21  ;;  %1102 = vst.msk [vmem:[#allocation3 + $0x38] sm:$0xf] %vm1087_vm10, %v1068_v0 }
 0x1e1   :  { %v1070_v22 = vpop.permute.xlu1 %1069  ;;  %v1193_v23 = vpop.permute.xlu0 %1192 }
 0x1e2   :  { %1103 = vst.msk [vmem:[#allocation3 + $0x3c] sm:$0xf] %vm1087_vm10, %v1070_v22  ;;  %vm4441_vm10 = vcmask 1046534  }
 0x1e3   :  { %1229 = vst.msk [vmem:[#allocation3 + $0x30] sm:$0xf] %vm1216_vm11, %v1193_v23 }
 0x1e5   :  { %v1195_v3 = vpop.permute.xlu1 %1194  ;;  %v1197_v24 = vpop.permute.xlu0 %1196 }
 0x1e6   :  { %1230 = vst.msk [vmem:[#allocation3 + $0x34] sm:$0xf] %vm1216_vm11, %v1195_v3  ;;  %1231 = vst.msk [vmem:[#allocation3 + $0x38] sm:$0xf] %vm1216_vm11, %v1197_v24 }
 0x1e9   :  { %v1199_v25 = vpop.permute.xlu1 %1198  ;;  %v1322_v26 = vpop.permute.xlu0 %1321 }
 0x1ea   :  { %1232 = vst.msk [vmem:[#allocation3 + $0x3c] sm:$0xf] %vm1216_vm11, %v1199_v25  ;;  %vm4443_vm11 = vcmask 1047559  }
 0x1eb   :  { %1358 = vst.msk [vmem:[#allocation3 + $0x30] sm:$0xf] %vm1345_vm12, %v1322_v26 }
 0x1ed   :  { %v1324_v27 = vpop.permute.xlu1 %1323  ;;  %v1326_v28 = vpop.permute.xlu0 %1325 }
 0x1ee   :  { %1359 = vst.msk [vmem:[#allocation3 + $0x34] sm:$0xf] %vm1345_vm12, %v1324_v27  ;;  %1360 = vst.msk [vmem:[#allocation3 + $0x38] sm:$0xf] %vm1345_vm12, %v1326_v28 }
 0x1f1   :  { %v1328_v54 = vpop.permute.xlu1 %1327 }
 0x1f2   :  { %1361 = vst.msk [vmem:[#allocation3 + $0x3c] sm:$0xf] %vm1345_vm12, %v1328_v54  ;;  %vm4502_vm12 = vcmask 15360  }
 0x1f5   :  { %v5528_v29 = vld [vmem:[#allocation3 + $0x30] sm:$0xff]  }
 0x1f6   :  { %5461 = vmatprep.mubr.msk.bf16.mxu0 %vm1438_vm13, %v5528_v29 }
 0x1f9   :  { %v5529_v47 = vld [vmem:[#allocation3 + $0x38] sm:$0xff]  }
 0x1fa   :  { %5462 = vmatmul.mubr.msk.bf16.gmra.mxu0 %vm1438_vm13, %v5529_v47  ;;  %vm4592_vm13 = vcmask 130112  }
 0x1fe   :  { %v6516_v45 = vpop.f32.mrf.mxu0 }
 0x1ff   :  { %v1606_v1 = vmul.f32 %v6516_v45, %v6516_v45  ;;  %v1570_v5 = vsel %vm1566_vm14, %v6516_v45, 0.0 }
 0x200   :  { %v6518_v37 = vpop.f32.mrf.mxu0 }
 0x201   :  { %v1604_v58 = vmul.f32 %v6518_v37, %v6518_v37  ;;  %v1567_v61 = vsel %vm1566_vm14, %v6518_v37, 0.0  ;;  %v1623_v9 = vsel %vm1566_vm14, %v1606_v1, 0.0 }
 0x202   :  { %v6520_v39 = vpop.f32.mrf.mxu0 }
 0x203   :  { %v1620_v2 = vsel %vm1566_vm14, %v1604_v58, 0.0  ;;  %v1607_v10 = vmul.f32 %v6520_v39, %v6520_v39  ;;  %v1572_v13 = vsel %vm1566_vm14, %v6520_v39, 0.0 }
 0x204   :  { %v6522_v49 = vpop.f32.mrf.mxu0 }
 0x205   :  { %v1605_v56 = vmul.f32 %v6522_v49, %v6522_v49  ;;  %v1568_v59 = vsel %vm1566_vm14, %v6522_v49, 0.0  ;;  %v1625_v17 = vsel %vm1566_vm14, %v1607_v10, 0.0 }
 0x206   :  { %v1569_v63 = vadd.f32 %v1568_v59, %v1567_v61 }
 0x207   :  { %v1621_v62 = vsel %vm1566_vm14, %v1605_v56, 0.0 }
 0x208   :  { %v1622_v4 = vadd.f32 %v1621_v62, %v1620_v2  ;;  %v1571_v6 = vadd.f32 %v1570_v5, %v1569_v63 }
 0x20a   :  { %v1624_v12 = vadd.f32 %v1623_v9, %v1622_v4  ;;  %v1573_v15 = vadd.f32 %v1572_v13, %v1571_v6 }
 0x20c   :  { %v1626_v21 = vadd.f32 %v1625_v17, %v1624_v12 }
 0x23e   :  { %v6524_v50 = vpop.f32.mrf.mxu0 }
 0x23f   :  { %v1610_v24 = vmul.f32 %v6524_v50, %v6524_v50  ;;  %v1578_v26 = vsel %vm1566_vm14, %v6524_v50, 0.0 }
 0x240   :  { %v6528_v55 = vpop.f32.mrf.mxu0 }
 0x241   :  { %v1608_v11 = vmul.f32 %v6528_v55, %v6528_v55  ;;  %v1574_v51 = vsel %vm1566_vm14, %v6528_v55, 0.0  ;;  %v1631_v54 = vsel %vm1566_vm14, %v1610_v24, 0.0 }
 0x242   :  { %v6536_v48 = vpop.f32.mrf.mxu0  ;;  %v1575_v20 = vadd.f32 %v1574_v51, %v1573_v15 }
 0x243   :  { %v1627_v18 = vsel %vm1566_vm14, %v1608_v11, 0.0  ;;  %v1611_v29 = vmul.f32 %v6536_v48, %v6536_v48  ;;  %v1580_v30 = vsel %vm1566_vm14, %v6536_v48, 0.0 }
 0x244   :  { %v6544_v60 = vpop.f32.mrf.mxu0  ;;  %v1628_v22 = vadd.f32 %v1627_v18, %v1626_v21 }
 0x245   :  { %v1609_v14 = vmul.f32 %v6544_v60, %v6544_v60  ;;  %v1576_v19 = vsel %vm1566_vm14, %v6544_v60, 0.0  ;;  %v1633_v36 = vsel %vm1566_vm14, %v1611_v29, 0.0 }
 0x246   :  { %v1577_v23 = vadd.f32 %v1576_v19, %v1575_v20 }
 0x247   :  { %v1629_v0 = vsel %vm1566_vm14, %v1609_v14, 0.0 }
 0x248   :  { %v1630_v25 = vadd.f32 %v1629_v0, %v1628_v22  ;;  %v1579_v27 = vadd.f32 %v1578_v26, %v1577_v23 }
 0x24a   :  { %v1632_v57 = vadd.f32 %v1631_v54, %v1630_v25  ;;  %v1581_v35 = vadd.f32 %v1580_v30, %v1579_v27 }
 0x24c   :  { %v1634_v40 = vadd.f32 %v1633_v36, %v1632_v57 }
 0x27e   :  { %v6548_v8 = vpop.f32.mrf.mxu0 }
 0x27f   :  { %v1614_v44 = vmul.f32 %v6548_v8, %v6548_v8  ;;  %v1586_v53 = vsel %vm1566_vm14, %v6548_v8, 0.0 }
 0x280   :  { %v6561_v16 = vpop.f32.mrf.mxu0 }
 0x281   :  { %v1612_v47 = vmul.f32 %v6561_v16, %v6561_v16  ;;  %v1582_v32 = vsel %vm1566_vm14, %v6561_v16, 0.0  ;;  %v1639_v56 = vsel %vm1566_vm14, %v1614_v44, 0.0 }
 0x282   :  { %v6568_v3 = vpop.f32.mrf.mxu0  ;;  %v1583_v38 = vadd.f32 %v1582_v32, %v1581_v35 }
 0x283   :  { %v1635_v31 = vsel %vm1566_vm14, %v1612_v47, 0.0  ;;  %v1615_v58 = vmul.f32 %v6568_v3, %v6568_v3  ;;  %v1588_v62 = vsel %vm1566_vm14, %v6568_v3, 0.0 }
 0x284   :  { %v6574_v28 = vpop.f32.mrf.mxu0  ;;  %v1636_v42 = vadd.f32 %v1635_v31, %v1634_v40 }
 0x285   :  { %v1613_v33 = vmul.f32 %v6574_v28, %v6574_v28  ;;  %v1584_v34 = vsel %vm1566_vm14, %v6574_v28, 0.0  ;;  %v1641_v5 = vsel %vm1566_vm14, %v1615_v58, 0.0 }
 0x286   :  { %v1585_v7 = vadd.f32 %v1584_v34, %v1583_v38 }
 0x287   :  { %v1637_v41 = vsel %vm1566_vm14, %v1613_v33, 0.0 }
 0x288   :  { %v1638_v52 = vadd.f32 %v1637_v41, %v1636_v42  ;;  %v1587_v43 = vadd.f32 %v1586_v53, %v1585_v7  ;;  %v1796_v53 = vld [vmem:[#allocation4] sm:$0xff] }
 0x28a   :  { %v1640_v59 = vadd.f32 %v1639_v56, %v1638_v52  ;;  %v1589_v2 = vadd.f32 %v1588_v62, %v1587_v43  ;;  %v1669_v52 = vlaneseq  ;;  %v5214_v43 = vpack.c.bf16 %v1796_v53, %v1796_v53  ;;  %v1958_v56 = vpop.permute.xlu0 %1957 }
 0x28c   :  { %v1642_v10 = vadd.f32 %v1641_v5, %v1640_v59  ;;  %1877 = vst.msk [vmem:[#allocation5] sm:$0xf] %vm1876_vm1, %v5214_v43  ;;  %v6627_v58 = vshrl.u32 %v1669_v52, 7  ;;  %v1564_v59 = vld [vmem:[%s7953_s3] sm:$0x1] }
 0x28d   :  { %2006 = vst.msk [vmem:[#allocation5] sm:$0xf] %vm2005_vm2, %v1958_v56 }
 0x28e   :  { %v2087_v62 = vpop.permute.xlu0 %2086 }
 0x28f   :  { %2135 = vst.msk [vmem:[#allocation5] sm:$0xf] %vm2134_vm3, %v2087_v62 }
 0x2ba   :  { %v6596_v46 = vpop.f32.mrf.mxu0 }
 0x2bb   :  { %v1618_v12 = vmul.f32 %v6596_v46, %v6596_v46  ;;  %v1594_v17 = vsel %vm1566_vm14, %v6596_v46, 0.0 }
 0x2bc   :  { %v6601_v61 = vpop.f32.mrf.mxu0 }
 0x2bd   :  { %v1590_v63 = vsel %vm1566_vm14, %v6601_v61, 0.0  ;;  %v1616_v1 = vmul.f32 %v6601_v61, %v6601_v61  ;;  %v1647_v0 = vsel %vm1566_vm14, %v1618_v12, 0.0 }
 0x2be   :  { %v6609_v4 = vpop.f32.mrf.mxu0  ;;  %v1591_v9 = vadd.f32 %v1590_v63, %v1589_v2  ;;  %v6634_v63 = vsub.s32 0, %v6627_v58 }
 0x2bf   :  { %v1643_v6 = vsel %vm1566_vm14, %v1616_v1, 0.0  ;;  %v1619_v18 = vmul.f32 %v6609_v4, %v6609_v4  ;;  %v1596_v22 = vsel %vm1566_vm14, %v6609_v4, 0.0  ;;  %v1804_v1 = vld [vmem:[#allocation4 + $0xa0] sm:$0xff] }
 0x2c0   :  { %v1552_v11 = vpop.f32.mrf.mxu0  ;;  %v1644_v14 = vadd.f32 %v1643_v6, %v1642_v10  ;;  %v5222_v5 = vpack.c.bf16 %v1804_v1, %v1804_v1  ;;  %v1974_v10 = vpop.permute.xlu0 %1973 }
 0x2c1   :  { %v1592_v13 = vsel %vm1566_vm14, %v1552_v11, 0.0  ;;  %v1617_v51 = vmul.f32 %v1552_v11, %v1552_v11  ;;  %v1649_v25 = vsel %vm1566_vm14, %v1619_v18, 0.0 }
 0x2c2   :  { %v1593_v15 = vadd.f32 %v1592_v13, %v1591_v9  ;;  %v1565_v9 = vld [vmem:[%s7954_s4] sm:$0x1]  ;;  %1885 = vst.msk [vmem:[#allocation5 + $0x60] sm:$0xf] %vm1876_vm1, %v5222_v5 }
 0x2c3   :  { %v1645_v19 = vsel %vm1566_vm14, %v1617_v51, 0.0  ;;  %2014 = vst.msk [vmem:[#allocation5 + $0x60] sm:$0xf] %vm2005_vm2, %v1974_v10 }
 0x2c4   :  { %v1595_v20 = vadd.f32 %v1594_v17, %v1593_v15  ;;  %v1646_v21 = vadd.f32 %v1645_v19, %v1644_v14 }
 0x2c6   :  { %v1597_v23 = vadd.f32 %v1596_v22, %v1595_v20  ;;  %v1648_v24 = vadd.f32 %v1647_v0, %v1646_v21  ;;  %v2103_v0 = vpop.permute.xlu0 %2102 }
 0x2c7   :  { %2143 = vst.msk [vmem:[#allocation5 + $0x60] sm:$0xf] %vm2134_vm3, %v2103_v0 }
 0x2c8   :  { %v1598_v26 = vrot.slane %v1597_v23, 4  ;;  %v1650_v27 = vadd.f32 %v1649_v25, %v1648_v24 }
 0x2ca   :  { %v1599_v54 = vadd.f32 %v1598_v26, %v1597_v23  ;;  %v1651_v29 = vrot.slane %v1650_v27, 4 }
 0x2cc   :  { %v1600_v47 = vrot.slane %v1599_v54, 2  ;;  %v1652_v57 = vadd.f32 %v1651_v29, %v1650_v27  ;;  %v5531_v29 = vld [vmem:[%s7952_s2 + $0x38] sm:$0xff]  }
 0x2ce   :  { %v1601_v30 = vadd.f32 %v1600_v47, %v1599_v54  ;;  %v1653_v32 = vrot.slane %v1652_v57, 2 }
 0x2d0   :  { %v1602_v33 = vrot.slane %v1601_v30, 1  ;;  %v1654_v35 = vadd.f32 %v1653_v32, %v1652_v57 }
 0x2d2   :  { %v1603_v36 = vadd.f32 %v1602_v33, %v1601_v30  ;;  %v1655_v31 = vrot.slane %v1654_v35, 1 }
 0x2d4   :  { %v1656_v34 = vadd.f32 %v1655_v31, %v1654_v35  ;;  %v1658_v38 = vmul.f32 0.0078125, %v1603_v36 }
 0x2d6   :  { %v1659_v40 = vmul.f32 0.0078125, %v1656_v34  ;;  %v1660_v41 = vmul.f32 %v1658_v38, %v1658_v38 }
 0x2d8   :  { %v1661_v42 = vsub.f32 %v1659_v40, %v1660_v41  ;;  %v5533_v40 = vld [vmem:[%s7952_s2 + $0x30] sm:$0xff]  }
 0x2da   :  { %v1662_v7 = vmax.f32 %v1661_v42, 0.0 }
 0x2dc   :  { %v1663_v44 = vadd.f32 1e-05, %v1662_v7 }
 0x2de   :  { %5575 = vrsqrt.f32 %v1663_v44 }
 0x2eb   :  { %v5576_v2 = vpop.eup %5575 }
 0x2ec   :  { %v1665_v6 = vmul.f32 %v5576_v2, %v1564_v59  ;;  %v5534_v59 = vld [vmem:[%s7952_s2 + $0x68] sm:$0xff]  }
 0x2ee   :  { %v1666_v12 = vmul.f32 %v1665_v6, %v1658_v38  ;;  %v1672_v13 = vrot.slane %v1665_v6, %v6634_v63 }
 0x2f0   :  { %v1667_v51 = vsub.f32 %v1565_v9, %v1666_v12  ;;  %v1687_v14 = vmul.f32 %v1672_v13, %v1552_v11  ;;  %v1676_v15 = vmul.f32 %v6516_v45, %v1672_v13  ;;  %v1675_v17 = vmul.f32 %v1672_v13, %v6522_v49  ;;  %v5530_v45 = vld [vmem:[%s7952_s2 + $0x78] sm:$0xff]   ;;  %v5536_v9 = vld [vmem:[%s7952_s2 + $0x60] sm:$0xff]  }
 0x2f1   :  { %v1677_v18 = vmul.f32 %v6520_v39, %v1672_v13  ;;  %v1678_v19 = vmul.f32 %v1672_v13, %v6528_v55  ;;  %v1679_v20 = vmul.f32 %v1672_v13, %v6544_v60  ;;  %v1680_v21 = vmul.f32 %v6524_v50, %v1672_v13  ;;  %5485 = vmatprep.subr.bf16.mxu1 %v5530_v45 }
 0x2f2   :  { %v1694_v22 = vrot.slane %v1667_v51, %v6634_v63  ;;  %v1674_v23 = vmul.f32 %v1672_v13, %v6518_v37  ;;  %v1681_v24 = vmul.f32 %v6536_v48, %v1672_v13  ;;  %v1682_v11 = vmul.f32 %v1672_v13, %v6561_v16  ;;  %5369 = vmatprep.subr.bf16.mxu0 %v5530_v45 }
 0x2f3   :  { %v1683_v39 = vmul.f32 %v1672_v13, %v6574_v28  ;;  %v1684_v49 = vmul.f32 %v6548_v8, %v1672_v13  ;;  %v1685_v50 = vmul.f32 %v6568_v3, %v1672_v13  ;;  %v1686_v55 = vmul.f32 %v1672_v13, %v6601_v61  ;;  %v5532_v61 = vld [vmem:[%s7952_s2 + $0x70] sm:$0xff]   ;;  %5493 = vmatpush3.bf16.msra.mxu1 %v5531_v29 }
 0x2f4   :  { %v1709_v60 = vadd.f32 %v1694_v22, %v1687_v14  ;;  %v1698_v37 = vadd.f32 %v1694_v22, %v1676_v15  ;;  %v1697_v25 = vadd.f32 %v1694_v22, %v1675_v17  ;;  %v1699_v48 = vadd.f32 %v1694_v22, %v1677_v18  ;;  %5370 = vmatpush3.bf16.msra.mxu0 %v5531_v29 }
 0x2f5   :  { %v1700_v16 = vadd.f32 %v1694_v22, %v1678_v19  ;;  %v1701_v26 = vadd.f32 %v1694_v22, %v1679_v20  ;;  %v1702_v27 = vadd.f32 %v1694_v22, %v1680_v21  ;;  %v1696_v54 = vadd.f32 %v1694_v22, %v1674_v23  ;;  %5486 = vmatprep.subr.bf16.mxu1 %v5532_v61 }
 0x2f6   :  { %v1725_v28 = vmax.f32 %v1709_v60, 0.0  ;;  %v1714_v8 = vmax.f32 %v1698_v37, 0.0  ;;  %v1713_v47 = vmax.f32 %v1697_v25, 0.0  ;;  %v1715_v3 = vmax.f32 %v1699_v48, 0.0  ;;  %5371 = vmatprep.subr.bf16.mxu0 %v5532_v61 }
 0x2f7   :  { %v1716_v57 = vmax.f32 %v1700_v16, 0.0  ;;  %v1717_v30 = vmax.f32 %v1701_v26, 0.0  ;;  %v1718_v32 = vmax.f32 %v1702_v27, 0.0  ;;  %v1712_v33 = vmax.f32 %v1696_v54, 0.0  ;;  %5494 = vmatpush3.bf16.msra.mxu1 %v5533_v40 }
 0x2f8   :  { %1793 = vst.msk [vmem:[#allocation4 + $0x101] sm:$0xff] %vm1566_vm14, %v1725_v28  ;;  %1782 = vst.msk [vmem:[#allocation4 + $0x31] sm:$0xff] %vm1566_vm14, %v1714_v8  ;;  %v1703_v35 = vadd.f32 %v1694_v22, %v1681_v24  ;;  %v1704_v36 = vadd.f32 %v1694_v22, %v1682_v11  ;;  %v1705_v31 = vadd.f32 %v1694_v22, %v1683_v39  ;;  %5372 = vmatpush3.bf16.msra.mxu0 %v5533_v40 }
 0x2f9   :  { %1781 = vst.msk [vmem:[#allocation4 + $0x21] sm:$0xff] %vm1566_vm14, %v1713_v47  ;;  %1783 = vst.msk [vmem:[#allocation4 + $0x41] sm:$0xff] %vm1566_vm14, %v1715_v3  ;;  %v1706_v34 = vadd.f32 %v1694_v22, %v1684_v49  ;;  %v1707_v38 = vadd.f32 %v1694_v22, %v1685_v50  ;;  %v1708_v41 = vadd.f32 %v1694_v22, %v1686_v55  ;;  %5487 = vmatprep.subr.bf16.mxu1 %v5534_v59 }
 0x2fa   :  { %1784 = vst.msk [vmem:[#allocation4 + $0x51] sm:$0xff] %vm1566_vm14, %v1716_v57  ;;  %1785 = vst.msk [vmem:[#allocation4 + $0x61] sm:$0xff] %vm1566_vm14, %v1717_v30  ;;  %v1688_v42 = vmul.f32 %v6596_v46, %v1672_v13  ;;  %v1689_v7 = vmul.f32 %v6609_v4, %v1672_v13  ;;  %v1719_v44 = vmax.f32 %v1703_v35, 0.0  ;;  %v1720_v53 = vmax.f32 %v1704_v36, 0.0  ;;  %5373 = vmatprep.subr.bf16.mxu0 %v5534_v59  ;;  %v5535_v46 = vld [vmem:[%s7952_s2 + $0x28] sm:$0xff]  }
 0x2fb   :  { %1786 = vst.msk [vmem:[#allocation4 + $0x71] sm:$0xff] %vm1566_vm14, %v1718_v32  ;;  %1780 = vst.msk [vmem:[#allocation4 + $0x11] sm:$0xff] %vm1566_vm14, %v1712_v33  ;;  %v1721_v43 = vmax.f32 %v1705_v31, 0.0  ;;  %v1722_v56 = vmax.f32 %v1706_v34, 0.0  ;;  %v1723_v62 = vmax.f32 %v1707_v38, 0.0  ;;  %v1724_v1 = vmax.f32 %v1708_v41, 0.0  ;;  %5495 = vmatpush3.bf16.msra.mxu1 %v5535_v46 }
 0x2fc   :  { %v1710_v2 = vadd.f32 %v1694_v22, %v1688_v42  ;;  %v1711_v5 = vadd.f32 %v1694_v22, %v1689_v7  ;;  %1787 = vst.msk [vmem:[#allocation4 + $0x81] sm:$0xff] %vm1566_vm14, %v1719_v44  ;;  %1788 = vst.msk [vmem:[#allocation4 + $0xb1] sm:$0xff] %vm1566_vm14, %v1720_v53  ;;  %5374 = vmatpush3.bf16.msra.mxu0 %v5535_v46  ;;  %5488 = vmatprep.subr.bf16.mxu1 %v5536_v9 }
 0x2fd   :  { %1789 = vst.msk [vmem:[#allocation4 + $0xc1] sm:$0xff] %vm1566_vm14, %v1721_v43  ;;  %1790 = vst.msk [vmem:[#allocation4 + $0xd1] sm:$0xff] %vm1566_vm14, %v1722_v56  ;;  %5375 = vmatprep.subr.bf16.mxu0 %v5536_v9 }
 0x2fe   :  { %1791 = vst.msk [vmem:[#allocation4 + $0xe1] sm:$0xff] %vm1566_vm14, %v1723_v62  ;;  %1792 = vst.msk [vmem:[#allocation4 + $0xf1] sm:$0xff] %vm1566_vm14, %v1724_v1  ;;  %v1726_v4 = vmax.f32 %v1710_v2, 0.0  ;;  %v1727_v6 = vmax.f32 %v1711_v5, 0.0 }
 0x2ff   :  { %v1896_v10 = vld [vmem:[#allocation4 + $0x31] sm:$0xff] }
 0x300   :  { %v1895_v12 = vld [vmem:[#allocation4 + $0x21] sm:$0xff]  ;;  %1794 = vst.msk [vmem:[#allocation4 + $0x111] sm:$0xff] %vm1566_vm14, %v1726_v4  ;;  %1795 = vst.msk [vmem:[#allocation4 + $0x121] sm:$0xff] %vm1566_vm14, %v1727_v6  ;;  %v6697_v13 = vpack.c.bf16 %v1896_v10, %v1896_v10  ;;  %v2378_v15 = vld [vmem:[#allocation4 + $0x32] sm:$0xff] }
 0x301   :  { %v6699_v51 = vpack.c.bf16 %v1895_v12, %v1895_v12  ;;  %v2379_v14 = vld [vmem:[#allocation4 + $0x42] sm:$0xff]  ;;  %v2508_v17 = vld [vmem:[#allocation4 + $0x50] sm:$0xff]  ;;  %v5296_v55 = vpack.c.bf16 %v2378_v15, %v2378_v15  ;;  %v5538_v12 = vld [vmem:[%s7952_s2 + $0x58] sm:$0xff]  }
 0x302   :  { %v6701_v18 = vpack.c.bf16 %v2508_v17, %v2508_v17  ;;  %v2507_v19 = vld [vmem:[#allocation4 + $0x40] sm:$0xff]  ;;  %v2153_v20 = vld [vmem:[#allocation4 + $0x30] sm:$0xff]  ;;  %1963 = vrot.lane.b32.xlu1 %v6697_v13, %s5642_s22  ;;  %2362 = vst.msk [vmem:[#allocation5 + $0x1c] sm:$0xf] %vm1876_vm1, %v6697_v13  ;;  %v6717_v11 = vpack.c.bf16 %v2379_v14, %v2379_v14 }
 0x303   :  { %v2636_v21 = vld [vmem:[#allocation4 + $0x51] sm:$0xff]  ;;  %1961 = vrot.lane.b32.xlu0 %v6699_v51, %s5642_s22  ;;  %v6707_v0 = vpack.c.bf16 %v2507_v19, %v2507_v19  ;;  %v6709_v22 = vpack.c.bf16 %v2153_v20, %v2153_v20  ;;  %v2635_v24 = vld [vmem:[#allocation4 + $0x41] sm:$0xff]  ;;  %2361 = vst.msk [vmem:[#allocation5 + $0x10] sm:$0xf] %vm1876_vm1, %v6699_v51 }
 0x304   :  { %v6711_v23 = vpack.c.bf16 %v2636_v21, %v2636_v21  ;;  %v6719_v45 = vpack.c.bf16 %v2635_v24, %v2635_v24  ;;  %v2510_v39 = vld [vmem:[#allocation4 + $0x70] sm:$0xff]  ;;  %v2509_v49 = vld [vmem:[#allocation4 + $0x60] sm:$0xff]  ;;  %1882 = vst.msk [vmem:[#allocation5 + $0x3c] sm:$0xf] %vm1876_vm1, %v6701_v18  ;;  %v5539_v19 = vld [vmem:[%s7952_s2 + $0x18] sm:$0xff]  }
 0x305   :  { %v2638_v50 = vld [vmem:[#allocation4 + $0x71] sm:$0xff]  ;;  %v6723_v60 = vpack.c.bf16 %v2510_v39, %v2510_v39  ;;  %v6725_v37 = vpack.c.bf16 %v2509_v49, %v2509_v49  ;;  %v2637_v48 = vld [vmem:[#allocation4 + $0x61] sm:$0xff]  ;;  %1880 = vst.msk [vmem:[#allocation5 + $0x24] sm:$0xf] %vm1876_vm1, %v6709_v22  ;;  %1881 = vst.msk [vmem:[#allocation5 + $0x30] sm:$0xf] %vm1876_vm1, %v6707_v0 }
 0x306   :  { %v6727_v25 = vpack.c.bf16 %v2638_v50, %v2638_v50  ;;  %v1894_v16 = vld [vmem:[#allocation4 + $0x11] sm:$0xff]  ;;  %2364 = vst.msk [vmem:[#allocation5 + $0x34] sm:$0xf] %vm1876_vm1, %v6711_v23  ;;  %v2024_v26 = vld [vmem:[#allocation4 + $0x22] sm:$0xff]  ;;  %v6735_v27 = vpack.c.bf16 %v2637_v48, %v2637_v48  ;;  %2363 = vst.msk [vmem:[#allocation5 + $0x28] sm:$0xf] %vm1876_vm1, %v6719_v45  ;;  %2446 = vrot.lane.b32.xlu1 %v6717_v11, %s5642_s22 }
 0x307   :  { %v6737_v54 = vpack.c.bf16 %v1894_v16, %v1894_v16  ;;  %v2505_v29 = vld [vmem:[#allocation4 + $0x20] sm:$0xff]  ;;  %v2151_v28 = vld [vmem:[#allocation4 + $0x10] sm:$0xff]  ;;  %2444 = vrot.lane.b32.xlu0 %v5296_v55, %s5642_s22  ;;  %1883 = vst.msk [vmem:[#allocation5 + $0x48] sm:$0xf] %vm1876_vm1, %v6725_v37  ;;  %1884 = vst.msk [vmem:[#allocation5 + $0x54] sm:$0xf] %vm1876_vm1, %v6723_v60  ;;  %v6762_v35 = vpack.c.bf16 %v2024_v26, %v2024_v26 }
 0x308   :  { %v6744_v8 = vpack.c.bf16 %v2505_v29, %v2505_v29  ;;  %v6746_v47 = vpack.c.bf16 %v2151_v28, %v2151_v28  ;;  %v2383_v3 = vld [vmem:[#allocation4 + $0x82] sm:$0xff]  ;;  %2366 = vst.msk [vmem:[#allocation5 + $0x4c] sm:$0xf] %vm1876_vm1, %v6727_v25  ;;  %v1902_v32 = vld [vmem:[#allocation4 + $0xb1] sm:$0xff]  ;;  %2365 = vst.msk [vmem:[#allocation5 + $0x40] sm:$0xf] %vm1876_vm1, %v6735_v27 }
 0x309   :  { %v2639_v61 = vld [vmem:[#allocation4 + $0x81] sm:$0xff]  ;;  %v6754_v57 = vpack.c.bf16 %v2383_v3, %v2383_v3  ;;  %2360 = vst.msk [vmem:[#allocation5 + $0x4] sm:$0xf] %vm1876_vm1, %v6737_v54  ;;  %v6764_v36 = vpack.c.bf16 %v1902_v32, %v1902_v32  ;;  %v2159_v38 = vld [vmem:[#allocation4 + $0xb0] sm:$0xff] }
 0x30a   :  { %v6756_v30 = vpack.c.bf16 %v2639_v61, %v2639_v61  ;;  %v2513_v33 = vld [vmem:[#allocation4 + $0xc0] sm:$0xff]  ;;  %1879 = vst.msk [vmem:[#allocation5 + $0x18] sm:$0xf] %vm1876_vm1, %v6744_v8  ;;  %1878 = vst.msk [vmem:[#allocation5 + $0xc] sm:$0xf] %vm1876_vm1, %v6746_v47  ;;  %v6774_v42 = vpack.c.bf16 %v2159_v38, %v2159_v38  ;;  %v2514_v44 = vld [vmem:[#allocation4 + $0xd0] sm:$0xff]  ;;  %2092 = vrot.lane.b32.xlu1 %v5296_v55, %s5643_s1 }
 0x30b   :  { %v6766_v31 = vpack.c.bf16 %v2513_v33, %v2513_v33  ;;  %v2385_v34 = vld [vmem:[#allocation4 + $0xc2] sm:$0xff]  ;;  %v2386_v53 = vld [vmem:[#allocation4 + $0xd2] sm:$0xff]  ;;  %2847 = vst.msk [vmem:[#allocation5 + $0x50] sm:$0xf] %vm1876_vm1, %v6754_v57  ;;  %2090 = vrot.lane.b32.xlu0 %v6762_v35, %s5643_s1  ;;  %v6785_v56 = vpack.c.bf16 %v2514_v44, %v2514_v44  ;;  %2368 = vst.msk [vmem:[#allocation5 + $0x64] sm:$0xf] %vm1876_vm1, %v6764_v36 }
 0x30c   :  { %v2641_v40 = vld [vmem:[#allocation4 + $0xc1] sm:$0xff]  ;;  %v6772_v41 = vpack.c.bf16 %v2385_v34, %v2385_v34  ;;  %v2642_v43 = vld [vmem:[#allocation4 + $0xd1] sm:$0xff]  ;;  %2367 = vst.msk [vmem:[#allocation5 + $0x58] sm:$0xf] %vm1876_vm1, %v6756_v30  ;;  %v6787_v59 = vpack.c.bf16 %v2386_v53, %v2386_v53  ;;  %1886 = vst.msk [vmem:[#allocation5 + $0x6c] sm:$0xf] %vm1876_vm1, %v6774_v42 }
 0x30d   :  { %v6776_v7 = vpack.c.bf16 %v2641_v40, %v2641_v40  ;;  %v6789_v62 = vpack.c.bf16 %v2642_v43, %v2642_v43  ;;  %v2515_v1 = vld [vmem:[#allocation4 + $0xe0] sm:$0xff]  ;;  %1887 = vst.msk [vmem:[#allocation5 + $0x78] sm:$0xf] %vm1876_vm1, %v6766_v31  ;;  %v2516_v9 = vld [vmem:[#allocation4 + $0xf0] sm:$0xff]  ;;  %1888 = vst.msk [vmem:[#allocation5 + $0x84] sm:$0xf] %vm1876_vm1, %v6785_v56 }
 0x30e   :  { %v2387_v2 = vld [vmem:[#allocation4 + $0xe2] sm:$0xff]  ;;  %v6795_v46 = vpack.c.bf16 %v2515_v1, %v2515_v1  ;;  %2849 = vst.msk [vmem:[#allocation5 + $0x68] sm:$0xf] %vm1876_vm1, %v6772_v41  ;;  %v6813_v14 = vpack.c.bf16 %v2516_v9, %v2516_v9  ;;  %v2388_v15 = vld [vmem:[#allocation4 + $0xf2] sm:$0xff]  ;;  %2850 = vst.msk [vmem:[#allocation5 + $0x74] sm:$0xf] %vm1876_vm1, %v6787_v59  ;;  %2575 = vrot.lane.b32.xlu1 %v6701_v18, %s5643_s1 }
 0x30f   :  { %v2643_v5 = vld [vmem:[#allocation4 + $0xe1] sm:$0xff]  ;;  %v6797_v4 = vpack.c.bf16 %v2387_v2, %v2387_v2  ;;  %2369 = vst.msk [vmem:[#allocation5 + $0x70] sm:$0xf] %vm1876_vm1, %v6776_v7  ;;  %v2644_v17 = vld [vmem:[#allocation4 + $0xf1] sm:$0xff]  ;;  %2370 = vst.msk [vmem:[#allocation5 + $0x7c] sm:$0xf] %vm1876_vm1, %v6789_v62  ;;  %v6824_v20 = vpack.c.bf16 %v2388_v15, %v2388_v15  ;;  %2573 = vrot.lane.b32.xlu0 %v6707_v0, %s5643_s1 }
 0x310   :  { %v6799_v6 = vpack.c.bf16 %v2643_v5, %v2643_v5  ;;  %v5537_v10 = vld [vmem:[%s7952_s2 + $0x20] sm:$0xff]   ;;  %v6826_v21 = vpack.c.bf16 %v2644_v17, %v2644_v17  ;;  %1889 = vst.msk [vmem:[#allocation5 + $0x90] sm:$0xf] %vm1876_vm1, %v6795_v46  ;;  %1890 = vst.msk [vmem:[#allocation5 + $0x9c] sm:$0xf] %vm1876_vm1, %v6813_v14  ;;  %v5540_v49 = vld [vmem:[%s7952_s2 + $0x50] sm:$0xff]  }
 0x311   :  { %5496 = vmatpush3.bf16.msra.mxu1 %v5537_v10  ;;  %5376 = vmatpush3.bf16.msra.mxu0 %v5537_v10  ;;  %2851 = vst.msk [vmem:[#allocation5 + $0x80] sm:$0xf] %vm1876_vm1, %v6797_v4  ;;  %v2517_v24 = vld [vmem:[#allocation4 + $0x100] sm:$0xff]  ;;  %v2518_v16 = vld [vmem:[#allocation4 + $0x110] sm:$0xff]  ;;  %2852 = vst.msk [vmem:[#allocation5 + $0x8c] sm:$0xf] %vm1876_vm1, %v6824_v20 }
 0x312   :  { %2371 = vst.msk [vmem:[#allocation5 + $0x88] sm:$0xf] %vm1876_vm1, %v6799_v6  ;;  %v2389_v39 = vld [vmem:[#allocation4 + $0x102] sm:$0xff]  ;;  %5489 = vmatprep.subr.bf16.mxu1 %v5538_v12  ;;  %v6843_v50 = vpack.c.bf16 %v2517_v24, %v2517_v24  ;;  %5377 = vmatprep.subr.bf16.mxu0 %v5538_v12  ;;  %2372 = vst.msk [vmem:[#allocation5 + $0x94] sm:$0xf] %vm1876_vm1, %v6826_v21  ;;  %v5541_v26 = vld [vmem:[%s7952_s2 + $0x10] sm:$0xff]   ;;  %v6856_v28 = vpack.c.bf16 %v2518_v16, %v2518_v16 }
 0x313   :  { %v6845_v55 = vpack.c.bf16 %v2389_v39, %v2389_v39  ;;  %v2645_v48 = vld [vmem:[#allocation4 + $0x101] sm:$0xff]  ;;  %v2390_v3 = vld [vmem:[#allocation4 + $0x112] sm:$0xff]  ;;  %2221 = vrot.lane.b32.xlu1 %v6707_v0, %s5644_s26  ;;  %2219 = vrot.lane.b32.xlu0 %v6709_v22, %s5644_s26 }
 0x314   :  { %v6854_v29 = vpack.c.bf16 %v2645_v48, %v2645_v48  ;;  %v2646_v61 = vld [vmem:[#allocation4 + $0x111] sm:$0xff]  ;;  %v5542_v32 = vld [vmem:[%s7952_s2 + $0x48] sm:$0xff]   ;;  %v6861_v33 = vpack.c.bf16 %v2390_v3, %v2390_v3  ;;  %1891 = vst.msk [vmem:[#allocation5 + $0xa8] sm:$0xf] %vm1876_vm1, %v6843_v50  ;;  %1892 = vst.msk [vmem:[#allocation5 + $0xb4] sm:$0xf] %vm1876_vm1, %v6856_v28 }
 0x315   :  { %5497 = vmatpush3.bf16.msra.mxu1 %v5539_v19  ;;  %v6863_v34 = vpack.c.bf16 %v2646_v61, %v2646_v61  ;;  %v2391_v38 = vld [vmem:[#allocation4 + $0x122] sm:$0xff]  ;;  %5378 = vmatpush3.bf16.msra.mxu0 %v5539_v19  ;;  %2853 = vst.msk [vmem:[#allocation5 + $0x98] sm:$0xf] %vm1876_vm1, %v6845_v55  ;;  %v2762_v1 = vld [vmem:[#allocation4 + $0x32] sm:$0xff] }
 0x316   :  { %v2647_v40 = vld [vmem:[#allocation4 + $0x121] sm:$0xff]  ;;  %v6873_v44 = vpack.c.bf16 %v2391_v38, %v2391_v38  ;;  %2373 = vst.msk [vmem:[#allocation5 + $0xa0] sm:$0xf] %vm1876_vm1, %v6854_v29  ;;  %5490 = vmatprep.subr.bf16.mxu1 %v5540_v49  ;;  %5379 = vmatprep.subr.bf16.mxu0 %v5540_v49  ;;  %v5343_v0 = vpack.c.bf16 %v2762_v1, %v2762_v1  ;;  %v2764_v9 = vld [vmem:[#allocation4 + $0x52] sm:$0xff]  ;;  %2854 = vst.msk [vmem:[#allocation5 + $0xa4] sm:$0xf] %vm1876_vm1, %v6861_v33 }
 0x317   :  { %v6875_v53 = vpack.c.bf16 %v2647_v40, %v2647_v40  ;;  %v2761_v43 = vld [vmem:[#allocation4 + $0x22] sm:$0xff]  ;;  %v2766_v15 = vld [vmem:[#allocation4 + $0x72] sm:$0xff]  ;;  %2374 = vst.msk [vmem:[#allocation5 + $0xac] sm:$0xf] %vm1876_vm1, %v6863_v34  ;;  %v5345_v17 = vpack.c.bf16 %v2764_v9, %v2764_v9  ;;  %2703 = vrot.lane.b32.xlu1 %v6711_v23, %s5644_s26  ;;  %2701 = vrot.lane.b32.xlu0 %v6719_v45, %s5644_s26 }
 0x318   :  { %v2763_v2 = vld [vmem:[#allocation4 + $0x42] sm:$0xff]  ;;  %v5342_v5 = vpack.c.bf16 %v2761_v43, %v2761_v43  ;;  %v5347_v24 = vpack.c.bf16 %v2766_v15, %v2766_v15  ;;  %2855 = vst.msk [vmem:[#allocation5 + $0xb0] sm:$0xf] %vm1876_vm1, %v6873_v44  ;;  %2842 = vst.msk [vmem:[#allocation5 + $0x14] sm:$0xf] %vm1876_vm1, %v5343_v0  ;;  %v2380_v16 = vld [vmem:[#allocation4 + $0x52] sm:$0xff] }
 0x319   :  { %v5344_v10 = vpack.c.bf16 %v2763_v2, %v2763_v2  ;;  %v2765_v12 = vld [vmem:[#allocation4 + $0x62] sm:$0xff]  ;;  %2375 = vst.msk [vmem:[#allocation5 + $0xb8] sm:$0xf] %vm1876_vm1, %v6875_v53  ;;  %5498 = vmatpush3.bf16.msra.mxu1 %v5541_v26  ;;  %5380 = vmatpush3.bf16.msra.mxu0 %v5541_v26  ;;  %2844 = vst.msk [vmem:[#allocation5 + $0x2c] sm:$0xf] %vm1876_vm1, %v5345_v17  ;;  %v5298_v61 = vpack.c.bf16 %v2380_v16, %v2380_v16 }
 0x31a   :  { %v5346_v19 = vpack.c.bf16 %v2765_v12, %v2765_v12  ;;  %v5543_v39 = vld [vmem:[%s7952_s2 + $0x8] sm:$0xff]   ;;  %2841 = vst.msk [vmem:[#allocation5 + $0x8] sm:$0xf] %vm1876_vm1, %v5342_v5  ;;  %2846 = vst.msk [vmem:[#allocation5 + $0x44] sm:$0xf] %vm1876_vm1, %v5347_v24  ;;  %5491 = vmatprep.subr.bf16.mxu1 %v5542_v32  ;;  %v5544_v49 = vld [vmem:[%s7952_s2 + $0x40] sm:$0xff]   ;;  %5381 = vmatprep.subr.bf16.mxu0 %v5542_v32 }
 0x31b   :  { %2843 = vst.msk [vmem:[#allocation5 + $0x20] sm:$0xf] %vm1876_vm1, %v5344_v10  ;;  %v2381_v48 = vld [vmem:[#allocation4 + $0x62] sm:$0xff]  ;;  %1967 = vrot.lane.b32.xlu1 %v6711_v23, %s5642_s22  ;;  %1965 = vrot.lane.b32.xlu0 %v6719_v45, %s5642_s22  ;;  %v2376_v23 = vld [vmem:[#allocation4 + $0x12] sm:$0xff] }
 0x31c   :  { %2845 = vst.msk [vmem:[#allocation5 + $0x38] sm:$0xf] %vm1876_vm1, %v5346_v19  ;;  %v5545_v26 = vld [vmem:[%s7952_s2] sm:$0xff]   ;;  %v5299_v3 = vpack.c.bf16 %v2381_v48, %v2381_v48  ;;  %v2648_v19 = vld [vmem:[#allocation4 + $0x131] sm:$0xff] }
 0x31d   :  { %5499 = vmatpush3.bf16.msra.mxu1 %v5543_v39  ;;  %5382 = vmatpush3.bf16.msra.mxu0 %v5543_v39  ;;  %v5341_v39 = vpack.c.bf16 %v2648_v19, %v2648_v19 }
 0x31e   :  { %5492 = vmatprep.subr.bf16.mxu1 %v5544_v49  ;;  %5383 = vmatprep.subr.bf16.mxu0 %v5544_v49 }
 0x31f   :  { %2450 = vrot.lane.b32.xlu1 %v5299_v3, %s5642_s22  ;;  %2448 = vrot.lane.b32.xlu0 %v5298_v61, %s5642_s22 }
 0x321   :  { %5500 = vmatpush3.bf16.msra.mxu1 %v5545_v26  ;;  %5384 = vmatpush3.bf16.msra.mxu0 %v5545_v26 }
 0x323   :  { %2096 = vrot.lane.b32.xlu1 %v5298_v61, %s5643_s1  ;;  %2094 = vrot.lane.b32.xlu0 %v6717_v11, %s5643_s1  ;;  %v5294_v11 = vpack.c.bf16 %v2376_v23, %v2376_v23 }
 0x327   :  { %2579 = vrot.lane.b32.xlu1 %v6723_v60, %s5643_s1  ;;  %2577 = vrot.lane.b32.xlu0 %v6725_v37, %s5643_s1 }
 0x32b   :  { %2225 = vrot.lane.b32.xlu1 %v6725_v37, %s5644_s26  ;;  %2223 = vrot.lane.b32.xlu0 %v6701_v18, %s5644_s26  ;;  %v2382_v18 = vld [vmem:[#allocation4 + $0x72] sm:$0xff]  ;;  %v2511_v37 = vld [vmem:[#allocation4 + $0x80] sm:$0xff] }
 0x32c   :  { %v5300_v45 = vpack.c.bf16 %v2382_v18, %v2382_v18 }
 0x32f   :  { %2707 = vrot.lane.b32.xlu1 %v6727_v25, %s5644_s26  ;;  %2705 = vrot.lane.b32.xlu0 %v6735_v27, %s5644_s26 }
 0x333   :  { %2440 = vrot.lane.b32.xlu0 %v5294_v11, %s5642_s22  ;;  %1959 = vrot.lane.b32.xlu1 %v6737_v54, %s5642_s22 }
 0x337   :  { %2569 = vrot.lane.b32.xlu0 %v6744_v8, %s5643_s1  ;;  %2442 = vrot.lane.b32.xlu1 %v6762_v35, %s5642_s22 }
 0x33b   :  { %1969 = vrot.lane.b32.xlu0 %v6735_v27, %s5642_s22  ;;  %2088 = vrot.lane.b32.xlu1 %v5294_v11, %s5643_s1  ;;  %v5316_v27 = vpack.c.bf16 %v2511_v37, %v2511_v37 }
 0x33f   :  { %2215 = vrot.lane.b32.xlu0 %v6746_v47, %s5644_s26  ;;  %2571 = vrot.lane.b32.xlu1 %v6709_v22, %s5643_s1  ;;  %v6956_v22 = vld [vmem:[%s7952_s2 + $0x88] sm:$0xff]  }
 0x340   :  { %5465 = vmatprep.subr.bf16.mxu0 %v6956_v22 }
 0x343   :  { %2452 = vrot.lane.b32.xlu0 %v5300_v45, %s5642_s22  ;;  %1971 = vrot.lane.b32.xlu1 %v6727_v25, %s5642_s22 }
 0x347   :  { %2697 = vrot.lane.b32.xlu0 %v6699_v51, %s5644_s26  ;;  %2217 = vrot.lane.b32.xlu1 %v6744_v8, %s5644_s26  ;;  %v2384_v51 = vld [vmem:[#allocation4 + $0xb2] sm:$0xff] }
 0x348   :  { %v5302_v25 = vpack.c.bf16 %v2384_v51, %v2384_v51 }
 0x34b   :  { %2098 = vrot.lane.b32.xlu0 %v5299_v3, %s5643_s1  ;;  %2454 = vrot.lane.b32.xlu1 %v6754_v57, %s5642_s22 }
 0x34f   :  { %2581 = vrot.lane.b32.xlu0 %v5316_v27, %s5643_s1  ;;  %2699 = vrot.lane.b32.xlu1 %v6697_v13, %s5644_s26  ;;  %v6978_v13 = vpop.permute.xlu1 %2583 }
 0x353   :  { %2227 = vrot.lane.b32.xlu0 %v6723_v60, %s5644_s26  ;;  %2100 = vrot.lane.b32.xlu1 %v5300_v45, %s5643_s1  ;;  %v6984_v60 = vpop.permute.xlu1 %2711 }
 0x357   :  { %2709 = vrot.lane.b32.xlu0 %v6756_v30, %s5644_s26  ;;  %2229 = vrot.lane.b32.xlu1 %v5316_v27, %s5644_s26  ;;  %v6994_v54 = vpop.permute.xlu1 %2599 }
 0x35b   :  { %2456 = vrot.lane.b32.xlu0 %v5302_v25, %s5642_s22  ;;  %1975 = vrot.lane.b32.xlu1 %v6764_v36, %s5642_s22 }
 0x35f   :  { %2585 = vrot.lane.b32.xlu0 %v6766_v31, %s5643_s1  ;;  %2458 = vrot.lane.b32.xlu1 %v6772_v41, %s5642_s22 }
 0x363   :  { %2231 = vrot.lane.b32.xlu0 %v6774_v42, %s5644_s26  ;;  %2104 = vrot.lane.b32.xlu1 %v5302_v25, %s5643_s1  ;;  %v5556_v25 = vld [vmem:[%s7952_s2 + $0x80] sm:$0xff]  }
 0x367   :  { %2713 = vrot.lane.b32.xlu0 %v6776_v7, %s5644_s26  ;;  %2587 = vrot.lane.b32.xlu1 %v6785_v56, %s5643_s1 }
 0x36b   :  { %1977 = vrot.lane.b32.xlu0 %v6776_v7, %s5642_s22  ;;  %2233 = vrot.lane.b32.xlu1 %v6766_v31, %s5644_s26 }
 0x36f   :  { %2460 = vrot.lane.b32.xlu0 %v6787_v59, %s5642_s22  ;;  %2715 = vrot.lane.b32.xlu1 %v6789_v62, %s5644_s26 }
 0x373   :  { %2106 = vrot.lane.b32.xlu0 %v6772_v41, %s5643_s1  ;;  %1979 = vrot.lane.b32.xlu1 %v6789_v62, %s5642_s22 }
 0x374   :  { %v1964_v8 = vpop.permute.xlu1 %1963 }
 0x375   :  { %v1962_v47 = vpop.permute.xlu0 %1961  ;;  %2009 = vst.msk [vmem:[#allocation5 + $0x24] sm:$0xf] %vm2005_vm2, %v1964_v8 }
 0x376   :  { %2008 = vst.msk [vmem:[#allocation5 + $0x18] sm:$0xf] %vm2005_vm2, %v1962_v47 }
 0x377   :  { %2589 = vrot.lane.b32.xlu0 %v6795_v46, %s5643_s1  ;;  %2462 = vrot.lane.b32.xlu1 %v6797_v4, %s5642_s22 }
 0x378   :  { %v2447_v57 = vpop.permute.xlu1 %2446 }
 0x379   :  { %v2445_v30 = vpop.permute.xlu0 %2444  ;;  %2491 = vst.msk [vmem:[#allocation5 + $0x28] sm:$0xf] %vm2005_vm2, %v2447_v57 }
 0x37a   :  { %2490 = vst.msk [vmem:[#allocation5 + $0x1c] sm:$0xf] %vm2005_vm2, %v2445_v30 }
 0x37b   :  { %2235 = vrot.lane.b32.xlu0 %v6785_v56, %s5644_s26  ;;  %2108 = vrot.lane.b32.xlu1 %v6787_v59, %s5643_s1 }
 0x37c   :  { %v2093_v35 = vpop.permute.xlu1 %2092 }
 0x37d   :  { %v2091_v36 = vpop.permute.xlu0 %2090  ;;  %2138 = vst.msk [vmem:[#allocation5 + $0x24] sm:$0xf] %vm2134_vm3, %v2093_v35 }
 0x37e   :  { %2137 = vst.msk [vmem:[#allocation5 + $0x18] sm:$0xf] %vm2134_vm3, %v2091_v36 }
 0x37f   :  { %2717 = vrot.lane.b32.xlu0 %v6799_v6, %s5644_s26  ;;  %2591 = vrot.lane.b32.xlu1 %v6813_v14, %s5643_s1 }
 0x380   :  { %v2576_v31 = vpop.permute.xlu1 %2575 }
 0x381   :  { %v2574_v41 = vpop.permute.xlu0 %2573  ;;  %2620 = vst.msk [vmem:[#allocation5 + $0x28] sm:$0xf] %vm2134_vm3, %v2576_v31 }
 0x382   :  { %2619 = vst.msk [vmem:[#allocation5 + $0x1c] sm:$0xf] %vm2134_vm3, %v2574_v41  ;;  %v5559_v41 = vld [vmem:[#allocation5 + $0x20] ss:$12 sps:$4 sm:$0xff]  }
 0x383   :  { %1981 = vrot.lane.b32.xlu0 %v6799_v6, %s5642_s22  ;;  %2237 = vrot.lane.b32.xlu1 %v6795_v46, %s5644_s26 }
 0x385   :  { %v2222_v42 = vpop.permute.xlu1 %2221  ;;  %v2220_v7 = vpop.permute.xlu0 %2219 }
 0x386   :  { %2267 = vst.msk [vmem:[#allocation5 + $0x24] sm:$0xf] %vm2263_vm4, %v2222_v42  ;;  %2266 = vst.msk [vmem:[#allocation5 + $0x18] sm:$0xf] %vm2263_vm4, %v2220_v7 }
 0x387   :  { %2464 = vrot.lane.b32.xlu0 %v6824_v20, %s5642_s22  ;;  %2719 = vrot.lane.b32.xlu1 %v6826_v21, %s5644_s26 }
 0x389   :  { %v2704_v56 = vpop.permute.xlu1 %2703  ;;  %v2702_v59 = vpop.permute.xlu0 %2701 }
 0x38a   :  { %2748 = vst.msk [vmem:[#allocation5 + $0x28] sm:$0xf] %vm2263_vm4, %v2704_v56  ;;  %2747 = vst.msk [vmem:[#allocation5 + $0x1c] sm:$0xf] %vm2263_vm4, %v2702_v59 }
 0x38b   :  { %2110 = vrot.lane.b32.xlu0 %v6797_v4, %s5643_s1  ;;  %1983 = vrot.lane.b32.xlu1 %v6826_v21, %s5642_s22 }
 0x38d   :  { %v1968_v62 = vpop.permute.xlu1 %1967  ;;  %v1966_v46 = vpop.permute.xlu0 %1965  ;;  %v5546_v38 = vld [vmem:[#allocation5 + $0x18] ss:$12 sps:$4 sm:$0xff]  }
 0x38e   :  { %2011 = vst.msk [vmem:[#allocation5 + $0x3c] sm:$0xf] %vm2005_vm2, %v1968_v62  ;;  %2010 = vst.msk [vmem:[#allocation5 + $0x30] sm:$0xf] %vm2005_vm2, %v1966_v46  ;;  %v5561_v62 = vld [vmem:[#allocation5 + $0x50] ss:$12 sps:$4 sm:$0xff]  }
 0x38f   :  { %2593 = vrot.lane.b32.xlu0 %v6843_v50, %s5643_s1  ;;  %2466 = vrot.lane.b32.xlu1 %v6845_v55, %s5642_s22  ;;  %v5562_v46 = vld [vmem:[#allocation5 + $0x68] ss:$12 sps:$4 sm:$0xff]  }
 0x391   :  { %v2451_v6 = vpop.permute.xlu1 %2450  ;;  %v2449_v32 = vpop.permute.xlu0 %2448  ;;  %v5548_v4 = vld [vmem:[#allocation5 + $0x1c] ss:$12 sps:$4 sm:$0xff]  }
 0x392   :  { %2493 = vst.msk [vmem:[#allocation5 + $0x40] sm:$0xf] %vm2005_vm2, %v2451_v6  ;;  %2492 = vst.msk [vmem:[#allocation5 + $0x34] sm:$0xf] %vm2005_vm2, %v2449_v32  ;;  %3217 = vmatprep.mubr.bf16.mxu1 %v5548_v4 }
 0x393   :  { %2239 = vrot.lane.b32.xlu0 %v6813_v14, %s5644_s26  ;;  %2112 = vrot.lane.b32.xlu1 %v6824_v20, %s5643_s1 }
 0x394   :  { %3218 = vmatmul.mubr.bf16.vlgmr.msra.gmra.mxu1 %v5546_v38 }
 0x395   :  { %v2097_v21 = vpop.permute.xlu1 %2096  ;;  %v2095_v40 = vpop.permute.xlu0 %2094 }
 0x396   :  { %2140 = vst.msk [vmem:[#allocation5 + $0x3c] sm:$0xf] %vm2134_vm3, %v2097_v21  ;;  %2139 = vst.msk [vmem:[#allocation5 + $0x30] sm:$0xf] %vm2134_vm3, %v2095_v40  ;;  %v5563_v21 = vld [vmem:[#allocation5 + $0x80] ss:$12 sps:$4 sm:$0xff]  }
 0x397   :  { %2721 = vrot.lane.b32.xlu0 %v6854_v29, %s5644_s26  ;;  %2595 = vrot.lane.b32.xlu1 %v6856_v28, %s5643_s1  ;;  %v5564_v40 = vld [vmem:[#allocation5 + $0x98] ss:$12 sps:$4 sm:$0xff]  }
 0x399   :  { %v2580_v43 = vpop.permute.xlu1 %2579  ;;  %v2578_v1 = vpop.permute.xlu0 %2577 }
 0x39a   :  { %2622 = vst.msk [vmem:[#allocation5 + $0x40] sm:$0xf] %vm2134_vm3, %v2580_v43  ;;  %2621 = vst.msk [vmem:[#allocation5 + $0x34] sm:$0xf] %vm2134_vm3, %v2578_v1 }
 0x39b   :  { %1985 = vrot.lane.b32.xlu0 %v6854_v29, %s5642_s22  ;;  %2241 = vrot.lane.b32.xlu1 %v6843_v50, %s5644_s26  ;;  %v2519_v29 = vld [vmem:[#allocation4 + $0x120] sm:$0xff] }
 0x39c   :  { %v5324_v9 = vpack.c.bf16 %v2519_v29, %v2519_v29 }
 0x39d   :  { %v2226_v14 = vpop.permute.xlu1 %2225  ;;  %v2224_v20 = vpop.permute.xlu0 %2223 }
 0x39e   :  { %2269 = vst.msk [vmem:[#allocation5 + $0x3c] sm:$0xf] %vm2263_vm4, %v2226_v14  ;;  %2268 = vst.msk [vmem:[#allocation5 + $0x30] sm:$0xf] %vm2263_vm4, %v2224_v20 }
 0x39f   :  { %2468 = vrot.lane.b32.xlu0 %v6861_v33, %s5642_s22  ;;  %2723 = vrot.lane.b32.xlu1 %v6863_v34, %s5644_s26 }
 0x3a1   :  { %v2708_v2 = vpop.permute.xlu1 %2707  ;;  %v2706_v5 = vpop.permute.xlu0 %2705 }
 0x3a2   :  { %2750 = vst.msk [vmem:[#allocation5 + $0x40] sm:$0xf] %vm2263_vm4, %v2708_v2  ;;  %2749 = vst.msk [vmem:[#allocation5 + $0x34] sm:$0xf] %vm2263_vm4, %v2706_v5 }
 0x3a3   :  { %2114 = vrot.lane.b32.xlu0 %v6845_v55, %s5643_s1  ;;  %1987 = vrot.lane.b32.xlu1 %v6863_v34, %s5642_s22 }
 0x3a5   :  { %v1960_v50 = vpop.permute.xlu1 %1959  ;;  %v2441_v0 = vpop.permute.xlu0 %2440 }
 0x3a6   :  { %2007 = vst.msk [vmem:[#allocation5 + $0xc] sm:$0xf] %vm2005_vm2, %v1960_v50  ;;  %2488 = vst.msk [vmem:[#allocation5 + $0x4] sm:$0xf] %vm2005_vm2, %v2441_v0  ;;  %v5567_v0 = vld [vmem:[#allocation5 + $0xb0] ss:$12 sps:$4 sm:$0xff]  }
 0x3a7   :  { %2597 = vrot.lane.b32.xlu0 %v5324_v9, %s5643_s1  ;;  %2470 = vrot.lane.b32.xlu1 %v6873_v44, %s5642_s22 }
 0x3a9   :  { %v2443_v10 = vpop.permute.xlu1 %2442  ;;  %v2570_v12 = vpop.permute.xlu0 %2569  ;;  %v2865_v15 = vld [vmem:[#allocation5 + $0x30] sm:$0xff]  ;;  %v2867_v17 = vld [vmem:[#allocation5 + $0x3c] sm:$0xff] }
 0x3aa   :  { %v5549_v55 = vld [vmem:[#allocation5 + $0x34] ss:$12 sps:$4 sm:$0xff]   ;;  %2489 = vst.msk [vmem:[#allocation5 + $0x10] sm:$0xf] %vm2005_vm2, %v2443_v10  ;;  %v5018_v34 = vcombine.low %v2865_v15, %v2867_v17 }
 0x3ab   :  { %2617 = vst.msk [vmem:[#allocation5 + $0x4] sm:$0xf] %vm2134_vm3, %v2570_v12  ;;  %2243 = vrot.lane.b32.xlu0 %v6856_v28, %s5644_s26  ;;  %2116 = vrot.lane.b32.xlu1 %v6861_v33, %s5643_s1 }
 0x3ac   :  { %3225 = vmatprep.mubr.bf16.mxu1 %v5549_v55 }
 0x3ad   :  { %v2089_v24 = vpop.permute.xlu1 %2088  ;;  %3226 = vmatmul.mubr.bf16.gmra.mxu1 %v5018_v34  ;;  %v1970_v44 = vpop.permute.xlu0 %1969 }
 0x3ae   :  { %2136 = vst.msk [vmem:[#allocation5 + $0xc] sm:$0xf] %vm2134_vm3, %v2089_v24 }
 0x3af   :  { %2012 = vst.msk [vmem:[#allocation5 + $0x48] sm:$0xf] %vm2005_vm2, %v1970_v44  ;;  %2725 = vrot.lane.b32.xlu0 %v6875_v53, %s5644_s26  ;;  %2245 = vrot.lane.b32.xlu1 %v5324_v9, %s5644_s26 }
 0x3b1   :  { %v2572_v49 = vpop.permute.xlu1 %2571  ;;  %v2216_v28 = vpop.permute.xlu0 %2215 }
 0x3b2   :  { %2618 = vst.msk [vmem:[#allocation5 + $0x10] sm:$0xf] %vm2134_vm3, %v2572_v49 }
 0x3b3   :  { %2264 = vst.msk [vmem:[#allocation5] sm:$0xf] %vm2263_vm4, %v2216_v28  ;;  %2727 = vrot.lane.b32.xlu1 %v5341_v39, %s5644_s26 }
 0x3b5   :  { %v1972_v33 = vpop.permute.xlu1 %1971  ;;  %v2453_v48 = vpop.permute.xlu0 %2452 }
 0x3b6   :  { %2013 = vst.msk [vmem:[#allocation5 + $0x54] sm:$0xf] %vm2005_vm2, %v1972_v33  ;;  %2494 = vst.msk [vmem:[#allocation5 + $0x4c] sm:$0xf] %vm2005_vm2, %v2453_v48 }
 0x3b9   :  { %v2218_v16 = vpop.permute.xlu1 %2217  ;;  %v2698_v26 = vpop.permute.xlu0 %2697 }
 0x3ba   :  { %2265 = vst.msk [vmem:[#allocation5 + $0xc] sm:$0xf] %vm2263_vm4, %v2218_v16  ;;  %2745 = vst.msk [vmem:[#allocation5 + $0x4] sm:$0xf] %vm2263_vm4, %v2698_v26 }
 0x3bd   :  { %v2455_v53 = vpop.permute.xlu1 %2454  ;;  %v2099_v3 = vpop.permute.xlu0 %2098 }
 0x3be   :  { %2495 = vst.msk [vmem:[#allocation5 + $0x58] sm:$0xf] %vm2005_vm2, %v2455_v53 }
 0x3bf   :  { %2141 = vst.msk [vmem:[#allocation5 + $0x48] sm:$0xf] %vm2134_vm3, %v2099_v3  ;;  %2624 = vst.msk [vmem:[#allocation5 + $0x58] sm:$0xf] %vm2134_vm3, %v6978_v13  ;;  %v5555_v13 = vld [vmem:[#allocation5 + $0x8] ss:$12 sps:$4 sm:$0xff]  }
 0x3c0   :  { %2752 = vst.msk [vmem:[#allocation5 + $0x58] sm:$0xf] %vm2263_vm4, %v6984_v60 }
 0x3c1   :  { %v2700_v61 = vpop.permute.xlu1 %2699  ;;  %v2582_v23 = vpop.permute.xlu0 %2581  ;;  %v5551_v27 = vld [vmem:[#allocation5] ss:$12 sps:$4 sm:$0xff]  }
 0x3c2   :  { %2746 = vst.msk [vmem:[#allocation5 + $0x10] sm:$0xf] %vm2263_vm4, %v2700_v61 }
 0x3c3   :  { %2623 = vst.msk [vmem:[#allocation5 + $0x4c] sm:$0xf] %vm2134_vm3, %v2582_v23 }
 0x3c5   :  { %v2101_v11 = vpop.permute.xlu1 %2100  ;;  %v2228_v18 = vpop.permute.xlu0 %2227 }
 0x3c6   :  { %2142 = vst.msk [vmem:[#allocation5 + $0x54] sm:$0xf] %vm2134_vm3, %v2101_v11 }
 0x3c7   :  { %2270 = vst.msk [vmem:[#allocation5 + $0x48] sm:$0xf] %vm2263_vm4, %v2228_v18 }
 0x3c9   :  { %v2230_v45 = vpop.permute.xlu1 %2229  ;;  %v2710_v37 = vpop.permute.xlu0 %2709  ;;  %v5553_v51 = vld [vmem:[#allocation5 + $0x4] ss:$12 sps:$4 sm:$0xff]  }
 0x3ca   :  { %2271 = vst.msk [vmem:[#allocation5 + $0x54] sm:$0xf] %vm2263_vm4, %v2230_v45  ;;  %2751 = vst.msk [vmem:[#allocation5 + $0x4c] sm:$0xf] %vm2263_vm4, %v2710_v37  ;;  %3209 = vmatprep.mubr.bf16.mxu0 %v5553_v51 }
 0x3cb   :  { %3210 = vmatmul.mubr.bf16.vlgmr.msra.gmra.mxu0 %v5551_v27 }
 0x3cc   :  { %5466 = vmatpush3.bf16.msra.mxu0 %v6956_v22  ;;  %5469 = vmatprep.mubr.msk.bf16.mxu0 %vm1566_vm14, %v5555_v13  ;;  %v5560_v22 = vld [vmem:[#allocation5 + $0x38] ss:$12 sps:$4 sm:$0xff]  }
 0x3cd   :  { %v1976_v60 = vpop.permute.xlu1 %1975  ;;  %v2457_v8 = vpop.permute.xlu0 %2456  ;;  %5467 = vmatprep.subr.bf16.mxu0 %v5556_v25 }
 0x3ce   :  { %2015 = vst.msk [vmem:[#allocation5 + $0x6c] sm:$0xf] %vm2005_vm2, %v1976_v60  ;;  %2496 = vst.msk [vmem:[#allocation5 + $0x64] sm:$0xf] %vm2005_vm2, %v2457_v8 }
 0x3d0   :  { %5468 = vmatpush3.bf16.msra.mxu0 %v5556_v25 }
 0x3d1   :  { %v2459_v47 = vpop.permute.xlu1 %2458  ;;  %v2586_v57 = vpop.permute.xlu0 %2585  ;;  %v2869_v30 = vld [vmem:[#allocation5 + $0x48] sm:$0xff]  ;;  %v2871_v35 = vld [vmem:[#allocation5 + $0x54] sm:$0xff] }
 0x3d2   :  { %v5557_v36 = vld [vmem:[#allocation5 + $0x4c] ss:$12 sps:$4 sm:$0xff]   ;;  %2497 = vst.msk [vmem:[#allocation5 + $0x70] sm:$0xf] %vm2005_vm2, %v2459_v47  ;;  %v5021_v31 = vcombine.low %v2869_v30, %v2871_v35 }
 0x3d3   :  { %2625 = vst.msk [vmem:[#allocation5 + $0x64] sm:$0xf] %vm2134_vm3, %v2586_v57  ;;  %3233 = vmatprep.mubr.bf16.mxu1 %v5557_v36  ;;  %5470 = vmatmul.mubr.msk.bf16.vlgmr.msra.gmra.mxu0 %vm1566_vm14, %v5559_v41 }
 0x3d4   :  { %3234 = vmatmul.mubr.bf16.gmra.mxu1 %v5021_v31  ;;  %5473 = vmatprep.mubr.msk.bf16.mxu0 %vm1566_vm14, %v5560_v22 }
 0x3d5   :  { %v2105_v42 = vpop.permute.xlu1 %2104  ;;  %v2232_v7 = vpop.permute.xlu0 %2231 }
 0x3d6   :  { %2144 = vst.msk [vmem:[#allocation5 + $0x6c] sm:$0xf] %vm2134_vm3, %v2105_v42  ;;  %v7170_v42 = vsub.s32 1, %v6627_v58 }
 0x3d7   :  { %2272 = vst.msk [vmem:[#allocation5 + $0x60] sm:$0xf] %vm2263_vm4, %v2232_v7 }
 0x3d9   :  { %v2588_v56 = vpop.permute.xlu1 %2587  ;;  %v2714_v59 = vpop.permute.xlu0 %2713 }
 0x3da   :  { %2626 = vst.msk [vmem:[#allocation5 + $0x70] sm:$0xf] %vm2134_vm3, %v2588_v56  ;;  %v7174_v56 = vsub.s32 3, %v6627_v58 }
 0x3db   :  { %2753 = vst.msk [vmem:[#allocation5 + $0x64] sm:$0xf] %vm2263_vm4, %v2714_v59  ;;  %5474 = vmatmul.mubr.msk.bf16.gmra.mxu0 %vm1566_vm14, %v5561_v62 }
 0x3dc   :  { %5477 = vmatprep.mubr.msk.bf16.mxu0 %vm1566_vm14, %v5562_v46  ;;  %v7179_v46 = vsub.s32 5, %v6627_v58 }
 0x3dd   :  { %v2234_v6 = vpop.permute.xlu1 %2233  ;;  %v1978_v32 = vpop.permute.xlu0 %1977 }
 0x3de   :  { %2273 = vst.msk [vmem:[#allocation5 + $0x6c] sm:$0xf] %vm2263_vm4, %v2234_v6 }
 0x3df   :  { %2016 = vst.msk [vmem:[#allocation5 + $0x78] sm:$0xf] %vm2005_vm2, %v1978_v32  ;;  %v7183_v32 = vsub.s32 2, %v6627_v58 }
 0x3e1   :  { %v2716_v38 = vpop.permute.xlu1 %2715  ;;  %v2461_v4 = vpop.permute.xlu0 %2460 }
 0x3e2   :  { %2754 = vst.msk [vmem:[#allocation5 + $0x70] sm:$0xf] %vm2263_vm4, %v2716_v38  ;;  %v2873_v2 = vld [vmem:[#allocation5 + $0x60] sm:$0xff] }
 0x3e3   :  { %2498 = vst.msk [vmem:[#allocation5 + $0x7c] sm:$0xf] %vm2005_vm2, %v2461_v4  ;;  %5478 = vmatmul.mubr.msk.bf16.gmra.mxu0 %vm1566_vm14, %v5563_v21  ;;  %v7187_v4 = vsub.s32 7, %v6627_v58  ;;  %v7190_v21 = vsub.s32 4, %v6627_v58 }
 0x3e4   :  { %5481 = vmatprep.mubr.msk.bf16.mxu0 %vm1566_vm14, %v5564_v40 }
 0x3e5   :  { %v1980_v43 = vpop.permute.xlu1 %1979  ;;  %v2107_v1 = vpop.permute.xlu0 %2106 }
 0x3e6   :  { %2017 = vst.msk [vmem:[#allocation5 + $0x84] sm:$0xf] %vm2005_vm2, %v1980_v43 }
 0x3e7   :  { %2145 = vst.msk [vmem:[#allocation5 + $0x78] sm:$0xf] %vm2134_vm3, %v2107_v1  ;;  %v3590_v1 = vld [vmem:[%s7958_s8 + $0x8] sm:$0xff] }
 0x3e9   :  { %v2463_v14 = vpop.permute.xlu1 %2462  ;;  %v2590_v20 = vpop.permute.xlu0 %2589  ;;  %v2875_v5 = vld [vmem:[#allocation5 + $0x6c] sm:$0xff] }
 0x3ea   :  { %v5565_v29 = vld [vmem:[#allocation5 + $0x64] ss:$12 sps:$4 sm:$0xff]   ;;  %2499 = vst.msk [vmem:[#allocation5 + $0x88] sm:$0xf] %vm2005_vm2, %v2463_v14  ;;  %v5024_v50 = vcombine.low %v2873_v2, %v2875_v5  ;;  %v7198_v14 = vsub.s32 6, %v6627_v58  ;;  %v3677_v5 = vrot.slane %v3590_v1, %v7174_v56 }
 0x3eb   :  { %2627 = vst.msk [vmem:[#allocation5 + $0x7c] sm:$0xf] %vm2134_vm3, %v2590_v20  ;;  %3241 = vmatprep.mubr.bf16.mxu1 %v5565_v29  ;;  %5482 = vmatmul.mubr.msk.bf16.gmra.mxu0 %vm1566_vm14, %v5567_v0  ;;  %v3663_v20 = vrot.slane %v3590_v1, %v7170_v42 }
 0x3ec   :  { %3242 = vmatmul.mubr.bf16.gmra.mxu1 %v5024_v50  ;;  %v3656_v50 = vrot.slane %v3590_v1, %v6634_v63 }
 0x3ed   :  { %v2109_v9 = vpop.permute.xlu1 %2108  ;;  %v2236_v10 = vpop.permute.xlu0 %2235 }
 0x3ee   :  { %2146 = vst.msk [vmem:[#allocation5 + $0x84] sm:$0xf] %vm2134_vm3, %v2109_v9  ;;  %v3691_v9 = vrot.slane %v3590_v1, %v7179_v46 }
 0x3ef   :  { %2274 = vst.msk [vmem:[#allocation5 + $0x78] sm:$0xf] %vm2263_vm4, %v2236_v10  ;;  %v3670_v10 = vrot.slane %v3590_v1, %v7183_v32 }
 0x3f1   :  { %v2592_v12 = vpop.permute.xlu1 %2591  ;;  %v2718_v15 = vpop.permute.xlu0 %2717 }
 0x3f2   :  { %2628 = vst.msk [vmem:[#allocation5 + $0x88] sm:$0xf] %vm2134_vm3, %v2592_v12  ;;  %v3705_v12 = vrot.slane %v3590_v1, %v7187_v4 }
 0x3f3   :  { %2755 = vst.msk [vmem:[#allocation5 + $0x7c] sm:$0xf] %vm2263_vm4, %v2718_v15 }
 0x3f5   :  { %v2238_v17 = vpop.permute.xlu1 %2237  ;;  %v1982_v55 = vpop.permute.xlu0 %1981 }
 0x3f6   :  { %2275 = vst.msk [vmem:[#allocation5 + $0x84] sm:$0xf] %vm2263_vm4, %v2238_v17  ;;  %v3684_v17 = vrot.slane %v3590_v1, %v7190_v21 }
 0x3f7   :  { %2018 = vst.msk [vmem:[#allocation5 + $0x90] sm:$0xf] %vm2005_vm2, %v1982_v55  ;;  %v3591_v55 = vld [vmem:[%s7958_s8 + $0x10] sm:$0xff] }
 0x3f9   :  { %v2720_v34 = vpop.permute.xlu1 %2719  ;;  %v2465_v19 = vpop.permute.xlu0 %2464 }
 0x3fa   :  { %2756 = vst.msk [vmem:[#allocation5 + $0x88] sm:$0xf] %vm2263_vm4, %v2720_v34  ;;  %v2877_v28 = vld [vmem:[#allocation5 + $0x78] sm:$0xff] }
 0x3fb   :  { %2500 = vst.msk [vmem:[#allocation5 + $0x94] sm:$0xf] %vm2005_vm2, %v2465_v19 }
 0x3fd   :  { %v1984_v24 = vpop.permute.xlu1 %1983  ;;  %v2111_v44 = vpop.permute.xlu0 %2110 }
 0x3fe   :  { %2019 = vst.msk [vmem:[#allocation5 + $0x9c] sm:$0xf] %vm2005_vm2, %v1984_v24  ;;  %v3719_v24 = vrot.slane %v3591_v55, %v7170_v42 }
 0x3ff   :  { %2147 = vst.msk [vmem:[#allocation5 + $0x90] sm:$0xf] %vm2134_vm3, %v2111_v44  ;;  %v3698_v44 = vrot.slane %v3590_v1, %v7198_v14 }
 0x401   :  { %v2467_v39 = vpop.permute.xlu1 %2466  ;;  %v2594_v49 = vpop.permute.xlu0 %2593  ;;  %v2879_v33 = vld [vmem:[#allocation5 + $0x84] sm:$0xff] }
 0x402   :  { %v5568_v48 = vld [vmem:[#allocation5 + $0x7c] ss:$12 sps:$4 sm:$0xff]   ;;  %2501 = vst.msk [vmem:[#allocation5 + $0xa0] sm:$0xf] %vm2005_vm2, %v2467_v39  ;;  %v5027_v16 = vcombine.low %v2877_v28, %v2879_v33  ;;  %v3733_v28 = vrot.slane %v3591_v55, %v7174_v56  ;;  %v3712_v33 = vrot.slane %v3591_v55, %v6634_v63 }
 0x403   :  { %2629 = vst.msk [vmem:[#allocation5 + $0x94] sm:$0xf] %vm2134_vm3, %v2594_v49  ;;  %3249 = vmatprep.mubr.bf16.mxu1 %v5568_v48 }
 0x404   :  { %3250 = vmatmul.mubr.bf16.gmra.mxu1 %v5027_v16  ;;  %v3747_v16 = vrot.slane %v3591_v55, %v7179_v46 }
 0x405   :  { %v2113_v26 = vpop.permute.xlu1 %2112  ;;  %v2240_v53 = vpop.permute.xlu0 %2239 }
 0x406   :  { %2148 = vst.msk [vmem:[#allocation5 + $0x9c] sm:$0xf] %vm2134_vm3, %v2113_v26 }
 0x407   :  { %2276 = vst.msk [vmem:[#allocation5 + $0x90] sm:$0xf] %vm2263_vm4, %v2240_v53  ;;  %v3726_v53 = vrot.slane %v3591_v55, %v7183_v32 }
 0x409   :  { %v2596_v3 = vpop.permute.xlu1 %2595  ;;  %v2722_v61 = vpop.permute.xlu0 %2721 }
 0x40a   :  { %2630 = vst.msk [vmem:[#allocation5 + $0xa0] sm:$0xf] %vm2134_vm3, %v2596_v3 }
 0x40b   :  { %2757 = vst.msk [vmem:[#allocation5 + $0x94] sm:$0xf] %vm2263_vm4, %v2722_v61  ;;  %v3761_v61 = vrot.slane %v3591_v55, %v7187_v4 }
 0x40d   :  { %v2242_v23 = vpop.permute.xlu1 %2241  ;;  %v1986_v11 = vpop.permute.xlu0 %1985 }
 0x40e   :  { %2277 = vst.msk [vmem:[#allocation5 + $0x9c] sm:$0xf] %vm2263_vm4, %v2242_v23 }
 0x40f   :  { %2020 = vst.msk [vmem:[#allocation5 + $0xa8] sm:$0xf] %vm2005_vm2, %v1986_v11  ;;  %v3740_v11 = vrot.slane %v3591_v55, %v7190_v21 }
 0x411   :  { %v2724_v18 = vpop.permute.xlu1 %2723  ;;  %v2469_v45 = vpop.permute.xlu0 %2468 }
 0x412   :  { %2758 = vst.msk [vmem:[#allocation5 + $0xa0] sm:$0xf] %vm2263_vm4, %v2724_v18  ;;  %v2881_v13 = vld [vmem:[#allocation5 + $0x90] sm:$0xff]  ;;  %v3592_v18 = vld [vmem:[%s7958_s8 + $0x18] sm:$0xff] }
 0x413   :  { %2502 = vst.msk [vmem:[#allocation5 + $0xac] sm:$0xf] %vm2005_vm2, %v2469_v45 }
 0x415   :  { %v1988_v37 = vpop.permute.xlu1 %1987  ;;  %v2115_v27 = vpop.permute.xlu0 %2114 }
 0x416   :  { %2021 = vst.msk [vmem:[#allocation5 + $0xb4] sm:$0xf] %vm2005_vm2, %v1988_v37  ;;  %v3775_v37 = vrot.slane %v3592_v18, %v7170_v42 }
 0x417   :  { %2149 = vst.msk [vmem:[#allocation5 + $0xa8] sm:$0xf] %vm2134_vm3, %v2115_v27  ;;  %v3754_v27 = vrot.slane %v3591_v55, %v7198_v14 }
 0x419   :  { %v2471_v51 = vpop.permute.xlu1 %2470  ;;  %v2598_v25 = vpop.permute.xlu0 %2597  ;;  %v2883_v60 = vld [vmem:[#allocation5 + $0x9c] sm:$0xff] }
 0x41a   :  { %v5570_v8 = vld [vmem:[#allocation5 + $0x94] ss:$12 sps:$4 sm:$0xff]   ;;  %2503 = vst.msk [vmem:[#allocation5 + $0xb8] sm:$0xf] %vm2005_vm2, %v2471_v51  ;;  %v5030_v47 = vcombine.low %v2881_v13, %v2883_v60  ;;  %v3789_v13 = vrot.slane %v3592_v18, %v7174_v56  ;;  %v3768_v60 = vrot.slane %v3592_v18, %v6634_v63 }
 0x41b   :  { %2631 = vst.msk [vmem:[#allocation5 + $0xac] sm:$0xf] %vm2134_vm3, %v2598_v25  ;;  %2632 = vst.msk [vmem:[#allocation5 + $0xb8] sm:$0xf] %vm2134_vm3, %v6994_v54  ;;  %3257 = vmatprep.mubr.bf16.mxu1 %v5570_v8  ;;  %v3589_v54 = vld [vmem:[%s7958_s8] sm:$0xff] }
 0x41c   :  { %3258 = vmatmul.mubr.bf16.gmra.mxu1 %v5030_v47  ;;  %v3607_v7 = vrot.slane %v3589_v54, %v7170_v42  ;;  %v3621_v59 = vrot.slane %v3589_v54, %v7174_v56  ;;  %v3600_v62 = vrot.slane %v3589_v54, %v6634_v63  ;;  %v3635_v6 = vrot.slane %v3589_v54, %v7179_v46 }
 0x41d   :  { %v2117_v57 = vpop.permute.xlu1 %2116  ;;  %v2244_v30 = vpop.permute.xlu0 %2243  ;;  %v3614_v38 = vrot.slane %v3589_v54, %v7183_v32  ;;  %v3649_v40 = vrot.slane %v3589_v54, %v7187_v4  ;;  %v3628_v43 = vrot.slane %v3589_v54, %v7190_v21  ;;  %v3642_v2 = vrot.slane %v3589_v54, %v7198_v14 }
 0x41e   :  { %2150 = vst.msk [vmem:[#allocation5 + $0xb4] sm:$0xf] %vm2134_vm3, %v2117_v57  ;;  %3609 = vbcast.lane.b32.xlu1 %v3607_v7, 256  ;;  %3602 = vbcast.lane.b32.xlu0 %v3600_v62, 256  ;;  %v3803_v57 = vrot.slane %v3592_v18, %v7179_v46  ;;  %v3810_v7 = vrot.slane %v3592_v18, %v7198_v14 }
 0x41f   :  { %2278 = vst.msk [vmem:[#allocation5 + $0xa8] sm:$0xf] %vm2263_vm4, %v2244_v30  ;;  %v3782_v30 = vrot.slane %v3592_v18, %v7183_v32 }
 0x421   :  { %v2246_v35 = vpop.permute.xlu1 %2245  ;;  %v2726_v36 = vpop.permute.xlu0 %2725 }
 0x422   :  { %2279 = vst.msk [vmem:[#allocation5 + $0xb4] sm:$0xf] %vm2263_vm4, %v2246_v35  ;;  %2759 = vst.msk [vmem:[#allocation5 + $0xac] sm:$0xf] %vm2263_vm4, %v2726_v36  ;;  %3623 = vbcast.lane.b32.xlu1 %v3621_v59, 256  ;;  %3616 = vbcast.lane.b32.xlu0 %v3614_v38, 256 }
 0x425   :  { %v2728_v31 = vpop.permute.xlu1 %2727 }
 0x426   :  { %2760 = vst.msk [vmem:[#allocation5 + $0xb8] sm:$0xf] %vm2263_vm4, %v2728_v31  ;;  %3637 = vbcast.lane.b32.xlu1 %v3635_v6, 256  ;;  %3630 = vbcast.lane.b32.xlu0 %v3628_v43, 256  ;;  %v3817_v31 = vrot.slane %v3592_v18, %v7187_v4 }
 0x429   :  { %v5574_v22 = vld [vmem:[#allocation5 + $0xa8] ss:$12 sps:$4 sm:$0xff]  }
 0x42a   :  { %3651 = vbcast.lane.b32.xlu1 %v3649_v40, 256  ;;  %3644 = vbcast.lane.b32.xlu0 %v3642_v2, 256 }
 0x42d   :  { %v5572_v41 = vld [vmem:[#allocation5 + $0xac] ss:$12 sps:$4 sm:$0xff]  }
 0x42e   :  { %3265 = vmatprep.mubr.bf16.mxu1 %v5572_v41  ;;  %3665 = vbcast.lane.b32.xlu1 %v3663_v20, 256  ;;  %v3796_v41 = vrot.slane %v3592_v18, %v7190_v21 }
 0x42f   :  { %3266 = vmatmul.mubr.bf16.gmra.mxu1 %v5574_v22  ;;  %3658 = vbcast.lane.b32.xlu0 %v3656_v50, 256 }
 0x432   :  { %3679 = vbcast.lane.b32.xlu1 %v3677_v5, 256 }
 0x433   :  { %3672 = vbcast.lane.b32.xlu0 %v3670_v10, 256 }
 0x436   :  { %3693 = vbcast.lane.b32.xlu1 %v3691_v9, 256 }
 0x437   :  { %3686 = vbcast.lane.b32.xlu0 %v3684_v17, 256 }
 0x43a   :  { %3707 = vbcast.lane.b32.xlu1 %v3705_v12, 256 }
 0x43b   :  { %3700 = vbcast.lane.b32.xlu0 %v3698_v44, 256 }
 0x43e   :  { %3721 = vbcast.lane.b32.xlu1 %v3719_v24, 256 }
 0x43f   :  { %3714 = vbcast.lane.b32.xlu0 %v3712_v33, 256 }
 0x442   :  { %3735 = vbcast.lane.b32.xlu1 %v3733_v28, 256 }
 0x443   :  { %3728 = vbcast.lane.b32.xlu0 %v3726_v53, 256 }
 0x446   :  { %3749 = vbcast.lane.b32.xlu1 %v3747_v16, 256 }
 0x447   :  { %3742 = vbcast.lane.b32.xlu0 %v3740_v11, 256 }
 0x44a   :  { %3763 = vbcast.lane.b32.xlu1 %v3761_v61, 256 }
 0x44b   :  { %3756 = vbcast.lane.b32.xlu0 %v3754_v27, 256 }
 0x44e   :  { %3777 = vbcast.lane.b32.xlu1 %v3775_v37, 256 }
 0x44f   :  { %3770 = vbcast.lane.b32.xlu0 %v3768_v60, 256 }
 0x452   :  { %3791 = vbcast.lane.b32.xlu1 %v3789_v13, 256 }
 0x453   :  { %3784 = vbcast.lane.b32.xlu0 %v3782_v30, 256 }
 0x454   :  { %v7203_v29 = vpop.f32.mrf.mxu1 }
 0x456   :  { %v7206_v0 = vpop.f32.mrf.mxu1  ;;  %3805 = vbcast.lane.b32.xlu1 %v3803_v57, 256 }
 0x457   :  { %3798 = vbcast.lane.b32.xlu0 %v3796_v41, 256  ;;  %v5393_v20 = vadd.f32 %v7206_v0, %v7203_v29 }
 0x458   :  { %v7211_v15 = vpop.f32.mrf.mxu1 }
 0x45a   :  { %v7217_v34 = vpop.f32.mrf.mxu1  ;;  %3819 = vbcast.lane.b32.xlu1 %v3817_v31, 256 }
 0x45b   :  { %3812 = vbcast.lane.b32.xlu0 %v3810_v7, 256  ;;  %v5396_v12 = vadd.f32 %v7217_v34, %v7211_v15 }
 0x46d   :  { %v7221_v39 = vpop.f32.mrf.mxu1 }
 0x46f   :  { %v7225_v48 = vpop.f32.mrf.mxu1 }
 0x470   :  { %v5399_v33 = vadd.f32 %v7225_v48, %v7221_v39 }
 0x471   :  { %v7229_v3 = vpop.f32.mrf.mxu1 }
 0x473   :  { %v5401_v45 = vpop.f32.mrf.mxu1 }
 0x474   :  { %v5402_v16 = vadd.f32 %v5401_v45, %v7229_v3 }
 0x48b   :  { %v5385_v19 = vpop.f32.mrf.mxu0 }
 0x48d   :  { %v5386_v49 = vpop.f32.mrf.mxu0 }
 0x48e   :  { %v5387_v38 = vadd.f32 %v5386_v49, %v5385_v19 }
 0x48f   :  { %v5388_v26 = vpop.f32.mrf.mxu0 }
 0x491   :  { %v5389_v23 = vpop.f32.mrf.mxu0 }
 0x492   :  { %v5390_v6 = vadd.f32 %v5389_v23, %v5388_v26 }
 0x493   :  { %v5471_v25 = vpop.f32.mrf.mxu0 }
 0x494   :  { %v7238_v51 = vpop.f32.mrf.mxu1  ;;  %v7261_v2 = vadd.f32 %v5471_v25, %v5393_v20 }
 0x495   :  { %v3308_v47 = vpop.f32.mrf.mxu0 }
 0x496   :  { %v7242_v8 = vpop.f32.mrf.mxu1  ;;  %v7255_v21 = vadd.f32 %v5387_v38, %v3308_v47  ;;  %v3412_v55 = vmul.f32 %v7261_v2, %v7261_v2  ;;  %v3376_v15 = vsel %vm1566_vm14, %v7261_v2, 0.0 }
 0x497   :  { %v5472_v36 = vpop.f32.mrf.mxu0  ;;  %v5405_v60 = vadd.f32 %v7242_v8, %v7238_v51 }
 0x498   :  { %v7246_v35 = vpop.f32.mrf.mxu1  ;;  %v3410_v5 = vmul.f32 %v7255_v21, %v7255_v21  ;;  %v3373_v17 = vsel %vm1566_vm14, %v7255_v21, 0.0  ;;  %v7275_v24 = vadd.f32 %v5472_v36, %v5396_v12  ;;  %v3429_v26 = vsel %vm1566_vm14, %v3412_v55, 0.0 }
 0x499   :  { %v3311_v54 = vpop.f32.mrf.mxu0 }
 0x49a   :  { %v7250_v22 = vpop.f32.mrf.mxu1  ;;  %v7253_v40 = vadd.f32 %v5390_v6, %v3311_v54  ;;  %v3426_v19 = vsel %vm1566_vm14, %v3410_v5, 0.0  ;;  %v3413_v53 = vmul.f32 %v7275_v24, %v7275_v24  ;;  %v3378_v37 = vsel %vm1566_vm14, %v7275_v24, 0.0 }
 0x49b   :  { %v5475_v56 = vpop.f32.mrf.mxu0 }
 0x49c   :  { %v3411_v14 = vmul.f32 %v7253_v40, %v7253_v40  ;;  %v3374_v50 = vsel %vm1566_vm14, %v7253_v40, 0.0  ;;  %v3431_v25 = vsel %vm1566_vm14, %v3413_v53, 0.0  ;;  %v7300_v31 = vadd.f32 %v5475_v56, %v5405_v60 }
 0x49d   :  { %v3324_v62 = vpop.f32.mrf.mxu0  ;;  %v3375_v0 = vadd.f32 %v3374_v50, %v3373_v17 }
 0x49e   :  { %v3427_v29 = vsel %vm1566_vm14, %v3411_v14, 0.0  ;;  %v7285_v61 = vadd.f32 %v5399_v33, %v3324_v62  ;;  %v5408_v62 = vadd.f32 %v7250_v22, %v7246_v35  ;;  %v3416_v56 = vmul.f32 %v7300_v31, %v7300_v31 }
 0x49f   :  { %v5476_v32 = vpop.f32.mrf.mxu0  ;;  %v3428_v44 = vadd.f32 %v3427_v29, %v3426_v19  ;;  %v3377_v34 = vadd.f32 %v3376_v15, %v3375_v0  ;;  %v3384_v35 = vsel %vm1566_vm14, %v7300_v31, 0.0 }
 0x4a0   :  { %v3414_v3 = vmul.f32 %v7285_v61, %v7285_v61  ;;  %v3380_v47 = vsel %vm1566_vm14, %v7285_v61, 0.0  ;;  %v3437_v17 = vsel %vm1566_vm14, %v3416_v56, 0.0 }
 0x4a1   :  { %v3327_v43 = vpop.f32.mrf.mxu0  ;;  %v3430_v23 = vadd.f32 %v3429_v26, %v3428_v44  ;;  %v3379_v48 = vadd.f32 %v3378_v37, %v3377_v34 }
 0x4a2   :  { %v7289_v39 = vadd.f32 %v5402_v16, %v3327_v43  ;;  %v3433_v41 = vsel %vm1566_vm14, %v3414_v3, 0.0  ;;  %v7308_v43 = vadd.f32 %v5476_v32, %v5408_v62 }
 0x4a3   :  { %v5479_v9 = vpop.f32.mrf.mxu0  ;;  %v3432_v45 = vadd.f32 %v3431_v25, %v3430_v23  ;;  %v3381_v30 = vadd.f32 %v3380_v47, %v3379_v48 }
 0x4a4   :  { %v3415_v57 = vmul.f32 %v7289_v39, %v7289_v39  ;;  %v3382_v54 = vsel %vm1566_vm14, %v7289_v39, 0.0 }
 0x4a5   :  { %v3340_v49 = vpop.f32.mrf.mxu0  ;;  %v3434_v51 = vadd.f32 %v3433_v41, %v3432_v45  ;;  %v3383_v20 = vadd.f32 %v3382_v54, %v3381_v30 }
 0x4a6   :  { %v3435_v6 = vsel %vm1566_vm14, %v3415_v57, 0.0 }
 0x4a7   :  { %v5480_v11 = vpop.f32.mrf.mxu0  ;;  %v3436_v12 = vadd.f32 %v3435_v6, %v3434_v51  ;;  %v3385_v32 = vadd.f32 %v3384_v35, %v3383_v20 }
 0x4a9   :  { %v3343_v13 = vpop.f32.mrf.mxu0  ;;  %v3438_v55 = vadd.f32 %v3437_v17, %v3436_v12 }
 0x4ab   :  { %v5483_v8 = vpop.f32.mrf.mxu0 }
 0x4ac   :  { %v5409_v42 = vpop.f32.mrf.mxu1 }
 0x4ae   :  { %v5410_v59 = vpop.f32.mrf.mxu1 }
 0x4af   :  { %v5411_v7 = vadd.f32 %v5410_v59, %v5409_v42  ;;  %v3356_v42 = vpop.f32.mrf.mxu0 }
 0x4b0   :  { %v5412_v46 = vpop.f32.mrf.mxu1 }
 0x4b1   :  { %v7312_v5 = vadd.f32 %v5411_v7, %v3340_v49  ;;  %v5484_v19 = vpop.f32.mrf.mxu0 }
 0x4b2   :  { %v5413_v4 = vpop.f32.mrf.mxu1 }
 0x4b3   :  { %v5414_v38 = vadd.f32 %v5413_v4, %v5412_v46  ;;  %v3417_v46 = vmul.f32 %v7308_v43, %v7308_v43  ;;  %v3418_v29 = vmul.f32 %v7312_v5, %v7312_v5  ;;  %v3388_v44 = vsel %vm1566_vm14, %v7312_v5, 0.0  ;;  %v3359_v37 = vpop.f32.mrf.mxu0 }
 0x4b5   :  { %v7316_v22 = vadd.f32 %v5414_v38, %v3343_v13  ;;  %v3439_v15 = vsel %vm1566_vm14, %v3417_v46, 0.0 }
 0x4b7   :  { %v3419_v49 = vmul.f32 %v7316_v22, %v7316_v22  ;;  %v3390_v16 = vsel %vm1566_vm14, %v7316_v22, 0.0 }
 0x4c4   :  { %v5415_v1 = vpop.f32.mrf.mxu1 }
 0x4c6   :  { %v5416_v10 = vpop.f32.mrf.mxu1 }
 0x4c7   :  { %v5417_v50 = vadd.f32 %v5416_v10, %v5415_v1  ;;  %v3386_v10 = vsel %vm1566_vm14, %v7308_v43, 0.0 }
 0x4c8   :  { %v5418_v28 = vpop.f32.mrf.mxu1  ;;  %v3387_v34 = vadd.f32 %v3386_v10, %v3385_v32 }
 0x4c9   :  { %v7323_v0 = vadd.f32 %v5479_v9, %v5417_v50  ;;  %v3441_v9 = vsel %vm1566_vm14, %v3418_v29, 0.0 }
 0x4ca   :  { %v5419_v18 = vpop.f32.mrf.mxu1  ;;  %v3389_v23 = vadd.f32 %v3388_v44, %v3387_v34 }
 0x4cb   :  { %v5420_v59 = vadd.f32 %v5419_v18, %v5418_v28  ;;  %v3420_v26 = vmul.f32 %v7323_v0, %v7323_v0  ;;  %v3440_v18 = vadd.f32 %v3439_v15, %v3438_v55  ;;  %v3392_v48 = vsel %vm1566_vm14, %v7323_v0, 0.0 }
 0x4cc   :  { %v3391_v45 = vadd.f32 %v3390_v16, %v3389_v23 }
 0x4cd   :  { %v7331_v28 = vadd.f32 %v5480_v11, %v5420_v59  ;;  %v3443_v11 = vsel %vm1566_vm14, %v3419_v49, 0.0  ;;  %v3442_v3 = vadd.f32 %v3441_v9, %v3440_v18  ;;  %v3445_v60 = vsel %vm1566_vm14, %v3420_v26, 0.0 }
 0x4cf   :  { %v3394_v47 = vsel %vm1566_vm14, %v7331_v28, 0.0  ;;  %v3444_v30 = vadd.f32 %v3443_v11, %v3442_v3 }
 0x4d1   :  { %v3446_v6 = vadd.f32 %v3445_v60, %v3444_v30 }
 0x4dc   :  { %v5421_v27 = vpop.f32.mrf.mxu1 }
 0x4de   :  { %v5422_v36 = vpop.f32.mrf.mxu1 }
 0x4df   :  { %v5423_v1 = vadd.f32 %v5422_v36, %v5421_v27  ;;  %v3421_v27 = vmul.f32 %v7331_v28, %v7331_v28  ;;  %v3393_v36 = vadd.f32 %v3392_v48, %v3391_v45 }
 0x4e0   :  { %v5424_v14 = vpop.f32.mrf.mxu1 }
 0x4e1   :  { %v7339_v53 = vadd.f32 %v5423_v1, %v3356_v42  ;;  %v3447_v54 = vsel %vm1566_vm14, %v3421_v27, 0.0  ;;  %v3395_v38 = vadd.f32 %v3394_v47, %v3393_v36 }
 0x4e2   :  { %v5425_v4 = vpop.f32.mrf.mxu1  ;;  %v3448_v12 = vadd.f32 %v3447_v54, %v3446_v6  ;;  %v3371_v54 = vld [vmem:[%s7955_s5] sm:$0x1] }
 0x4e3   :  { %v5426_v33 = vadd.f32 %v5425_v4, %v5424_v14  ;;  %v3422_v57 = vmul.f32 %v7339_v53, %v7339_v53  ;;  %v3396_v7 = vsel %vm1566_vm14, %v7339_v53, 0.0 }
 0x4e4   :  { %v3397_v42 = vadd.f32 %v3396_v7, %v3395_v38 }
 0x4e5   :  { %v7346_v25 = vadd.f32 %v5426_v33, %v3359_v37  ;;  %v3449_v14 = vsel %vm1566_vm14, %v3422_v57, 0.0 }
 0x4e6   :  { %v3450_v17 = vadd.f32 %v3449_v14, %v3448_v12 }
 0x4e7   :  { %v3423_v62 = vmul.f32 %v7346_v25, %v7346_v25  ;;  %v3398_v56 = vsel %vm1566_vm14, %v7346_v25, 0.0 }
 0x4e8   :  { %v3399_v29 = vadd.f32 %v3398_v56, %v3397_v42 }
 0x4e9   :  { %v3451_v59 = vsel %vm1566_vm14, %v3423_v62, 0.0 }
 0x4ea   :  { %v3452_v55 = vadd.f32 %v3451_v59, %v3450_v17 }
 0x4ef   :  { %v5427_v13 = vpop.f32.mrf.mxu1 }
 0x4f1   :  { %v5428_v41 = vpop.f32.mrf.mxu1 }
 0x4f2   :  { %v5429_v51 = vadd.f32 %v5428_v41, %v5427_v13 }
 0x4f3   :  { %v5430_v20 = vpop.f32.mrf.mxu1 }
 0x4f4   :  { %v3365_v50 = vadd.f32 %v5483_v8, %v5429_v51  ;;  %v3372_v51 = vld [vmem:[%s7956_s6] sm:$0x1] }
 0x4f5   :  { %v5431_v35 = vpop.f32.mrf.mxu1 }
 0x4f6   :  { %v3400_v46 = vsel %vm1566_vm14, %v3365_v50, 0.0  ;;  %v3424_v32 = vmul.f32 %v3365_v50, %v3365_v50  ;;  %v5432_v4 = vadd.f32 %v5431_v35, %v5430_v20 }
 0x4f7   :  { %v3401_v44 = vadd.f32 %v3400_v46, %v3399_v29 }
 0x4f8   :  { %v3453_v1 = vsel %vm1566_vm14, %v3424_v32, 0.0  ;;  %v3368_v10 = vadd.f32 %v5484_v19, %v5432_v4 }
 0x4f9   :  { %v3454_v8 = vadd.f32 %v3453_v1, %v3452_v55 }
 0x4fa   :  { %v3402_v49 = vsel %vm1566_vm14, %v3368_v10, 0.0  ;;  %v3425_v33 = vmul.f32 %v3368_v10, %v3368_v10 }
 0x4fb   :  { %v3403_v15 = vadd.f32 %v3402_v49, %v3401_v44 }
 0x4fc   :  { %v3455_v34 = vsel %vm1566_vm14, %v3425_v33, 0.0 }
 0x4fd   :  { %v3404_v9 = vrot.slane %v3403_v15, 4  ;;  %v3456_v16 = vadd.f32 %v3455_v34, %v3454_v8 }
 0x4ff   :  { %v3405_v26 = vadd.f32 %v3404_v9, %v3403_v15  ;;  %v3457_v23 = vrot.slane %v3456_v16, 4 }
 0x501   :  { %v3406_v18 = vrot.slane %v3405_v26, 2  ;;  %v3458_v37 = vadd.f32 %v3457_v23, %v3456_v16 }
 0x503   :  { %v3407_v11 = vadd.f32 %v3406_v18, %v3405_v26  ;;  %v3459_v48 = vrot.slane %v3458_v37, 2 }
 0x505   :  { %v3408_v27 = vrot.slane %v3407_v11, 1  ;;  %v3460_v3 = vadd.f32 %v3459_v48, %v3458_v37 }
 0x507   :  { %v3409_v19 = vadd.f32 %v3408_v27, %v3407_v11  ;;  %v3461_v45 = vrot.slane %v3460_v3, 1 }
 0x509   :  { %v3462_v13 = vadd.f32 %v3461_v45, %v3460_v3  ;;  %v3463_v60 = vmul.f32 0.0078125, %v3409_v19 }
 0x50b   :  { %v3464_v47 = vmul.f32 0.0078125, %v3462_v13  ;;  %v3465_v57 = vmul.f32 %v3463_v60, %v3463_v60 }
 0x50d   :  { %v3466_v30 = vsub.f32 %v3464_v47, %v3465_v57 }
 0x50f   :  { %v3467_v36 = vmax.f32 %v3466_v30, 0.0 }
 0x511   :  { %v3468_v41 = vadd.f32 1e-05, %v3467_v36 }
 0x513   :  { %5577 = vrsqrt.f32 %v3468_v41 }
 0x520   :  { %v5578_v7 = vpop.eup %5577 }
 0x521   :  { %v3470_v62 = vmul.f32 %v5578_v7, %v3371_v54 }
 0x523   :  { %v3471_v6 = vmul.f32 %v3470_v62, %v3463_v60  ;;  %v3477_v38 = vrot.slane %v3470_v62, %v6634_v63 }
 0x525   :  { %v3472_v20 = vsub.f32 %v3372_v51, %v3471_v6  ;;  %v3487_v56 = vmul.f32 %v3477_v38, %v7312_v5  ;;  %v3488_v12 = vmul.f32 %v3477_v38, %v7316_v22  ;;  %v3489_v42 = vmul.f32 %v3477_v38, %v7323_v0 }
 0x526   :  { %v3490_v35 = vmul.f32 %v3477_v38, %v7331_v28  ;;  %v3491_v59 = vmul.f32 %v3477_v38, %v7339_v53  ;;  %v3492_v5 = vmul.f32 %v3477_v38, %v7346_v25  ;;  %v3493_v29 = vmul.f32 %v3477_v38, %v3365_v50 }
 0x527   :  { %v7374_v14 = vrot.slane %v3472_v20, %v6634_v63  ;;  %v3494_v63 = vmul.f32 %v3477_v38, %v3368_v10  ;;  %v3479_v1 = vmul.f32 %v3477_v38, %v7255_v21  ;;  %v3480_v55 = vmul.f32 %v3477_v38, %v7253_v40 }
 0x528   :  { %v3481_v10 = vmul.f32 %v3477_v38, %v7261_v2  ;;  %v3482_v21 = vmul.f32 %v3477_v38, %v7275_v24  ;;  %v3483_v40 = vmul.f32 %v3477_v38, %v7285_v61  ;;  %v3484_v2 = vmul.f32 %v3477_v38, %v7289_v39 }
 0x529   :  { %v7382_v46 = vadd.f32 %v7374_v14, %v3487_v56  ;;  %v7385_v32 = vadd.f32 %v7374_v14, %v3488_v12  ;;  %v7388_v4 = vadd.f32 %v7374_v14, %v3489_v42  ;;  %v7392_v22 = vadd.f32 %v7374_v14, %v3490_v35 }
 0x52a   :  { %v7395_v0 = vadd.f32 %v7374_v14, %v3491_v59  ;;  %v7404_v25 = vadd.f32 %v7374_v14, %v3492_v5  ;;  %v7417_v8 = vadd.f32 %v7374_v14, %v3493_v29  ;;  %v7424_v9 = vadd.f32 %v7374_v14, %v3479_v1 }
 0x52b   :  { %v7968_v28 = vmax.f32 %v7382_v46, 0.0  ;;  %v7967_v53 = vmax.f32 %v7385_v32, 0.0  ;;  %v7966_v17 = vmax.f32 %v7388_v4, 0.0  ;;  %v7965_v44 = vmax.f32 %v7392_v22, 0.0 }
 0x52c   :  { %v7964_v15 = vmax.f32 %v7395_v0, 0.0  ;;  %v7427_v26 = vadd.f32 %v7374_v14, %v3480_v55  ;;  %v7430_v24 = vadd.f32 %v7374_v14, %v3481_v10  ;;  %v7433_v61 = vadd.f32 %v7374_v14, %v3482_v21 }
 0x52d   :  { %v3554_v49 = vsel %vm1566_vm14, %v7968_v28, 0.0  ;;  %v3555_v33 = vsel %vm1566_vm14, %v7967_v53, 0.0  ;;  %v3557_v34 = vsel %vm1566_vm14, %v7966_v17, 0.0  ;;  %v7436_v39 = vadd.f32 %v7374_v14, %v3494_v63 }
 0x52e   :  { %v3556_v50 = vadd.f32 %v3555_v33, %v3554_v49  ;;  %v7963_v23 = vmax.f32 %v7404_v25, 0.0  ;;  %v3559_v18 = vsel %vm1566_vm14, %v7965_v44, 0.0  ;;  %v7443_v37 = vadd.f32 %v7374_v14, %v3483_v40 }
 0x52f   :  { %v3517_v48 = vmax.f32 %v7424_v9, 0.0  ;;  %v3518_v27 = vmax.f32 %v7427_v26, 0.0  ;;  %v3519_v3 = vmax.f32 %v7430_v24, 0.0  ;;  %v7962_v19 = vmax.f32 %v7417_v8, 0.0 }
 0x530   :  { %v3558_v16 = vadd.f32 %v3557_v34, %v3556_v50  ;;  %v3561_v45 = vsel %vm1566_vm14, %v7964_v15, 0.0  ;;  %v3485_v13 = vmul.f32 %v3477_v38, %v7300_v31  ;;  %v7454_v60 = vadd.f32 %v7374_v14, %v3484_v2 }
 0x531   :  { %v7972_v57 = vmax.f32 %v7433_v61, 0.0  ;;  %v3533_v30 = vsel %vm1566_vm14, %v3517_v48, 0.0  ;;  %v3534_v36 = vsel %vm1566_vm14, %v3518_v27, 0.0  ;;  %v7961_v41 = vmax.f32 %v7436_v39, 0.0 }
 0x532   :  { %v3560_v11 = vadd.f32 %v3559_v18, %v3558_v16  ;;  %v3563_v31 = vsel %vm1566_vm14, %v7963_v23, 0.0  ;;  %v3486_v54 = vmul.f32 %v3477_v38, %v7308_v43  ;;  %v3535_v7 = vadd.f32 %v3534_v36, %v3533_v30  ;;  %v3578_v30 = vld [vmem:[%s7957_s7] sm:$0x3]  ;;  %s5646_s7 = smov [#allocation6]  }
 0x533   :  { %v7469_v51 = vadd.f32 %v7374_v14, %v3485_v13  ;;  %v7971_v6 = vmax.f32 %v7443_v37, 0.0  ;;  %v3536_v20 = vsel %vm1566_vm14, %v3519_v3, 0.0  ;;  %v3565_v56 = vsel %vm1566_vm14, %v7962_v19, 0.0  ;;  %s4678_s4 = sshll.u32 %s5646_s7, 4  ;;  %s4679_s4 = int_to_ptr.vmem [resolvable:$true] %s4678_s4 }
 0x534   :  { %v3562_v47 = vadd.f32 %v3561_v45, %v3560_v11  ;;  %v3537_v12 = vadd.f32 %v3536_v20, %v3535_v7  ;;  %v7479_v35 = vadd.f32 %v7374_v14, %v3486_v54  ;;  %v7970_v43 = vmax.f32 %v7454_v60, 0.0  ;;  %s5611_s10 = scalar_lea.vmem %s4679_s4, 2048  ;;  %p5616_p1 = scmp.lt.s32.totalorder %s4679_s4, %s4679_s4 }
 0x535   :  { %v3538_v38 = vsel %vm1566_vm14, %v7972_v57, 0.0  ;;  %v3567_v59 = vsel %vm1566_vm14, %v7961_v41, 0.0  ;;  %v7969_v29 = vmax.f32 %v7469_v51, 0.0  ;;  %v3540_v1 = vsel %vm1566_vm14, %v7971_v6, 0.0  ;;  %p5612_p0 = scmp.ne.s32.totalorder %s4679_s4, %s5611_s10  ;;  %p5617_p2 = scmp.lt.s32.totalorder %s5611_s10, %s5611_s10 }
 0x536   :  { %v3564_v62 = vadd.f32 %v3563_v31, %v3562_v47  ;;  %v3539_v63 = vadd.f32 %v3538_v38, %v3537_v12  ;;  %v7960_v10 = vmax.f32 %v7479_v35, 0.0  ;;  %v3542_v49 = vsel %vm1566_vm14, %v7970_v43, 0.0 }
 0x537   :  { %v3544_v21 = vsel %vm1566_vm14, %v7969_v29, 0.0  ;;  %v7977_v26 = vmax.f32 %v7382_v46, 0.0  ;;  %v7978_v24 = vmax.f32 %v7385_v32, 0.0  ;;  %v7981_v46 = vmax.f32 %v7395_v0, 0.0  ;;  %p5618_p3 = por %p5617_p2, %p5616_p1 }
 0x538   :  { %v3566_v42 = vadd.f32 %v3565_v56, %v3564_v62  ;;  %v3541_v14 = vadd.f32 %v3540_v1, %v3539_v63  ;;  %v3546_v34 = vsel %vm1566_vm14, %v7960_v10, 0.0  ;;  %v7507_v63 = vpop.permute.xlu1 %3609  ;;  %v7982_v32 = vmax.f32 %v7404_v25, 0.0 }
 0x539   :  { %v7985_v0 = vmax.f32 %v7479_v35, 0.0  ;;  %p5619_p4 = pnand %p5618_p3, %p5612_p0 }
 0x53a   :  { %v3568_v5 = vadd.f32 %v3567_v59, %v3566_v42  ;;  %v3543_v33 = vadd.f32 %v3542_v49, %v3541_v14  ;;  %v5645_v59 = vmov 0  }
 0x53b   :  { %5518 = vset.pattern.permute.xlu1 %v5645_v59  ;;  %5517 = vset.pattern.permute.xlu0 %v5645_v59 }
 0x53c   :  { %v3569_v55 = vrot.slane %v3568_v5, 4  ;;  %v3545_v40 = vadd.f32 %v3544_v21, %v3543_v33  ;;  %v7511_v1 = vpop.permute.xlu1 %3623 }
 0x53e   :  { %v3570_v50 = vadd.f32 %v3569_v55, %v3568_v5  ;;  %v3547_v16 = vadd.f32 %v3546_v34, %v3545_v40  ;;  %v7509_v5 = vpop.permute.xlu0 %3602 }
 0x540   :  { %v3571_v2 = vrot.slane %v3570_v50, 2  ;;  %v3548_v11 = vrot.slane %v3547_v16, 4  ;;  %v7515_v55 = vpop.permute.xlu1 %3637 }
 0x542   :  { %v3572_v18 = vadd.f32 %v3571_v2, %v3570_v50  ;;  %v3549_v13 = vadd.f32 %v3548_v11, %v3547_v16  ;;  %v7513_v14 = vpop.permute.xlu0 %3616 }
 0x544   :  { %v3573_v45 = vrot.slane %v3572_v18, 1  ;;  %v3550_v36 = vrot.slane %v3549_v13, 2  ;;  %v7519_v33 = vpop.permute.xlu1 %3651 }
 0x546   :  { %v3574_v47 = vadd.f32 %v3573_v45, %v3572_v18  ;;  %v3551_v54 = vadd.f32 %v3550_v36, %v3549_v13  ;;  %v7517_v49 = vpop.permute.xlu0 %3630 }
 0x548   :  { %v3577_v31 = vmul.f32 0.015625, %v3574_v47  ;;  %v3552_v62 = vrot.slane %v3551_v54, 1  ;;  %v7523_v21 = vpop.permute.xlu1 %3665 }
 0x54a   :  { %v3580_v7 = vmul.f32 %v3578_v30, %v3577_v31  ;;  %v3553_v56 = vadd.f32 %v3552_v62, %v3551_v54  ;;  %v7521_v50 = vpop.permute.xlu0 %3644 }
 0x54c   :  { %v3584_v20 = vsel %vm1729_vm15, %v3580_v7, 0.0  ;;  %v3576_v12 = vmul.f32 0.015625, %v3553_v56  ;;  %v7527_v2 = vpop.permute.xlu1 %3679 }
 0x54d   :  { %3585 = vadd.xlane.f32.xlu1 %v3584_v20 }
 0x54e   :  { %v3579_v42 = vmul.f32 %v3578_v30, %v3576_v12  ;;  %v7525_v40 = vpop.permute.xlu0 %3658 }
 0x550   :  { %v3581_v38 = vsel %vm1729_vm15, %v3579_v42, 0.0  ;;  %v7531_v16 = vpop.permute.xlu1 %3693  ;;  %vm4599_vm15 = vcmask 195712  }
 0x551   :  { %3582 = vadd.xlane.f32.xlu0 %v3581_v38 }
 0x552   :  { %v7529_v34 = vpop.permute.xlu0 %3672 }
 0x554   :  { %v7535_v11 = vpop.permute.xlu1 %3707 }
 0x556   :  { %v7533_v18 = vpop.permute.xlu0 %3686 }
 0x558   :  { %v7539_v13 = vpop.permute.xlu1 %3721 }
 0x55a   :  { %v7537_v45 = vpop.permute.xlu0 %3700 }
 0x55c   :  { %v7543_v30 = vpop.permute.xlu1 %3735 }
 0x55e   :  { %v7541_v47 = vpop.permute.xlu0 %3714 }
 0x560   :  { %v7547_v31 = vpop.permute.xlu1 %3749 }
 0x562   :  { %v7545_v36 = vpop.permute.xlu0 %3728 }
 0x564   :  { %v7551_v7 = vpop.permute.xlu1 %3763 }
 0x566   :  { %v7549_v54 = vpop.permute.xlu0 %3742 }
 0x568   :  { %v7555_v20 = vpop.permute.xlu1 %3777 }
 0x56a   :  { %v7553_v62 = vpop.permute.xlu0 %3756 }
 0x56c   :  { %v7559_v12 = vpop.permute.xlu1 %3791 }
 0x56e   :  { %v7557_v56 = vpop.permute.xlu0 %3770 }
 0x570   :  { %v7563_v38 = vpop.permute.xlu1 %3805 }
 0x572   :  { %v7561_v42 = vpop.permute.xlu0 %3784 }
 0x574   :  { %v3820_v10 = vpop.permute.xlu1 %3819 }
 0x576   :  { %v7565_v59 = vpop.permute.xlu0 %3798 }
 0x57a   :  { %v3813_v19 = vpop.permute.xlu0 %3812 }
 0x5d6   :  { %v3586_v41 = vpop.xlane.xlu1 %3585 }
 0x5d7   :  { %v7567_v23 = vmax.f32 %v3586_v41, 0.0 }
 0x5d9   :  { %v7570_v44 = vmul.f32 %v3813_v19, %v7567_v23  ;;  %v7573_v17 = vmul.f32 %v3820_v10, %v7567_v23 }
 0x5da   :  { %v3583_v15 = vpop.xlane.xlu0 %3582 }
 0x5db   :  { %v7575_v53 = vmax.f32 %v3583_v15, 0.0 }
 0x5dd   :  { %v3853_v28 = vmul.f32 %v7509_v5, %v7575_v53  ;;  %v3854_v29 = vmul.f32 %v7507_v63, %v7575_v53  ;;  %v3855_v41 = vmul.f32 %v7513_v14, %v7575_v53  ;;  %v3856_v43 = vmul.f32 %v7511_v1, %v7575_v53 }
 0x5de   :  { %v7586_v6 = vmul.f32 %v3813_v19, %v7575_v53  ;;  %v7589_v15 = vmul.f32 %v3820_v10, %v7575_v53  ;;  %v3857_v57 = vmul.f32 %v7517_v49, %v7575_v53  ;;  %v3861_v19 = vmul.f32 %v7525_v40, %v7575_v53 }
 0x5df   :  { %3985 = vperm.xlu1 %5518, %v3854_v29   ;;  %3982 = vperm.xlu0 %5517, %v3853_v28   ;;  %v3858_v28 = vmul.f32 %v7515_v55, %v7575_v53  ;;  %v3859_v29 = vmul.f32 %v7521_v50, %v7575_v53  ;;  %v3864_v10 = vmul.f32 %v7527_v2, %v7575_v53 }
 0x5e3   :  { %3988 = vperm.xlu1 %5518, %v3855_v41   ;;  %3991 = vperm.xlu0 %5517, %v3856_v43   ;;  %v3860_v41 = vmul.f32 %v7519_v33, %v7575_v53  ;;  %v3862_v43 = vmul.f32 %v7523_v21, %v7575_v53 }
 0x5e7   :  { %3994 = vperm.xlu1 %5518, %v3857_v57   ;;  %3997 = vperm.xlu0 %5517, %v3858_v28   ;;  %v3863_v57 = vmul.f32 %v7529_v34, %v7575_v53  ;;  %v3865_v28 = vmul.f32 %v7533_v18, %v7575_v53 }
 0x5eb   :  { %4000 = vperm.xlu1 %5518, %v3859_v29   ;;  %4003 = vperm.xlu0 %5517, %v3860_v41   ;;  %v3866_v29 = vmul.f32 %v7531_v16, %v7575_v53  ;;  %v3867_v41 = vmul.f32 %v7537_v45, %v7575_v53 }
 0x5ef   :  { %4006 = vperm.xlu1 %5518, %v3861_v19   ;;  %4009 = vperm.xlu0 %5517, %v3862_v43   ;;  %v3868_v19 = vmul.f32 %v7535_v11, %v7575_v53  ;;  %v3869_v43 = vmul.f32 %v7541_v47, %v7575_v53 }
 0x5f3   :  { %4012 = vperm.xlu1 %5518, %v3863_v57   ;;  %4015 = vperm.xlu0 %5517, %v3864_v10   ;;  %v3870_v57 = vmul.f32 %v7539_v13, %v7575_v53  ;;  %v3871_v10 = vmul.f32 %v7545_v36, %v7575_v53 }
 0x5f7   :  { %4018 = vperm.xlu1 %5518, %v3865_v28   ;;  %4021 = vperm.xlu0 %5517, %v3866_v29   ;;  %v3872_v28 = vmul.f32 %v7543_v30, %v7575_v53  ;;  %v3873_v29 = vmul.f32 %v7549_v54, %v7575_v53 }
 0x5fb   :  { %4024 = vperm.xlu1 %5518, %v3867_v41   ;;  %4027 = vperm.xlu0 %5517, %v3868_v19   ;;  %v3874_v41 = vmul.f32 %v7547_v31, %v7575_v53  ;;  %v3875_v19 = vmul.f32 %v7553_v62, %v7575_v53 }
 0x5ff   :  { %4030 = vperm.xlu1 %5518, %v3869_v43   ;;  %4033 = vperm.xlu0 %5517, %v3870_v57   ;;  %v3876_v43 = vmul.f32 %v7551_v7, %v7575_v53  ;;  %v3877_v57 = vmul.f32 %v7557_v56, %v7575_v53 }
 0x603   :  { %4036 = vperm.xlu1 %5518, %v3871_v10   ;;  %4039 = vperm.xlu0 %5517, %v3872_v28   ;;  %v3878_v10 = vmul.f32 %v7555_v20, %v7575_v53  ;;  %v3885_v28 = vmul.f32 %v7509_v5, %v7567_v23  ;;  %v3902_v5 = vmul.f32 %v7539_v13, %v7567_v23 }
 0x604   :  { %v3910_v13 = vmul.f32 %v7555_v20, %v7567_v23  ;;  %v3880_v20 = vmul.f32 %v7559_v12, %v7575_v53 }
 0x607   :  { %4042 = vperm.xlu1 %5518, %v3873_v29   ;;  %4045 = vperm.xlu0 %5517, %v3874_v41   ;;  %v3886_v29 = vmul.f32 %v7507_v63, %v7567_v23  ;;  %v3893_v41 = vmul.f32 %v7525_v40, %v7567_v23  ;;  %v3901_v63 = vmul.f32 %v7541_v47, %v7567_v23 }
 0x608   :  { %v3896_v40 = vmul.f32 %v7527_v2, %v7567_v23  ;;  %v3879_v47 = vmul.f32 %v7561_v42, %v7575_v53  ;;  %v3897_v2 = vmul.f32 %v7533_v18, %v7567_v23  ;;  %v3905_v18 = vmul.f32 %v7549_v54, %v7567_v23 }
 0x609   :  { %v3913_v54 = vmul.f32 %v7565_v59, %v7567_v23 }
 0x60b   :  { %4048 = vperm.xlu1 %5518, %v3875_v19   ;;  %4051 = vperm.xlu0 %5517, %v3876_v43   ;;  %v3894_v19 = vmul.f32 %v7523_v21, %v7567_v23  ;;  %v3887_v43 = vmul.f32 %v7513_v14, %v7567_v23  ;;  %v3888_v21 = vmul.f32 %v7511_v1, %v7567_v23 }
 0x60c   :  { %v3903_v14 = vmul.f32 %v7545_v36, %v7567_v23  ;;  %v3889_v1 = vmul.f32 %v7517_v49, %v7567_v23  ;;  %v3904_v36 = vmul.f32 %v7543_v30, %v7567_v23  ;;  %v3898_v49 = vmul.f32 %v7531_v16, %v7567_v23 }
 0x60d   :  { %v3912_v30 = vmul.f32 %v7559_v12, %v7567_v23  ;;  %v3906_v16 = vmul.f32 %v7547_v31, %v7567_v23  ;;  %v3882_v12 = vmul.f32 %v7563_v38, %v7575_v53  ;;  %v3914_v31 = vmul.f32 %v7563_v38, %v7567_v23 }
 0x60e   :  { %v7708_v38 = vand.u32 127, %v1669_v52 }
 0x60f   :  { %4054 = vperm.xlu1 %5518, %v3877_v57   ;;  %4057 = vperm.xlu0 %5517, %v3878_v10   ;;  %v3895_v57 = vmul.f32 %v7529_v34, %v7567_v23  ;;  %v3909_v34 = vmul.f32 %v7557_v56, %v7567_v23  ;;  %v3911_v56 = vmul.f32 %v7561_v42, %v7567_v23 }
 0x610   :  { %v3890_v10 = vmul.f32 %v7515_v55, %v7567_v23  ;;  %v3881_v42 = vmul.f32 %v7565_v59, %v7575_v53  ;;  %v3891_v55 = vmul.f32 %v7521_v50, %v7567_v23  ;;  %v3900_v50 = vmul.f32 %v7535_v11, %v7567_v23 }
 0x611   :  { %v3908_v53 = vmul.f32 %v7551_v7, %v7567_v23 }
 0x613   :  { %4078 = vperm.xlu1 %5518, %v3885_v28   ;;  %4081 = vperm.xlu0 %5517, %v3886_v29   ;;  %v3899_v28 = vmul.f32 %v7537_v45, %v7567_v23  ;;  %v3892_v29 = vmul.f32 %v7519_v33, %v7567_v23  ;;  %v3907_v45 = vmul.f32 %v7553_v62, %v7567_v23 }
 0x614   :  { %v7712_v23 = vsub.s32 %v7708_v38, %v6627_v58 }
 0x617   :  { %4102 = vperm.xlu1 %5518, %v3893_v41   ;;  %4105 = vperm.xlu0 %5517, %v3894_v19  }
 0x61b   :  { %4084 = vperm.xlu1 %5518, %v3887_v43   ;;  %4108 = vperm.xlu0 %5517, %v3895_v57  }
 0x61f   :  { %4126 = vperm.xlu1 %5518, %v3901_v63   ;;  %4129 = vperm.xlu0 %5517, %v3902_v5  }
 0x623   :  { %4087 = vperm.xlu1 %5518, %v3888_v21   ;;  %4111 = vperm.xlu0 %5517, %v3896_v40  }
 0x627   :  { %4132 = vperm.xlu1 %5518, %v3903_v14   ;;  %4150 = vperm.xlu0 %5517, %v3909_v34  }
 0x62b   :  { %4153 = vperm.xlu1 %5518, %v3910_v13   ;;  %4060 = vperm.xlu0 %5517, %v3879_v47  }
 0x62f   :  { %4090 = vperm.xlu1 %5518, %v3889_v1   ;;  %4114 = vperm.xlu0 %5517, %v3897_v2  }
 0x633   :  { %4135 = vperm.xlu1 %5518, %v3904_v36   ;;  %4156 = vperm.xlu0 %5517, %v3911_v56  }
 0x637   :  { %4063 = vperm.xlu1 %5518, %v3880_v20   ;;  %4093 = vperm.xlu0 %5517, %v3890_v10  }
 0x63b   :  { %4117 = vperm.xlu1 %5518, %v3898_v49   ;;  %4138 = vperm.xlu0 %5517, %v3905_v18  }
 0x63f   :  { %4159 = vperm.xlu1 %5518, %v3912_v30   ;;  %4066 = vperm.xlu0 %5517, %v3881_v42  }
 0x643   :  { %4096 = vperm.xlu1 %5518, %v3891_v55   ;;  %4120 = vperm.xlu0 %5517, %v3899_v28  }
 0x647   :  { %4141 = vperm.xlu1 %5518, %v3906_v16   ;;  %4162 = vperm.xlu0 %5517, %v3913_v54  }
 0x64b   :  { %4069 = vperm.xlu1 %5518, %v3882_v12   ;;  %4099 = vperm.xlu0 %5517, %v3892_v29  }
 0x64f   :  { %4123 = vperm.xlu1 %5518, %v3900_v50   ;;  %4144 = vperm.xlu0 %5517, %v3907_v45  }
 0x653   :  { %4165 = vperm.xlu1 %5518, %v3914_v31   ;;  %4072 = vperm.xlu0 %5517, %v7586_v6  }
 0x657   :  { %4147 = vperm.xlu1 %5518, %v3908_v53   ;;  %4168 = vperm.xlu0 %5517, %v7570_v44  }
 0x65a   :  { %v3986_v33 = vpop.permute.xlu1 %3985  ;;  %v3983_v59 = vpop.permute.xlu0 %3982 }
 0x65b   :  { %4075 = vperm.xlu1 %5518, %v7589_v15   ;;  %4171 = vperm.xlu0 %5517, %v7573_v17   ;;  %v4182_v43 = vrot.slane %v3986_v33, %v7712_v23  ;;  %v4178_v15 = vrot.slane %v3983_v59, %v7712_v23 }
 0x65d   :  { %v4432_v21 = vsel %vm4431_vm5, %v4182_v43, %v4178_v15 }
 0x65e   :  { %v3989_v11 = vpop.permute.xlu1 %3988  ;;  %v3992_v62 = vpop.permute.xlu0 %3991 }
 0x65f   :  { %v4186_v17 = vrot.slane %v3989_v11, %v7712_v23  ;;  %v4190_v40 = vrot.slane %v3992_v62, %v7712_v23 }
 0x661   :  { %v4434_v13 = vsel %vm4433_vm6, %v4186_v17, %v4432_v21 }
 0x662   :  { %v3995_v41 = vpop.permute.xlu1 %3994  ;;  %v3998_v19 = vpop.permute.xlu0 %3997  ;;  %v4436_v20 = vsel %vm4435_vm7, %v4190_v40, %v4434_v13 }
 0x663   :  { %v4194_v47 = vrot.slane %v3995_v41, %v7712_v23  ;;  %v4198_v10 = vrot.slane %v3998_v19, %v7712_v23 }
 0x665   :  { %v4438_v30 = vsel %vm4437_vm8, %v4194_v47, %v4436_v20 }
 0x666   :  { %v4001_v6 = vpop.permute.xlu1 %4000  ;;  %v4004_v7 = vpop.permute.xlu0 %4003  ;;  %v4440_v12 = vsel %vm4439_vm9, %v4198_v10, %v4438_v30 }
 0x667   :  { %v4202_v42 = vrot.slane %v4001_v6, %v7712_v23  ;;  %v4206_v29 = vrot.slane %v4004_v7, %v7712_v23 }
 0x669   :  { %v4442_v33 = vsel %vm4441_vm10, %v4202_v42, %v4440_v12 }
 0x66a   :  { %v4007_v44 = vpop.permute.xlu1 %4006  ;;  %v4010_v57 = vpop.permute.xlu0 %4009  ;;  %v4444_v7 = vsel %vm4443_vm11, %v4206_v29, %v4442_v33 }
 0x66b   :  { %v4210_v63 = vrot.slane %v4007_v44, %v7712_v23  ;;  %v4214_v52 = vrot.slane %v4010_v57, %v7712_v23  ;;  %v4503_v57 = vsel %vm4502_vm12, %v4444_v7, 0.0 }
 0x66d   :  { %v4445_v1 = vsel %vm4431_vm5, %v4214_v52, %v4210_v63 }
 0x66e   :  { %v4013_v5 = vpop.permute.xlu1 %4012  ;;  %v4016_v34 = vpop.permute.xlu0 %4015 }
 0x66f   :  { %v4218_v14 = vrot.slane %v4013_v5, %v7712_v23  ;;  %v4222_v2 = vrot.slane %v4016_v34, %v7712_v23 }
 0x671   :  { %v4446_v36 = vsel %vm4433_vm6, %v4218_v14, %v4445_v1 }
 0x672   :  { %v4019_v56 = vpop.permute.xlu1 %4018  ;;  %v4022_v18 = vpop.permute.xlu0 %4021  ;;  %v4447_v55 = vsel %vm4435_vm7, %v4222_v2, %v4446_v36 }
 0x673   :  { %v4226_v49 = vrot.slane %v4019_v56, %v7712_v23  ;;  %v4230_v28 = vrot.slane %v4022_v18, %v7712_v23 }
 0x675   :  { %v4448_v16 = vsel %vm4437_vm8, %v4226_v49, %v4447_v55 }
 0x676   :  { %v4025_v54 = vpop.permute.xlu1 %4024  ;;  %v4028_v45 = vpop.permute.xlu0 %4027  ;;  %v4449_v31 = vsel %vm4439_vm9, %v4230_v28, %v4448_v16 }
 0x677   :  { %v4234_v50 = vrot.slane %v4025_v54, %v7712_v23  ;;  %v4238_v53 = vrot.slane %v4028_v45, %v7712_v23 }
 0x679   :  { %v4450_v59 = vsel %vm4441_vm10, %v4234_v50, %v4449_v31 }
 0x67a   :  { %v4031_v11 = vpop.permute.xlu1 %4030  ;;  %v4451_v62 = vsel %vm4443_vm11, %v4238_v53, %v4450_v59  ;;  %v4034_v19 = vpop.permute.xlu0 %4033 }
 0x67b   :  { %v4242_v41 = vrot.slane %v4031_v11, %v7712_v23  ;;  %v4506_v6 = vsel %vm4502_vm12, %v4451_v62, 0.0  ;;  %v4246_v44 = vrot.slane %v4034_v19, %v7712_v23 }
 0x67c   :  { %4507 = vadd.xlane.f32.xlu0 %v4506_v6 }
 0x67d   :  { %v4452_v43 = vsel %vm4431_vm5, %v4246_v44, %v4242_v41 }
 0x67e   :  { %v4037_v15 = vpop.permute.xlu1 %4036  ;;  %v4040_v63 = vpop.permute.xlu0 %4039 }
 0x67f   :  { %v4250_v17 = vrot.slane %v4037_v15, %v7712_v23  ;;  %4504 = vadd.xlane.f32.xlu1 %v4503_v57  ;;  %v4254_v52 = vrot.slane %v4040_v63, %v7712_v23 }
 0x681   :  { %v4453_v5 = vsel %vm4433_vm6, %v4250_v17, %v4452_v43 }
 0x682   :  { %v4454_v21 = vsel %vm4435_vm7, %v4254_v52, %v4453_v5  ;;  %v4043_v40 = vpop.permute.xlu1 %4042  ;;  %v4046_v34 = vpop.permute.xlu0 %4045 }
 0x683   :  { %v4258_v14 = vrot.slane %v4043_v40, %v7712_v23  ;;  %v4262_v13 = vrot.slane %v4046_v34, %v7712_v23 }
 0x685   :  { %v4455_v47 = vsel %vm4437_vm8, %v4258_v14, %v4454_v21 }
 0x686   :  { %v4456_v1 = vsel %vm4439_vm9, %v4262_v13, %v4455_v47  ;;  %v4049_v2 = vpop.permute.xlu1 %4048  ;;  %v4052_v56 = vpop.permute.xlu0 %4051 }
 0x687   :  { %v4266_v36 = vrot.slane %v4049_v2, %v7712_v23  ;;  %v4270_v20 = vrot.slane %v4052_v56, %v7712_v23 }
 0x689   :  { %v4457_v10 = vsel %vm4441_vm10, %v4266_v36, %v4456_v1 }
 0x68a   :  { %v4055_v49 = vpop.permute.xlu1 %4054  ;;  %v7761_v18 = vsel %vm4443_vm11, %v4270_v20, %v4457_v10  ;;  %v4058_v42 = vpop.permute.xlu0 %4057 }
 0x68b   :  { %v4274_v30 = vrot.slane %v4055_v49, %v7712_v23  ;;  %v4278_v55 = vrot.slane %v4058_v42, %v7712_v23 }
 0x68d   :  { %v7766_v28 = vsel %vm4431_vm5, %v4278_v55, %v4274_v30 }
 0x68e   :  { %v4079_v16 = vpop.permute.xlu1 %4078  ;;  %v4082_v54 = vpop.permute.xlu0 %4081 }
 0x68f   :  { %v4306_v14 = vrot.slane %v4079_v16, %v7712_v23  ;;  %v4310_v34 = vrot.slane %v4082_v54, %v7712_v23 }
 0x691   :  { %v4466_v10 = vsel %vm4431_vm5, %v4310_v34, %v4306_v14 }
 0x692   :  { %v4103_v12 = vpop.permute.xlu1 %4102  ;;  %v4106_v29 = vpop.permute.xlu0 %4105 }
 0x693   :  { %v4338_v2 = vrot.slane %v4103_v12, %v7712_v23  ;;  %v4342_v36 = vrot.slane %v4106_v29, %v7712_v23 }
 0x696   :  { %v4085_v50 = vpop.permute.xlu1 %4084  ;;  %v4109_v45 = vpop.permute.xlu0 %4108 }
 0x697   :  { %v4314_v13 = vrot.slane %v4085_v50, %v7712_v23  ;;  %v4346_v49 = vrot.slane %v4109_v45, %v7712_v23  ;;  %v4473_v50 = vsel %vm4431_vm5, %v4342_v36, %v4338_v2 }
 0x699   :  { %v4467_v42 = vsel %vm4433_vm6, %v4314_v13, %v4466_v10 }
 0x69a   :  { %v7768_v31 = vpop.permute.xlu1 %4126  ;;  %v7770_v53 = vpop.permute.xlu0 %4129 }
 0x69b   :  { %v4370_v13 = vrot.slane %v7768_v31, %v7712_v23  ;;  %v4374_v36 = vrot.slane %v7770_v53, %v7712_v23 }
 0x69e   :  { %v4088_v33 = vpop.permute.xlu1 %4087  ;;  %v4112_v59 = vpop.permute.xlu0 %4111 }
 0x69f   :  { %v4318_v47 = vrot.slane %v4088_v33, %v7712_v23  ;;  %v4350_v55 = vrot.slane %v4112_v59, %v7712_v23 }
 0x6a1   :  { %v4468_v54 = vsel %vm4435_vm7, %v4318_v47, %v4467_v42 }
 0x6a2   :  { %v7772_v11 = vpop.permute.xlu1 %4132  ;;  %v7774_v62 = vpop.permute.xlu0 %4150 }
 0x6a6   :  { %v7776_v41 = vpop.permute.xlu1 %4153  ;;  %v7778_v19 = vpop.permute.xlu0 %4060 }
 0x6a7   :  { %v4406_v53 = vrot.slane %v7776_v41, %v7712_v23  ;;  %v4402_v41 = vrot.slane %v7774_v62, %v7712_v23 }
 0x6aa   :  { %v4091_v6 = vpop.permute.xlu1 %4090  ;;  %v4115_v7 = vpop.permute.xlu0 %4114 }
 0x6ab   :  { %v4322_v56 = vrot.slane %v4091_v6, %v7712_v23  ;;  %v4354_v12 = vrot.slane %v4115_v7, %v7712_v23 }
 0x6ad   :  { %v4469_v33 = vsel %vm4437_vm8, %v4322_v56, %v4468_v54 }
 0x6ae   :  { %v7780_v44 = vpop.permute.xlu1 %4135  ;;  %v7782_v43 = vpop.permute.xlu0 %4156 }
 0x6af   :  { %v4382_v42 = vrot.slane %v7780_v44, %v7712_v23  ;;  %v4509_v44 = vsel %vm4502_vm12, %v7761_v18, 0.0  ;;  %v4487_v18 = vsel %vm4431_vm5, %v4406_v53, %v4402_v41 }
 0x6b2   :  { %v7784_v15 = vpop.permute.xlu1 %4063  ;;  %v4094_v57 = vpop.permute.xlu0 %4093 }
 0x6b3   :  { %v4326_v30 = vrot.slane %v4094_v57, %v7712_v23  ;;  %v4474_v57 = vsel %vm4433_vm6, %v4346_v49, %v4473_v50  ;;  %v4480_v50 = vsel %vm4431_vm5, %v4374_v36, %v4370_v13 }
 0x6b4   :  { %v4475_v34 = vsel %vm4435_vm7, %v4350_v55, %v4474_v57 }
 0x6b5   :  { %v4470_v14 = vsel %vm4439_vm9, %v4326_v30, %v4469_v33  ;;  %v4476_v47 = vsel %vm4437_vm8, %v4354_v12, %v4475_v34  ;;  %v4378_v30 = vrot.slane %v7772_v11, %v7712_v23 }
 0x6b6   :  { %v4118_v17 = vpop.permute.xlu1 %4117  ;;  %v7786_v63 = vpop.permute.xlu0 %4138 }
 0x6b7   :  { %v4358_v45 = vrot.slane %v4118_v17, %v7712_v23 }
 0x6b9   :  { %v4477_v56 = vsel %vm4439_vm9, %v4358_v45, %v4476_v47  ;;  %v4481_v45 = vsel %vm4433_vm6, %v4378_v30, %v4480_v50 }
 0x6ba   :  { %v7788_v52 = vpop.permute.xlu1 %4159  ;;  %v7790_v5 = vpop.permute.xlu0 %4066  ;;  %v4482_v57 = vsel %vm4435_vm7, %v4382_v42, %v4481_v45 }
 0x6bb   :  { %v4414_v62 = vrot.slane %v7788_v52, %v7712_v23 }
 0x6be   :  { %v4097_v21 = vpop.permute.xlu1 %4096  ;;  %v4121_v40 = vpop.permute.xlu0 %4120 }
 0x6bf   :  { %v4330_v16 = vrot.slane %v4097_v21, %v7712_v23  ;;  %v4362_v59 = vrot.slane %v4121_v40, %v7712_v23 }
 0x6c1   :  { %v4471_v7 = vsel %vm4441_vm10, %v4330_v16, %v4470_v14  ;;  %v4478_v31 = vsel %vm4441_vm10, %v4362_v59, %v4477_v56  ;;  %v4386_v16 = vrot.slane %v7786_v63, %v7712_v23  ;;  %v4282_v63 = vrot.slane %v7778_v19, %v7712_v23 }
 0x6c2   :  { %v4142_v1 = vpop.permute.xlu1 %4141  ;;  %v7799_v20 = vpop.permute.xlu0 %4162  ;;  %v4286_v14 = vrot.slane %v7784_v15, %v7712_v23  ;;  %v4290_v19 = vrot.slane %v7790_v5, %v7712_v23 }
 0x6c3   :  { %v4390_v11 = vrot.slane %v4142_v1, %v7712_v23  ;;  %v4410_v1 = vrot.slane %v7782_v43, %v7712_v23  ;;  %v4483_v59 = vsel %vm4437_vm8, %v4386_v16, %v4482_v57  ;;  %v4460_v47 = vsel %vm4433_vm6, %v4282_v63, %v7766_v28 }
 0x6c4   :  { %v4461_v36 = vsel %vm4435_vm7, %v4286_v14, %v4460_v47 }
 0x6c5   :  { %v4484_v34 = vsel %vm4439_vm9, %v4390_v11, %v4483_v59 }
 0x6c6   :  { %v7809_v29 = vpop.permute.xlu1 %4069  ;;  %v4100_v6 = vpop.permute.xlu0 %4099 }
 0x6c7   :  { %v4334_v21 = vrot.slane %v4100_v6, %v7712_v23  ;;  %v4294_v43 = vrot.slane %v7809_v29, %v7712_v23 }
 0x6c9   :  { %v4472_v17 = vsel %vm4443_vm11, %v4334_v21, %v4471_v7  ;;  %v4418_v7 = vrot.slane %v7799_v20, %v7712_v23 }
 0x6ca   :  { %v4124_v2 = vpop.permute.xlu1 %4123  ;;  %v4145_v10 = vpop.permute.xlu0 %4144  ;;  %v4515_v49 = vsel %vm4502_vm12, %v4472_v17, 0.0  ;;  %v4488_v17 = vsel %vm4433_vm6, %v4410_v1, %v4487_v18 }
 0x6cb   :  { %v4366_v40 = vrot.slane %v4124_v2, %v7712_v23  ;;  %4516 = vadd.xlane.f32.xlu0 %v4515_v49  ;;  %v4394_v6 = vrot.slane %v4145_v10, %v7712_v23  ;;  %v4489_v56 = vsel %vm4435_vm7, %v4414_v62, %v4488_v17 }
 0x6cc   :  { %v4490_v49 = vsel %vm4437_vm8, %v4418_v7, %v4489_v56 }
 0x6cd   :  { %v4479_v55 = vsel %vm4443_vm11, %v4366_v40, %v4478_v31  ;;  %v4485_v5 = vsel %vm4441_vm10, %v4394_v6, %v4484_v34  ;;  %v4462_v40 = vsel %vm4437_vm8, %v4290_v19, %v4461_v36 }
 0x6ce   :  { %v4166_v54 = vpop.permute.xlu1 %4165  ;;  %v4518_v12 = vsel %vm4502_vm12, %v4479_v55, 0.0  ;;  %v4073_v33 = vpop.permute.xlu0 %4072  ;;  %v4463_v30 = vsel %vm4439_vm9, %v4294_v43, %v4462_v40 }
 0x6cf   :  { %4519 = vadd.xlane.f32.xlu1 %v4518_v12  ;;  %4510 = vadd.xlane.f32.xlu0 %v4509_v44  ;;  %v4422_v52 = vrot.slane %v4166_v54, %v7712_v23  ;;  %v4298_v2 = vrot.slane %v4073_v33, %v7712_v23 }
 0x6d1   :  { %v4491_v55 = vsel %vm4439_vm9, %v4422_v52, %v4490_v49  ;;  %v4464_v16 = vsel %vm4441_vm10, %v4298_v2, %v4463_v30 }
 0x6d2   :  { %v4148_v21 = vpop.permute.xlu1 %4147  ;;  %v4169_v13 = vpop.permute.xlu0 %4168 }
 0x6d3   :  { %v4398_v15 = vrot.slane %v4148_v21, %v7712_v23  ;;  %v4426_v20 = vrot.slane %v4169_v13, %v7712_v23 }
 0x6d5   :  { %v4486_v29 = vsel %vm4443_vm11, %v4398_v15, %v4485_v5  ;;  %v4492_v12 = vsel %vm4441_vm10, %v4426_v20, %v4491_v55 }
 0x6d6   :  { %v4076_v10 = vpop.permute.xlu1 %4075  ;;  %v4521_v28 = vsel %vm4502_vm12, %v4486_v29, 0.0  ;;  %v4172_v42 = vpop.permute.xlu0 %4171 }
 0x6d7   :  { %v4302_v31 = vrot.slane %v4076_v10, %v7712_v23  ;;  %4522 = vadd.xlane.f32.xlu1 %v4521_v28  ;;  %v4430_v53 = vrot.slane %v4172_v42, %v7712_v23  ;;  %v4587_v42 = vadd.s32 4294967288, %v7708_v38 }
 0x6d9   :  { %v4465_v54 = vsel %vm4443_vm11, %v4302_v31, %v4464_v16  ;;  %v4493_v11 = vsel %vm4443_vm11, %v4430_v53, %v4492_v12  ;;  %v4594_v31 = vadd.s32 4294967280, %v7708_v38  ;;  %v4601_v16 = vadd.s32 4294967272, %v7708_v38 }
 0x6da   :  { %v4512_v50 = vsel %vm4502_vm12, %v4465_v54, 0.0  ;;  %v4524_v33 = vsel %vm4502_vm12, %v4493_v11, 0.0  ;;  %v4590_v11 = vsub.s32 %v4587_v42, %v6627_v58 }
 0x6db   :  { %4513 = vadd.xlane.f32.xlu0 %v4512_v50  ;;  %4525 = vadd.xlane.f32.xlu1 %v4524_v33  ;;  %v4597_v12 = vsub.s32 %v4594_v31, %v6627_v58 }
 0x705   :  { %v4508_v44 = vpop.xlane.xlu0 %4507 }
 0x706   :  { %v5063_v63 = vmul.f32 -1.442695, %v4508_v44 }
 0x708   :  { %v4505_v45 = vpop.xlane.xlu1 %4504  ;;  %5579 = vpow2.f32 %v5063_v63 }
 0x709   :  { %v5062_v6 = vmul.f32 -1.442695, %v4505_v45 }
 0x70b   :  { %5581 = vpow2.f32 %v5062_v6 }
 0x715   :  { %v5580_v15 = vpop.eup %5579 }
 0x716   :  { %v4552_v2 = vadd.f32 1.0, %v5580_v15 }
 0x718   :  { %v5582_v13 = vpop.eup %5581 }
 0x719   :  { %v4551_v5 = vadd.f32 1.0, %v5582_v13 }
 0x754   :  { %v4517_v41 = vpop.xlane.xlu0 %4516 }
 0x755   :  { %v5066_v59 = vmul.f32 -1.442695, %v4517_v41  ;;  %v4604_v41 = vsub.s32 %v4601_v16, %v6627_v58 }
 0x758   :  { %v4520_v57 = vpop.xlane.xlu1 %4519  ;;  %v4511_v14 = vpop.xlane.xlu0 %4510 }
 0x759   :  { %v5067_v1 = vmul.f32 -1.442695, %v4520_v57  ;;  %v5064_v18 = vmul.f32 -1.442695, %v4511_v14 }
 0x75b   :  { %5583 = vpow2.f32 %v5067_v1 }
 0x75c   :  { %5585 = vpow2.f32 %v5064_v18 }
 0x75d   :  { %5587 = vpow2.f32 %v5066_v59 }
 0x760   :  { %v4523_v62 = vpop.xlane.xlu1 %4522 }
 0x761   :  { %v5068_v19 = vmul.f32 -1.442695, %v4523_v62 }
 0x763   :  { %5589 = vpow2.f32 %v5068_v19 }
 0x764   :  { %v4514_v21 = vpop.xlane.xlu0 %4513  ;;  %v4526_v34 = vpop.xlane.xlu1 %4525 }
 0x765   :  { %v5065_v7 = vmul.f32 -1.442695, %v4514_v21  ;;  %v5069_v43 = vmul.f32 -1.442695, %v4526_v34 }
 0x767   :  { %5591 = vpow2.f32 %v5065_v7 }
 0x768   :  { %5593 = vpow2.f32 %v5069_v43  ;;  %v5584_v47 = vpop.eup %5583 }
 0x769   :  { %v5586_v52 = vpop.eup %5585  ;;  %v4556_v36 = vadd.f32 1.0, %v5584_v47  ;;  %5595 = vrcp.f32 %v4552_v2  ;;  %v7974_v2 = vmax.f32 %v7443_v37, 0.0  ;;  %v7980_v37 = vmax.f32 %v7392_v22, 0.0 }
 0x76a   :  { %v5588_v17 = vpop.eup %5587  ;;  %v4553_v20 = vadd.f32 1.0, %v5586_v52  ;;  %5597 = vrcp.f32 %v4551_v5  ;;  %v7984_v22 = vmax.f32 %v7436_v39, 0.0 }
 0x76b   :  { %v4555_v56 = vadd.f32 1.0, %v5588_v17  ;;  %5599 = vrcp.f32 %v4556_v36  ;;  %v7975_v17 = vmax.f32 %v7454_v60, 0.0 }
 0x76c   :  { %5601 = vrcp.f32 %v4553_v20  ;;  %v7976_v20 = vmax.f32 %v7469_v51, 0.0 }
 0x770   :  { %v5590_v29 = vpop.eup %5589 }
 0x771   :  { %v4557_v40 = vadd.f32 1.0, %v5590_v29 }
 0x773   :  { %5603 = vrcp.f32 %v4557_v40 }
 0x774   :  { %v5592_v10 = vpop.eup %5591  ;;  %5605 = vrcp.f32 %v4555_v56 }
 0x775   :  { %v4554_v28 = vadd.f32 1.0, %v5592_v10  ;;  %v5594_v49 = vpop.eup %5593 }
 0x776   :  { %v4558_v30 = vadd.f32 1.0, %v5594_v49  ;;  %v5596_v55 = vpop.eup %5595 }
 0x777   :  { %5607 = vrcp.f32 %v4554_v28  ;;  %v5598_v53 = vpop.eup %5597  ;;  %v4591_v57 = vrot.slane %v5596_v55, %v4590_v11 }
 0x778   :  { %5609 = vrcp.f32 %v4558_v30  ;;  %v5600_v54 = vpop.eup %5599  ;;  %v4586_v45 = vrot.slane %v5598_v53, %v7712_v23 }
 0x779   :  { %v5602_v50 = vpop.eup %5601  ;;  %v4615_v63 = vrot.slane %v5600_v54, %v4590_v11 }
 0x77a   :  { %v4598_v6 = vrot.slane %v5602_v50, %v4597_v12  ;;  %v4593_v18 = vsel %vm4592_vm13, %v4591_v57, %v4586_v45 }
 0x77c   :  { %v4600_v21 = vsel %vm4599_vm15, %v4598_v6, %v4593_v18 }
 0x780   :  { %v5604_v33 = vpop.eup %5603 }
 0x781   :  { %v5606_v44 = vpop.eup %5605  ;;  %v4620_v1 = vrot.slane %v5604_v33, %v4597_v12 }
 0x782   :  { %v4611_v38 = vrot.slane %v5606_v44, %v7712_v23  ;;  %v7973_v23 = vmax.f32 %v7433_v61, 0.0  ;;  %v7979_v61 = vmax.f32 %v7388_v4, 0.0  ;;  %v7983_v4 = vmax.f32 %v7417_v8, 0.0 }
 0x784   :  { %v5608_v14 = vpop.eup %5607  ;;  %v4616_v19 = vsel %vm4592_vm13, %v4615_v63, %v4611_v38 }
 0x785   :  { %v4605_v59 = vrot.slane %v5608_v14, %v4604_v41  ;;  %v5610_v62 = vpop.eup %5609  ;;  %v4621_v34 = vsel %vm4599_vm15, %v4620_v1, %v4616_v19 }
 0x786   :  { %v4625_v7 = vrot.slane %v5610_v62, %v4604_v41 }
 0x787   :  { %v4607_v43 = vsel %vm4606_vm0, %v4605_v59, %v4600_v21 }
 0x788   :  { %v4641_v58 = vmul.f32 %v4607_v43, %v3517_v48  ;;  %v4642_v15 = vmul.f32 %v4607_v43, %v3518_v27  ;;  %v4643_v13 = vmul.f32 %v4607_v43, %v3519_v3  ;;  %v4644_v47 = vmul.f32 %v4607_v43, %v7973_v23 }
 0x789   :  { %v4626_v52 = vsel %vm4606_vm0, %v4625_v7, %v4621_v34  ;;  %v4645_v5 = vmul.f32 %v4607_v43, %v7974_v2  ;;  %v4646_v36 = vmul.f32 %v4607_v43, %v7975_v17  ;;  %v4647_v9 = vmul.f32 %v4607_v43, %v7976_v20 }
 0x78a   :  { %v4649_v48 = vmul.f32 %v4626_v52, %v7977_v26  ;;  %v4650_v27 = vmul.f32 %v4626_v52, %v7978_v24  ;;  %v4651_v3 = vmul.f32 %v4626_v52, %v7979_v61  ;;  %v4652_v29 = vmul.f32 %v4626_v52, %v7980_v37  ;;  %4657 = vst.msk [vmem:[#allocation6] sm:$0xff] %vm1566_vm14, %v4641_v58 }
 0x78b   :  { %4658 = vst.msk [vmem:[#allocation6 + $0x8] sm:$0xff] %vm1566_vm14, %v4642_v15  ;;  %4659 = vst.msk [vmem:[#allocation6 + $0x10] sm:$0xff] %vm1566_vm14, %v4643_v13  ;;  %v4653_v60 = vmul.f32 %v4626_v52, %v7981_v46  ;;  %v4654_v51 = vmul.f32 %v4626_v52, %v7982_v32  ;;  %v4655_v56 = vmul.f32 %v4626_v52, %v7983_v4 }
 0x78c   :  { %4660 = vst.msk [vmem:[#allocation6 + $0x18] sm:$0xff] %vm1566_vm14, %v4644_v47  ;;  %v4656_v40 = vmul.f32 %v4626_v52, %v7984_v22  ;;  %4661 = vst.msk [vmem:[#allocation6 + $0x20] sm:$0xff] %vm1566_vm14, %v4645_v5  ;;  %v4648_v25 = vmul.f32 %v4607_v43, %v7985_v0 }
 0x78d   :  { %4662 = vst.msk [vmem:[#allocation6 + $0x28] sm:$0xff] %vm1566_vm14, %v4646_v36  ;;  %4663 = vst.msk [vmem:[#allocation6 + $0x30] sm:$0xff] %vm1566_vm14, %v4647_v9 }
 0x78e   :  { %4665 = vst.msk [vmem:[#allocation6 + $0x40] sm:$0xff] %vm1566_vm14, %v4649_v48  ;;  %4666 = vst.msk [vmem:[#allocation6 + $0x48] sm:$0xff] %vm1566_vm14, %v4650_v27 }
 0x78f   :  { %4667 = vst.msk [vmem:[#allocation6 + $0x50] sm:$0xff] %vm1566_vm14, %v4651_v3  ;;  %4668 = vst.msk [vmem:[#allocation6 + $0x58] sm:$0xff] %vm1566_vm14, %v4652_v29 }
 0x790   :  { %4669 = vst.msk [vmem:[#allocation6 + $0x60] sm:$0xff] %vm1566_vm14, %v4653_v60  ;;  %4670 = vst.msk [vmem:[#allocation6 + $0x68] sm:$0xff] %vm1566_vm14, %v4654_v51 }
 0x791   :  { %4671 = vst.msk [vmem:[#allocation6 + $0x70] sm:$0xff] %vm1566_vm14, %v4655_v56  ;;  %4672 = vst.msk [vmem:[#allocation6 + $0x78] sm:$0xff] %vm1566_vm14, %v4656_v40 }
 0x792   :  { %4664 = vst.msk [vmem:[#allocation6 + $0x38] sm:$0xff] %vm1566_vm14, %v4648_v25 }
 0x793   :  { %5622 = shalt.err (!%p5619_p4)
}
 0x794   :  { %s5647_s11 = smov 128  }
 0x795   :  { %4684 = dma.vmem_to_hbm [thread:$0]  %s4679_s4, 2048, %s7959_s9, [#allocation7], %s5647_s11, %s5647_s11, %s5636_s13  }
 0x796   :  { %5631 = dma.done.wait [#allocation7], 2048  }
 0x797   :  { %5632 = vsyncadd [#allocation7], 4294965248 }
 0x798   :  { %4688 = vsyncpa [#allocation7], 1 }

</bundles_post_ra>
